<compile_context>
chip_gen: v7x
topology: tpu7x:2x2x1
jax: 0.10.0
libtpu: 0.0.40
codegen_flags: <defaults>
</compile_context>

<pallas_src>
import numpy as np
import jax
import jax.numpy as jnp
from jax.experimental import pallas as pl
from jax.experimental.pallas import tpu as pltpu

MAP_SHAPE = (1, 80, 40)                 # map_shape in the PyTorch module
OUT_FEATURES = int(np.prod(MAP_SHAPE))  # 3200
LEAKY_SLOPE = 0.2
BN_EPS = 0.8                            # BatchNorm1d(out_feat, 0.8) -> eps=0.8

LATENT_DIM = 100
LATENT_PAD = 128                        # zero-padded latent (lane-aligned)
H1, H2, H3, H4 = 128, 256, 512, 1024

N_TILES = 5                             # 3200 = 5 * 640 ; 640 is a multiple of 128
TN = OUT_FEATURES // N_TILES            # 640


# ------------------------------ kernel body -------------------------------

def _lrelu(v):
    return jnp.where(v > 0, v, LEAKY_SLOPE * v)


def _bn(v, gamma, beta):
    # Training-mode BatchNorm1d: per-batch mean, biased variance, eps = 0.8.
    mean = jnp.mean(v, axis=0, keepdims=True)
    var = jnp.mean(jnp.square(v - mean), axis=0, keepdims=True)
    return (v - mean) * jax.lax.rsqrt(var + BN_EPS) * gamma + beta


def _generator_kernel(x_ref, w0_ref, b0_ref,
                      w1_ref, g1_ref, be1_ref,
                      w2_ref, g2_ref, be2_ref,
                      w3_ref, g3_ref, be3_ref,
                      w4_ref, b4_ref, o_ref):
    # Trunk (layers 0-3): weights are VMEM-resident (constant block index
    # across the grid -> a single DMA each), recomputed per output tile so the
    # grid axis stays "parallel" (megacore-splittable on v7x).  The recompute
    # is a few hundred kFLOPs at small batch — far below the w4 DMA cost.
    h = jnp.dot(x_ref[...], w0_ref[...],
                preferred_element_type=jnp.float32) + b0_ref[...]
    h = _lrelu(h)
    # Biases of the BN-fed layers are omitted: BatchNorm's batch-mean
    # subtraction cancels a per-feature constant bias exactly.
    h = _lrelu(_bn(jnp.dot(h.astype(jnp.bfloat16), w1_ref[...],
                           preferred_element_type=jnp.float32),
                   g1_ref[...], be1_ref[...]))
    h = _lrelu(_bn(jnp.dot(h.astype(jnp.bfloat16), w2_ref[...],
                           preferred_element_type=jnp.float32),
                   g2_ref[...], be2_ref[...]))
    h = _lrelu(_bn(jnp.dot(h.astype(jnp.bfloat16), w3_ref[...],
                           preferred_element_type=jnp.float32),
                   g3_ref[...], be3_ref[...]))
    # Last layer: one 640-wide N tile of Linear(1024, 3200) + Tanh (EUP).
    y = jnp.dot(h.astype(jnp.bfloat16), w4_ref[...],
                preferred_element_type=jnp.float32) + b4_ref[...]
    o_ref[...] = jnp.tanh(y)


# --------------------------- parameter creation ---------------------------

_LAYER_SIZES = [(LATENT_DIM, H1), (H1, H2), (H2, H3), (H3, H4), (H4, OUT_FEATURES)]
_BN_LAYERS = (1, 2, 3)   # layers followed by BatchNorm1d


def init_generator_params(key):
    """Mirrors the PyTorch init:
       Linear.weight: xavier_uniform_; Linear.bias: default U(+-1/sqrt(fan_in))
       BatchNorm.weight: N(1.0, 0.2); BatchNorm.bias: 0.
       Weights stored bf16 (the kernel is HBM-bandwidth-bound on weights);
       biases / BN affine params kept f32."""
    params = {}
    for i, (fin, fout) in enumerate(_LAYER_SIZES):
        key, kw, kb, kg = jax.random.split(key, 4)
        xavier_bound = float(np.sqrt(6.0 / (fin + fout)))
        # Stored as (in, out): kernel does x @ W directly (== PyTorch x @ W.T).
        w = jax.random.uniform(kw, (fin, fout), jnp.float32,
                               -xavier_bound, xavier_bound)
        if i == 0:
            # Zero-pad latent dim 100 -> 128; padded rows meet zero-padded x cols.
            w = jnp.pad(w, ((0, LATENT_PAD - fin), (0, 0)))
        params[f"w{i}"] = w.astype(jnp.bfloat16)
        if i in _BN_LAYERS:
            # Linear bias cancels against BN batch-mean subtraction -> dropped.
            params[f"gamma{i}"] = 1.0 + 0.2 * jax.random.normal(kg, (1, fout), jnp.float32)
            params[f"beta{i}"] = jnp.zeros((1, fout), jnp.float32)
        else:
            bias_bound = float(1.0 / np.sqrt(fin))
            params[f"b{i}"] = jax.random.uniform(kb, (1, fout), jnp.float32,
                                                 -bias_bound, bias_bound)
    return params


# ------------------------------ forward pass ------------------------------

def generator_forward(params, x):
    """x: (B, 100) float32 latent -> (B, 1, 80, 40) float32 in (-1, 1)."""
    b = x.shape[0]
    # Pad latent 100 -> 128 and pre-cast to bf16 (half the activation DMA;
    # identical to casting inside the kernel).
    x_pad = jnp.pad(x, ((0, 0), (0, LATENT_PAD - x.shape[1]))).astype(jnp.bfloat16)

    const = lambda j: (0, 0)   # resident across grid steps (single DMA)
    tiled = lambda j: (0, j)   # N-tiled, auto double-buffered / pipelined

    in_specs = [
        pl.BlockSpec((b, LATENT_PAD), const),     # x
        pl.BlockSpec((LATENT_PAD, H1), const),    # w0
        pl.BlockSpec((1, H1), const),             # b0
        pl.BlockSpec((H1, H2), const),            # w1
        pl.BlockSpec((1, H2), const),             # gamma1
        pl.BlockSpec((1, H2), const),             # beta1
        pl.BlockSpec((H2, H3), const),            # w2
        pl.BlockSpec((1, H3), const),             # gamma2
        pl.BlockSpec((1, H3), const),             # beta2
        pl.BlockSpec((H3, H4), const),            # w3
        pl.BlockSpec((1, H4), const),             # gamma3
        pl.BlockSpec((1, H4), const),             # beta3
        pl.BlockSpec((H4, TN), tiled),            # w4 (dominant weight, pipelined)
        pl.BlockSpec((1, TN), tiled),             # b4
    ]
    out_specs = pl.BlockSpec((b, TN), tiled)      # lane-dense 640-wide output tile

    args = (x_pad, params["w0"], params["b0"],
            params["w1"], params["gamma1"], params["beta1"],
            params["w2"], params["gamma2"], params["beta2"],
            params["w3"], params["gamma3"], params["beta3"],
            params["w4"], params["b4"])

    trunk_flops = 2 * b * (LATENT_PAD * H1 + H1 * H2 + H2 * H3 + H3 * H4)
    flops = trunk_flops * N_TILES + 2 * b * H4 * OUT_FEATURES
    bytes_accessed = (sum(int(np.prod(a.shape)) * a.dtype.itemsize for a in args)
                      + b * OUT_FEATURES * 4)

    flat = pl.pallas_call(
        _generator_kernel,
        out_shape=jax.ShapeDtypeStruct((b, OUT_FEATURES), jnp.float32),
        grid=(N_TILES,),
        in_specs=in_specs,
        out_specs=out_specs,
        compiler_params=pltpu.CompilerParams(
            dimension_semantics=("parallel",),        # v7x: split tiles across 2 TCs
            vmem_limit_bytes=32 * 1024 * 1024,        # safe on v5e/v6e/v7x
        ),
        cost_estimate=pl.CostEstimate(
            flops=int(flops),
            transcendentals=int(b * OUT_FEATURES),
            bytes_accessed=int(bytes_accessed)),
    )(*args)
    return flat.reshape(b, *MAP_SHAPE)


# ---------------------------------- main ----------------------------------

if __name__ == "__main__":
    key = jax.random.PRNGKey(0)
    key_params, key_x = jax.random.split(key)

    params = init_generator_params(key_params)

    batch = 8  # BatchNorm1d in training mode needs batch > 1
    x = jax.random.normal(key_x, (batch, LATENT_DIM), dtype=jnp.float32)

    fwd = jax.jit(generator_forward)
    img = jax.block_until_ready(fwd(params, x))

    assert img.shape == (batch, *MAP_SHAPE), img.shape
    assert img.dtype == jnp.float32
    assert bool(jnp.all(jnp.isfinite(img)))
    assert float(jnp.max(jnp.abs(img))) <= 1.0 + 1e-5  # tanh output range

    print("KERNEL_OK")
</pallas_src>

<mosaic_0001>
module attributes {stable_mosaic.version = 11 : i64} {
  func.func @_generator_kernel(%arg0: i32, %arg1: memref<8x128xbf16, #tpu.memory_space<vmem>>, %arg2: memref<128x128xbf16, #tpu.memory_space<vmem>>, %arg3: memref<1x128xf32, #tpu.memory_space<vmem>>, %arg4: memref<128x256xbf16, #tpu.memory_space<vmem>>, %arg5: memref<1x256xf32, #tpu.memory_space<vmem>>, %arg6: memref<1x256xf32, #tpu.memory_space<vmem>>, %arg7: memref<256x512xbf16, #tpu.memory_space<vmem>>, %arg8: memref<1x512xf32, #tpu.memory_space<vmem>>, %arg9: memref<1x512xf32, #tpu.memory_space<vmem>>, %arg10: memref<512x1024xbf16, #tpu.memory_space<vmem>>, %arg11: memref<1x1024xf32, #tpu.memory_space<vmem>>, %arg12: memref<1x1024xf32, #tpu.memory_space<vmem>>, %arg13: memref<1024x640xbf16, #tpu.memory_space<vmem>>, %arg14: memref<1x640xf32, #tpu.memory_space<vmem>>, %arg15: memref<8x640xf32, #tpu.memory_space<vmem>>) attributes {dimension_semantics = [#tpu.dimension_semantics<parallel>], iteration_bounds = array<i64: 5>, scalar_prefetch = 0 : i64, scratch_operands = 0 : i64, tpu.core_type = #tpu.core_type<tc>, window_params = [{pipeline_mode = #tpu.pipeline_mode<synchronous>, transform_indices = @transform_0, window_bounds = array<i64: 8, 128>}, {pipeline_mode = #tpu.pipeline_mode<synchronous>, transform_indices = @transform_1, window_bounds = array<i64: 128, 128>}, {pipeline_mode = #tpu.pipeline_mode<synchronous>, transform_indices = @transform_2, window_bounds = array<i64: 1, 128>}, {pipeline_mode = #tpu.pipeline_mode<synchronous>, transform_indices = @transform_3, window_bounds = array<i64: 128, 256>}, {pipeline_mode = #tpu.pipeline_mode<synchronous>, transform_indices = @transform_4, window_bounds = array<i64: 1, 256>}, {pipeline_mode = #tpu.pipeline_mode<synchronous>, transform_indices = @transform_5, window_bounds = array<i64: 1, 256>}, {pipeline_mode = #tpu.pipeline_mode<synchronous>, transform_indices = @transform_6, window_bounds = array<i64: 256, 512>}, {pipeline_mode = #tpu.pipeline_mode<synchronous>, transform_indices = @transform_7, window_bounds = array<i64: 1, 512>}, {pipeline_mode = #tpu.pipeline_mode<synchronous>, transform_indices = @transform_8, window_bounds = array<i64: 1, 512>}, {pipeline_mode = #tpu.pipeline_mode<synchronous>, transform_indices = @transform_9, window_bounds = array<i64: 512, 1024>}, {pipeline_mode = #tpu.pipeline_mode<synchronous>, transform_indices = @transform_10, window_bounds = array<i64: 1, 1024>}, {pipeline_mode = #tpu.pipeline_mode<synchronous>, transform_indices = @transform_11, window_bounds = array<i64: 1, 1024>}, {transform_indices = @transform_12, window_bounds = array<i64: 1024, 640>}, {transform_indices = @transform_13, window_bounds = array<i64: 1, 640>}, {transform_indices = @transform_14, window_bounds = array<i64: 8, 640>}]} {
    %c0 = arith.constant 0 : index
    %c0_0 = arith.constant 0 : index
    %0 = vector.load %arg1[%c0, %c0_0] : memref<8x128xbf16, #tpu.memory_space<vmem>>, vector<8x128xbf16>
    %c0_1 = arith.constant 0 : index
    %c0_2 = arith.constant 0 : index
    %1 = vector.load %arg2[%c0_1, %c0_2] : memref<128x128xbf16, #tpu.memory_space<vmem>>, vector<128x128xbf16>
    %cst = arith.constant dense<0.000000e+00> : vector<8x128xf32>
    %2 = tpu.matmul %0, %1, %cst {dimension_numbers = #tpu.dot_dimension_numbers<[1], [0], [0], [1], [0, 0, 1, 1], [], []>} : vector<8x128xbf16>, vector<128x128xbf16>, vector<8x128xf32> -> vector<8x128xf32>
    %c0_3 = arith.constant 0 : index
    %c0_4 = arith.constant 0 : index
    %3 = vector.load %arg3[%c0_3, %c0_4] : memref<1x128xf32, #tpu.memory_space<vmem>>, vector<1x128xf32>
    %4 = vector.broadcast %3 : vector<1x128xf32> to vector<8x128xf32>
    %5 = arith.addf %2, %4 : vector<8x128xf32>
    %cst_5 = arith.constant 0.000000e+00 : f32
    %6 = vector.broadcast %cst_5 : f32 to vector<8x128xf32>
    %7 = arith.cmpf ogt, %5, %6 : vector<8x128xf32>
    %cst_6 = arith.constant 2.000000e-01 : f32
    %8 = vector.broadcast %cst_6 : f32 to vector<8x128xf32>
    %9 = arith.mulf %8, %5 : vector<8x128xf32>
    %10 = arith.select %7, %5, %9 : vector<8x128xi1>, vector<8x128xf32>
    %11 = arith.truncf %10 : vector<8x128xf32> to vector<8x128xbf16>
    %c0_7 = arith.constant 0 : index
    %c0_8 = arith.constant 0 : index
    %12 = vector.load %arg4[%c0_7, %c0_8] : memref<128x256xbf16, #tpu.memory_space<vmem>>, vector<128x256xbf16>
    %cst_9 = arith.constant dense<0.000000e+00> : vector<8x256xf32>
    %13 = tpu.matmul %11, %12, %cst_9 {dimension_numbers = #tpu.dot_dimension_numbers<[1], [0], [0], [1], [0, 0, 1, 1], [], []>} : vector<8x128xbf16>, vector<128x256xbf16>, vector<8x256xf32> -> vector<8x256xf32>
    %c0_10 = arith.constant 0 : index
    %c0_11 = arith.constant 0 : index
    %14 = vector.load %arg5[%c0_10, %c0_11] : memref<1x256xf32, #tpu.memory_space<vmem>>, vector<1x256xf32>
    %c0_12 = arith.constant 0 : index
    %c0_13 = arith.constant 0 : index
    %15 = vector.load %arg6[%c0_12, %c0_13] : memref<1x256xf32, #tpu.memory_space<vmem>>, vector<1x256xf32>
    %cst_14 = arith.constant dense<0.000000e+00> : vector<256xf32>
    %16 = vector.multi_reduction <add>, %13, %cst_14 [0] : vector<8x256xf32> to vector<256xf32>
    %17 = vector.shape_cast %16 : vector<256xf32> to vector<1x256xf32>
    %cst_15 = arith.constant 8.000000e+00 : f32
    %18 = vector.broadcast %cst_15 : f32 to vector<1x256xf32>
    %19 = arith.divf %17, %18 : vector<1x256xf32>
    %20 = vector.broadcast %19 : vector<1x256xf32> to vector<8x256xf32>
    %21 = arith.subf %13, %20 : vector<8x256xf32>
    %22 = arith.mulf %21, %21 : vector<8x256xf32>
    %cst_16 = arith.constant dense<0.000000e+00> : vector<256xf32>
    %23 = vector.multi_reduction <add>, %22, %cst_16 [0] : vector<8x256xf32> to vector<256xf32>
    %24 = vector.shape_cast %23 : vector<256xf32> to vector<1x256xf32>
    %cst_17 = arith.constant 8.000000e+00 : f32
    %25 = vector.broadcast %cst_17 : f32 to vector<1x256xf32>
    %26 = arith.divf %24, %25 : vector<1x256xf32>
    %27 = vector.broadcast %19 : vector<1x256xf32> to vector<8x256xf32>
    %28 = arith.subf %13, %27 : vector<8x256xf32>
    %cst_18 = arith.constant 8.000000e-01 : f32
    %29 = vector.broadcast %cst_18 : f32 to vector<1x256xf32>
    %30 = arith.addf %26, %29 : vector<1x256xf32>
    %31 = math.rsqrt %30 : vector<1x256xf32>
    %32 = vector.broadcast %31 : vector<1x256xf32> to vector<8x256xf32>
    %33 = arith.mulf %28, %32 : vector<8x256xf32>
    %34 = vector.broadcast %14 : vector<1x256xf32> to vector<8x256xf32>
    %35 = arith.mulf %33, %34 : vector<8x256xf32>
    %36 = vector.broadcast %15 : vector<1x256xf32> to vector<8x256xf32>
    %37 = arith.addf %35, %36 : vector<8x256xf32>
    %cst_19 = arith.constant 0.000000e+00 : f32
    %38 = vector.broadcast %cst_19 : f32 to vector<8x256xf32>
    %39 = arith.cmpf ogt, %37, %38 : vector<8x256xf32>
    %cst_20 = arith.constant 2.000000e-01 : f32
    %40 = vector.broadcast %cst_20 : f32 to vector<8x256xf32>
    %41 = arith.mulf %40, %37 : vector<8x256xf32>
    %42 = arith.select %39, %37, %41 : vector<8x256xi1>, vector<8x256xf32>
    %43 = arith.truncf %42 : vector<8x256xf32> to vector<8x256xbf16>
    %c0_21 = arith.constant 0 : index
    %c0_22 = arith.constant 0 : index
    %44 = vector.load %arg7[%c0_21, %c0_22] : memref<256x512xbf16, #tpu.memory_space<vmem>>, vector<256x512xbf16>
    %cst_23 = arith.constant dense<0.000000e+00> : vector<8x512xf32>
    %45 = tpu.matmul %43, %44, %cst_23 {dimension_numbers = #tpu.dot_dimension_numbers<[1], [0], [0], [1], [0, 0, 1, 1], [], []>} : vector<8x256xbf16>, vector<256x512xbf16>, vector<8x512xf32> -> vector<8x512xf32>
    %c0_24 = arith.constant 0 : index
    %c0_25 = arith.constant 0 : index
    %46 = vector.load %arg8[%c0_24, %c0_25] : memref<1x512xf32, #tpu.memory_space<vmem>>, vector<1x512xf32>
    %c0_26 = arith.constant 0 : index
    %c0_27 = arith.constant 0 : index
    %47 = vector.load %arg9[%c0_26, %c0_27] : memref<1x512xf32, #tpu.memory_space<vmem>>, vector<1x512xf32>
    %cst_28 = arith.constant dense<0.000000e+00> : vector<512xf32>
    %48 = vector.multi_reduction <add>, %45, %cst_28 [0] : vector<8x512xf32> to vector<512xf32>
    %49 = vector.shape_cast %48 : vector<512xf32> to vector<1x512xf32>
    %cst_29 = arith.constant 8.000000e+00 : f32
    %50 = vector.broadcast %cst_29 : f32 to vector<1x512xf32>
    %51 = arith.divf %49, %50 : vector<1x512xf32>
    %52 = vector.broadcast %51 : vector<1x512xf32> to vector<8x512xf32>
    %53 = arith.subf %45, %52 : vector<8x512xf32>
    %54 = arith.mulf %53, %53 : vector<8x512xf32>
    %cst_30 = arith.constant dense<0.000000e+00> : vector<512xf32>
    %55 = vector.multi_reduction <add>, %54, %cst_30 [0] : vector<8x512xf32> to vector<512xf32>
    %56 = vector.shape_cast %55 : vector<512xf32> to vector<1x512xf32>
    %cst_31 = arith.constant 8.000000e+00 : f32
    %57 = vector.broadcast %cst_31 : f32 to vector<1x512xf32>
    %58 = arith.divf %56, %57 : vector<1x512xf32>
    %59 = vector.broadcast %51 : vector<1x512xf32> to vector<8x512xf32>
    %60 = arith.subf %45, %59 : vector<8x512xf32>
    %cst_32 = arith.constant 8.000000e-01 : f32
    %61 = vector.broadcast %cst_32 : f32 to vector<1x512xf32>
    %62 = arith.addf %58, %61 : vector<1x512xf32>
    %63 = math.rsqrt %62 : vector<1x512xf32>
    %64 = vector.broadcast %63 : vector<1x512xf32> to vector<8x512xf32>
    %65 = arith.mulf %60, %64 : vector<8x512xf32>
    %66 = vector.broadcast %46 : vector<1x512xf32> to vector<8x512xf32>
    %67 = arith.mulf %65, %66 : vector<8x512xf32>
    %68 = vector.broadcast %47 : vector<1x512xf32> to vector<8x512xf32>
    %69 = arith.addf %67, %68 : vector<8x512xf32>
    %cst_33 = arith.constant 0.000000e+00 : f32
    %70 = vector.broadcast %cst_33 : f32 to vector<8x512xf32>
    %71 = arith.cmpf ogt, %69, %70 : vector<8x512xf32>
    %cst_34 = arith.constant 2.000000e-01 : f32
    %72 = vector.broadcast %cst_34 : f32 to vector<8x512xf32>
    %73 = arith.mulf %72, %69 : vector<8x512xf32>
    %74 = arith.select %71, %69, %73 : vector<8x512xi1>, vector<8x512xf32>
    %75 = arith.truncf %74 : vector<8x512xf32> to vector<8x512xbf16>
    %c0_35 = arith.constant 0 : index
    %c0_36 = arith.constant 0 : index
    %76 = vector.load %arg10[%c0_35, %c0_36] : memref<512x1024xbf16, #tpu.memory_space<vmem>>, vector<512x1024xbf16>
    %cst_37 = arith.constant dense<0.000000e+00> : vector<8x1024xf32>
    %77 = tpu.matmul %75, %76, %cst_37 {dimension_numbers = #tpu.dot_dimension_numbers<[1], [0], [0], [1], [0, 0, 1, 1], [], []>} : vector<8x512xbf16>, vector<512x1024xbf16>, vector<8x1024xf32> -> vector<8x1024xf32>
    %c0_38 = arith.constant 0 : index
    %c0_39 = arith.constant 0 : index
    %78 = vector.load %arg11[%c0_38, %c0_39] : memref<1x1024xf32, #tpu.memory_space<vmem>>, vector<1x1024xf32>
    %c0_40 = arith.constant 0 : index
    %c0_41 = arith.constant 0 : index
    %79 = vector.load %arg12[%c0_40, %c0_41] : memref<1x1024xf32, #tpu.memory_space<vmem>>, vector<1x1024xf32>
    %cst_42 = arith.constant dense<0.000000e+00> : vector<1024xf32>
    %80 = vector.multi_reduction <add>, %77, %cst_42 [0] : vector<8x1024xf32> to vector<1024xf32>
    %81 = vector.shape_cast %80 : vector<1024xf32> to vector<1x1024xf32>
    %cst_43 = arith.constant 8.000000e+00 : f32
    %82 = vector.broadcast %cst_43 : f32 to vector<1x1024xf32>
    %83 = arith.divf %81, %82 : vector<1x1024xf32>
    %84 = vector.broadcast %83 : vector<1x1024xf32> to vector<8x1024xf32>
    %85 = arith.subf %77, %84 : vector<8x1024xf32>
    %86 = arith.mulf %85, %85 : vector<8x1024xf32>
    %cst_44 = arith.constant dense<0.000000e+00> : vector<1024xf32>
    %87 = vector.multi_reduction <add>, %86, %cst_44 [0] : vector<8x1024xf32> to vector<1024xf32>
    %88 = vector.shape_cast %87 : vector<1024xf32> to vector<1x1024xf32>
    %cst_45 = arith.constant 8.000000e+00 : f32
    %89 = vector.broadcast %cst_45 : f32 to vector<1x1024xf32>
    %90 = arith.divf %88, %89 : vector<1x1024xf32>
    %91 = vector.broadcast %83 : vector<1x1024xf32> to vector<8x1024xf32>
    %92 = arith.subf %77, %91 : vector<8x1024xf32>
    %cst_46 = arith.constant 8.000000e-01 : f32
    %93 = vector.broadcast %cst_46 : f32 to vector<1x1024xf32>
    %94 = arith.addf %90, %93 : vector<1x1024xf32>
    %95 = math.rsqrt %94 : vector<1x1024xf32>
    %96 = vector.broadcast %95 : vector<1x1024xf32> to vector<8x1024xf32>
    %97 = arith.mulf %92, %96 : vector<8x1024xf32>
    %98 = vector.broadcast %78 : vector<1x1024xf32> to vector<8x1024xf32>
    %99 = arith.mulf %97, %98 : vector<8x1024xf32>
    %100 = vector.broadcast %79 : vector<1x1024xf32> to vector<8x1024xf32>
    %101 = arith.addf %99, %100 : vector<8x1024xf32>
    %cst_47 = arith.constant 0.000000e+00 : f32
    %102 = vector.broadcast %cst_47 : f32 to vector<8x1024xf32>
    %103 = arith.cmpf ogt, %101, %102 : vector<8x1024xf32>
    %cst_48 = arith.constant 2.000000e-01 : f32
    %104 = vector.broadcast %cst_48 : f32 to vector<8x1024xf32>
    %105 = arith.mulf %104, %101 : vector<8x1024xf32>
    %106 = arith.select %103, %101, %105 : vector<8x1024xi1>, vector<8x1024xf32>
    %107 = arith.truncf %106 : vector<8x1024xf32> to vector<8x1024xbf16>
    %c0_49 = arith.constant 0 : index
    %c0_50 = arith.constant 0 : index
    %108 = vector.load %arg13[%c0_49, %c0_50] : memref<1024x640xbf16, #tpu.memory_space<vmem>>, vector<1024x640xbf16>
    %cst_51 = arith.constant dense<0.000000e+00> : vector<8x640xf32>
    %109 = tpu.matmul %107, %108, %cst_51 {dimension_numbers = #tpu.dot_dimension_numbers<[1], [0], [0], [1], [0, 0, 1, 1], [], []>} : vector<8x1024xbf16>, vector<1024x640xbf16>, vector<8x640xf32> -> vector<8x640xf32>
    %c0_52 = arith.constant 0 : index
    %c0_53 = arith.constant 0 : index
    %110 = vector.load %arg14[%c0_52, %c0_53] : memref<1x640xf32, #tpu.memory_space<vmem>>, vector<1x640xf32>
    %111 = vector.broadcast %110 : vector<1x640xf32> to vector<8x640xf32>
    %112 = arith.addf %109, %111 : vector<8x640xf32>
    %113 = math.tanh %112 : vector<8x640xf32>
    %c0_54 = arith.constant 0 : index
    %c0_55 = arith.constant 0 : index
    %114 = vector.load %arg15[%c0_54, %c0_55] : memref<8x640xf32, #tpu.memory_space<vmem>>, vector<8x640xf32>
    tpu.vector_store %arg15[%c0_54, %c0_55], %113 {strides = array<i32>} : memref<8x640xf32, #tpu.memory_space<vmem>>, vector<8x640xf32>,
    return
  }
  func.func @transform_0(%arg0: i32) -> (i32, i32) {
    %c0_i32 = arith.constant 0 : i32
    %c0_i32_0 = arith.constant 0 : i32
    %c0_i32_1 = arith.constant 0 : i32
    return %c0_i32, %c0_i32_0 : i32, i32
  }
  func.func @transform_1(%arg0: i32) -> (i32, i32) {
    %c0_i32 = arith.constant 0 : i32
    %c0_i32_0 = arith.constant 0 : i32
    %c0_i32_1 = arith.constant 0 : i32
    return %c0_i32, %c0_i32_0 : i32, i32
  }
  func.func @transform_2(%arg0: i32) -> (i32, i32) {
    %c0_i32 = arith.constant 0 : i32
    %c0_i32_0 = arith.constant 0 : i32
    %c0_i32_1 = arith.constant 0 : i32
    return %c0_i32, %c0_i32_0 : i32, i32
  }
  func.func @transform_3(%arg0: i32) -> (i32, i32) {
    %c0_i32 = arith.constant 0 : i32
    %c0_i32_0 = arith.constant 0 : i32
    %c0_i32_1 = arith.constant 0 : i32
    return %c0_i32, %c0_i32_0 : i32, i32
  }
  func.func @transform_4(%arg0: i32) -> (i32, i32) {
    %c0_i32 = arith.constant 0 : i32
    %c0_i32_0 = arith.constant 0 : i32
    %c0_i32_1 = arith.constant 0 : i32
    return %c0_i32, %c0_i32_0 : i32, i32
  }
  func.func @transform_5(%arg0: i32) -> (i32, i32) {
    %c0_i32 = arith.constant 0 : i32
    %c0_i32_0 = arith.constant 0 : i32
    %c0_i32_1 = arith.constant 0 : i32
    return %c0_i32, %c0_i32_0 : i32, i32
  }
  func.func @transform_6(%arg0: i32) -> (i32, i32) {
    %c0_i32 = arith.constant 0 : i32
    %c0_i32_0 = arith.constant 0 : i32
    %c0_i32_1 = arith.constant 0 : i32
    return %c0_i32, %c0_i32_0 : i32, i32
  }
  func.func @transform_7(%arg0: i32) -> (i32, i32) {
    %c0_i32 = arith.constant 0 : i32
    %c0_i32_0 = arith.constant 0 : i32
    %c0_i32_1 = arith.constant 0 : i32
    return %c0_i32, %c0_i32_0 : i32, i32
  }
  func.func @transform_8(%arg0: i32) -> (i32, i32) {
    %c0_i32 = arith.constant 0 : i32
    %c0_i32_0 = arith.constant 0 : i32
    %c0_i32_1 = arith.constant 0 : i32
    return %c0_i32, %c0_i32_0 : i32, i32
  }
  func.func @transform_9(%arg0: i32) -> (i32, i32) {
    %c0_i32 = arith.constant 0 : i32
    %c0_i32_0 = arith.constant 0 : i32
    %c0_i32_1 = arith.constant 0 : i32
    return %c0_i32, %c0_i32_0 : i32, i32
  }
  func.func @transform_10(%arg0: i32) -> (i32, i32) {
    %c0_i32 = arith.constant 0 : i32
    %c0_i32_0 = arith.constant 0 : i32
    %c0_i32_1 = arith.constant 0 : i32
    return %c0_i32, %c0_i32_0 : i32, i32
  }
  func.func @transform_11(%arg0: i32) -> (i32, i32) {
    %c0_i32 = arith.constant 0 : i32
    %c0_i32_0 = arith.constant 0 : i32
    %c0_i32_1 = arith.constant 0 : i32
    return %c0_i32, %c0_i32_0 : i32, i32
  }
  func.func @transform_12(%arg0: i32) -> (i32, i32) {
    %c0_i32 = arith.constant 0 : i32
    %c0_i32_0 = arith.constant 0 : i32
    return %c0_i32, %arg0 : i32, i32
  }
  func.func @transform_13(%arg0: i32) -> (i32, i32) {
    %c0_i32 = arith.constant 0 : i32
    %c0_i32_0 = arith.constant 0 : i32
    return %c0_i32, %arg0 : i32, i32
  }
  func.func @transform_14(%arg0: i32) -> (i32, i32) {
    %c0_i32 = arith.constant 0 : i32
    %c0_i32_0 = arith.constant 0 : i32
    return %c0_i32, %arg0 : i32, i32
  }
}

</mosaic_0001>

<bundles_post_ra>
// kernel: generator_forward.1
= control target key start
LH: loop header
LB: loop body
LE: loop exit
PB: predicated region body
PF: predicated region fallthrough
CT: control target
= control target key end

     0   :  { %s9658_s0 = inlined_call_operand.vmem [shape: bf16[8,128], index: 0, kind: input, shape index: {}]   ;;  %s9659_s1 = inlined_call_operand.hbm [shape: bf16[128,128], index: 1, kind: input, shape index: {}]   ;;  %s9660_s2 = inlined_call_operand.hbm [shape: f32[1,128], index: 2, kind: input, shape index: {}]   ;;  %s9661_s3 = inlined_call_operand.hbm [shape: bf16[128,256], index: 3, kind: input, shape index: {}]   ;;  %s9662_s4 = inlined_call_operand.hbm [shape: f32[1,256], index: 4, kind: input, shape index: {}]   ;;  %s9663_s5 = inlined_call_operand.hbm [shape: f32[1,256], index: 5, kind: input, shape index: {}]   ;;  %s9664_s6 = inlined_call_operand.hbm [shape: bf16[256,512], index: 6, kind: input, shape index: {}]   ;;  %s9665_s7 = inlined_call_operand.hbm [shape: f32[1,512], index: 7, kind: input, shape index: {}]   ;;  %s9666_s8 = inlined_call_operand.hbm [shape: f32[1,512], index: 8, kind: input, shape index: {}]   ;;  %s9667_s9 = inlined_call_operand.hbm [shape: bf16[512,1024], index: 9, kind: input, shape index: {}]   ;;  %s9668_s10 = inlined_call_operand.hbm [shape: f32[1,1024], index: 10, kind: input, shape index: {}]   ;;  %s9669_s11 = inlined_call_operand.hbm [shape: f32[1,1024], index: 11, kind: input, shape index: {}]   ;;  %s9670_s12 = inlined_call_operand.hbm [shape: bf16[1024,3200], index: 12, kind: input, shape index: {}]   ;;  %s9671_s13 = inlined_call_operand.hbm [shape: f32[1,3200], index: 13, kind: input, shape index: {}]   ;;  %s9672_s14 = inlined_call_operand.vmem [shape: f32[8,3200], index: 14, kind: output, shape index: {}]  }
   0x1   :  { %9686 = sst [smem:[#allocation30_spill]] %s9658_s0 }
   0x2   :  { %9687 = sst [smem:[#allocation31_spill]] %s9659_s1 }
   0x3   :  { %9688 = sst [smem:[#allocation32_spill]] %s9660_s2 }
   0x4   :  { %9689 = sst [smem:[#allocation33_spill]] %s9661_s3 }
   0x5   :  { %9690 = sst [smem:[#allocation34_spill]] %s9662_s4 }
   0x6   :  { %9691 = sst [smem:[#allocation35_spill]] %s9663_s5 }
   0x7   :  { %9692 = sst [smem:[#allocation36_spill]] %s9664_s6 }
   0x8   :  { %9693 = sst [smem:[#allocation37_spill]] %s9666_s8 }
   0x9   :  { %9694 = sst [smem:[#allocation38_spill]] %s9667_s9 }
   0xa   :  { %9695 = sst [smem:[#allocation39_spill]] %s9668_s10 }
   0xb   :  { %9696 = sst [smem:[#allocation40_spill]] %s9669_s11 }
   0xc   :  { %9697 = sst [smem:[#allocation41_spill]] %s9671_s13 }
   0xd   :  { %9698 = sst [smem:[#allocation42_spill]] %s9672_s14 }
   0xe   :  { %19 = vsyncpa [#allocation3], 0 }
   0xf   :  { %20 = vsyncpa [#allocation5], 0 }
  0x10   :  { %21 = vsyncpa [#allocation8], 0 }
  0x11   :  { %22 = vsyncpa [#allocation11], 0 }
  0x12   :  { %23 = vsyncpa [#allocation14], 0 }
  0x13   :  { %24 = vsyncpa [#allocation17], 0 }
  0x14   :  { %25 = vsyncpa [#allocation20], 0 }
  0x15   :  { %27 = vsyncpa [#allocation20 + $0x1], 0  ;;  %s8705_s29 = smov 0   ;;  %s8707_s30 = smov 0  }
  0x16   :  { %s8709_s15 = smov 0   ;;  %s8711_s16 = smov 0  }
  0x17 LB: > { %s8603_s17 = smov [#allocation4]   ;;  %s8726_s19 = sadd.s32 4294967295, %s8601_s16   ;;  %s8601_s16 = sphi %s8711_s16, %s9743_s16   ;;  %s8597_s15 = sphi %s8709_s15, %s9742_s15   ;;  %s8593_s30 = sphi %s8707_s30, %s9741_s30   ;;  %s8589_s29 = sphi %s8705_s29, %s9740_s29  }
  0x18   : > { %s397_s18 = sshll.u32 %s8603_s17, 4  ;;  %p6528_p0 = scmp.ge.s32.totalorder %s8601_s16, 1  ;;  %s398_s18 = int_to_ptr.vmem [resolvable:$true] %s397_s18 }
  0x19   : > { %p9673_p1 = scmp.eq.s32.totalorder %s8726_s19, 0  ;;  %p368_p2 = scmp.lt.s32.totalorder %s8601_s16, 6 }
  0x1a   : > { %s8604_s21 = smov [#allocation7]   ;;  %s8605_s23 = smov [#allocation10]  }
  0x1b   : > { %p8731_p3 = pnand %p6528_p0, %p368_p2  ;;  %s421_s22 = sshll.u32 %s8604_s21, 4  ;;  %s8737_s22 = int_to_ptr.vmem [resolvable:$true] %s421_s22 }
  0x1c   : > { %s442_s24 = sshll.u32 %s8605_s23, 4  ;;  %s9702_s2 = sld [smem:[#allocation32_spill]]  ;;  %s8745_s24 = int_to_ptr.vmem [resolvable:$true] %s442_s24 }
  0x1d   : > { %s9699_s20 = scalar_select %p8731_p3, 1, 0 }
  0x1e   : > { %p7438_p4 = pneg %p8731_p3 }
  0x1f   : > { %9700 = sst [smem:[#allocation29_spill]] %s9699_s20 }
  0x20   : > { %p8741_p5 = pnand %p7438_p4, %p9673_p1 }
  0x22   : > { %s9701_s25 = scalar_select %p8741_p5, 1, 0 }
  0x23   : > { %s8175_s28 = scalar_lea.hbm %s9702_s2, 16  ;;  %p8755_p7 = pneg %p8741_p5 }
  0x24   : > { %p8176_p6 = scmp.ne.s32.totalorder %s9702_s2, %s8175_s28  ;;  %p8182_p10 = scmp.lt.u32.totalorder %s8175_s28, %s9702_s2 }
  0x26   : > { %p8178_p8 = pnand %p8755_p7, %p8176_p6 }
  0x28   : > { %p8179_p9 = pneg %p8178_p8 }
  0x2a   : > { %p8184_p11 = pnand %p8182_p10, %p8179_p9 }
  0x2c   : > { %8187 = shalt.err (!%p8184_p11)
}
  0x2d   : > { %s8188_s26 = scalar_lea.vmem %s398_s18, 16  ;;  %s8195_s14 = scalar_lea.vmem %s398_s18, 32 }
  0x2e   : > { %p8189_p12 = scmp.ne.s32.totalorder %s398_s18, %s8188_s26  ;;  %p8196_p2 = scmp.lt.s32.totalorder %s398_s18, %s398_s18 }
  0x2f   : > { %p8197_p4 = scmp.lt.s32.totalorder %s8195_s14, %s8188_s26 }
  0x30   : > { %p8191_p13 = pnand %p8189_p12, %p8755_p7 }
  0x31   : > { %p8198_p1 = por %p8197_p4, %p8196_p2 }
  0x32   : > { %p8192_p0 = pneg %p8191_p13 }
  0x34   : > { %p8199_p3 = pnand %p8198_p1, %p8192_p0 }
  0x36   : > { %8202 = shalt.err (!%p8199_p3)
}
  0x37   : > { %7444 = dma.hbm_to_vmem [thread:$0]  (!%p8741_p5), %s9702_s2, 16, %s398_s18, [#allocation5]  }
  0x38   : > { %s9704_s4 = sld [smem:[#allocation34_spill]] }
  0x3e   : > { %s8203_s23 = scalar_lea.hbm %s9704_s4, 32 }
  0x3f   : > { %p8204_p6 = scmp.ne.s32.totalorder %s9704_s4, %s8203_s23  ;;  %p8210_p1 = scmp.lt.u32.totalorder %s8203_s23, %s9704_s4 }
  0x41   : > { %p8206_p8 = pnand %p8204_p6, %p8755_p7 }
  0x43   : > { %p8207_p9 = pneg %p8206_p8 }
  0x45   : > { %p8212_p3 = pnand %p8210_p1, %p8207_p9 }
  0x47   : > { %8215 = shalt.err (!%p8212_p3)
}
  0x48   : > { %s8216_s18 = scalar_lea.vmem %s8737_s22, 32  ;;  %p8224_p13 = scmp.lt.s32.totalorder %s8737_s22, %s8737_s22 }
  0x49   : > { %p8217_p10 = scmp.ne.s32.totalorder %s8737_s22, %s8216_s18  ;;  %p8225_p0 = scmp.lt.s32.totalorder %s8216_s18, %s8216_s18 }
  0x4b   : > { %p8219_p11 = pnand %p8217_p10, %p8755_p7  ;;  %p8226_p2 = por %p8225_p0, %p8224_p13 }
  0x4d   : > { %p8220_p12 = pneg %p8219_p11 }
  0x4f   : > { %p8227_p4 = pnand %p8226_p2, %p8220_p12 }
  0x51   : > { %8230 = shalt.err (!%p8227_p4)
}
  0x52   : > { %7450 = dma.hbm_to_vmem [thread:$0]  (!%p8741_p5), %s9704_s4, 32, %s8737_s22, [#allocation8]  }
  0x53   : > { %s9705_s6 = sld [smem:[#allocation36_spill]] }
  0x59   : > { %s8231_s0 = scalar_lea.hbm %s9705_s6, 8192 }
  0x5a   : > { %p8232_p6 = scmp.ne.s32.totalorder %s9705_s6, %s8231_s0  ;;  %p8238_p1 = scmp.lt.u32.totalorder %s8231_s0, %s9705_s6 }
  0x5c   : > { %p8234_p8 = pnand %p8232_p6, %p8755_p7 }
  0x5e   : > { %p8235_p9 = pneg %p8234_p8 }
  0x60   : > { %p8240_p3 = pnand %p8238_p1, %p8235_p9 }
  0x62   : > { %8243 = shalt.err (!%p8240_p3)
}
  0x63   : > { %s8244_s22 = scalar_lea.vmem %s8745_s24, 8192  ;;  %p8252_p13 = scmp.lt.s32.totalorder %s8745_s24, %s8745_s24 }
  0x64   : > { %p8245_p10 = scmp.ne.s32.totalorder %s8745_s24, %s8244_s22  ;;  %p8253_p0 = scmp.lt.s32.totalorder %s8244_s22, %s8244_s22 }
  0x66   : > { %p8247_p11 = pnand %p8245_p10, %p8755_p7  ;;  %p8254_p2 = por %p8253_p0, %p8252_p13 }
  0x68   : > { %p8248_p12 = pneg %p8247_p11 }
  0x6a   : > { %p8255_p4 = pnand %p8254_p2, %p8248_p12 }
  0x6c   : > { %8258 = shalt.err (!%p8255_p4)
}
  0x6d   : > { %s8606_s18 = smov 256   ;;  %s8607_s13 = smov 16  }
  0x6e   : > { %7456 = dma.hbm_to_vmem [thread:$0]  (!%p8741_p5), %s9705_s6, 8192, %s8745_s24, [#allocation11], %s8606_s18, %s8606_s18, %s8607_s13  }
  0x6f   : > { %s8608_s17 = smov [#allocation13]   ;;  %s8609_s28 = smov [#allocation16]  }
  0x70   : > { %s467_s0 = sshll.u32 %s8608_s17, 4  ;;  %s491_s23 = sshll.u32 %s8609_s28, 4  ;;  %s468_s0 = int_to_ptr.vmem [resolvable:$true] %s467_s0  ;;  %s492_s23 = int_to_ptr.vmem [resolvable:$true] %s491_s23 }
  0x71   : > { %s9706_s8 = sld [smem:[#allocation37_spill]] }
  0x77   : > { %s8259_s22 = scalar_lea.hbm %s9706_s8, 64 }
  0x78   : > { %p8260_p6 = scmp.ne.s32.totalorder %s9706_s8, %s8259_s22  ;;  %p8266_p1 = scmp.lt.u32.totalorder %s8259_s22, %s9706_s8 }
  0x7a   : > { %p8262_p8 = pnand %p8260_p6, %p8755_p7 }
  0x7c   : > { %p8263_p9 = pneg %p8262_p8 }
  0x7e   : > { %p8268_p3 = pnand %p8266_p1, %p8263_p9 }
  0x80   : > { %8271 = shalt.err (!%p8268_p3)
}
  0x81   : > { %s8272_s24 = scalar_lea.vmem %s468_s0, 64  ;;  %p8280_p13 = scmp.lt.s32.totalorder %s468_s0, %s468_s0 }
  0x82   : > { %p8273_p10 = scmp.ne.s32.totalorder %s468_s0, %s8272_s24  ;;  %p8281_p0 = scmp.lt.s32.totalorder %s8272_s24, %s8272_s24 }
  0x84   : > { %p8275_p11 = pnand %p8273_p10, %p8755_p7  ;;  %p8282_p2 = por %p8281_p0, %p8280_p13 }
  0x86   : > { %p8276_p12 = pneg %p8275_p11 }
  0x88   : > { %p8283_p4 = pnand %p8282_p2, %p8276_p12 }
  0x8a   : > { %8286 = shalt.err (!%p8283_p4)
}
  0x8b   : > { %7462 = dma.hbm_to_vmem [thread:$0]  (!%p8741_p5), %s9706_s8, 64, %s468_s0, [#allocation14]  }
  0x8c   : > { %s9707_s10 = sld [smem:[#allocation39_spill]] }
  0x92   : > { %s8287_s18 = scalar_lea.hbm %s9707_s10, 128 }
  0x93   : > { %p8288_p6 = scmp.ne.s32.totalorder %s9707_s10, %s8287_s18  ;;  %p8294_p1 = scmp.lt.u32.totalorder %s8287_s18, %s9707_s10 }
  0x95   : > { %p8290_p8 = pnand %p8288_p6, %p8755_p7 }
  0x97   : > { %p8291_p9 = pneg %p8290_p8 }
  0x99   : > { %p8296_p3 = pnand %p8294_p1, %p8291_p9 }
  0x9b   : > { %8299 = shalt.err (!%p8296_p3)
}
  0x9c   : > { %s8300_s28 = scalar_lea.vmem %s492_s23, 128  ;;  %p8308_p13 = scmp.lt.s32.totalorder %s492_s23, %s492_s23 }
  0x9d   : > { %p8301_p10 = scmp.ne.s32.totalorder %s492_s23, %s8300_s28  ;;  %p8309_p0 = scmp.lt.s32.totalorder %s8300_s28, %s8300_s28 }
  0x9f   : > { %p8303_p11 = pnand %p8301_p10, %p8755_p7  ;;  %p8310_p2 = por %p8309_p0, %p8308_p13 }
  0xa1   : > { %p8304_p12 = pneg %p8303_p11 }
  0xa3   : > { %p8311_p4 = pnand %p8310_p2, %p8304_p12 }
  0xa5   : > { %8314 = shalt.err (!%p8311_p4)
}
  0xa6   : > { %7468 = dma.hbm_to_vmem [thread:$0]  (!%p8741_p5), %s9707_s10, 128, %s492_s23, [#allocation17]  }
  0xa7   : > { %s8854_s14 = sadd.s32 1, %s8601_s16   ;;  %s292_s24 = sadd.s32 1, %s8597_s15 }
  0xa8   : > { %s289_s22 = ssub.s32 %s8601_s16, %s8854_s14  ;;  %p299_p8 = scmp.ne.s32.totalorder %s8597_s15, %s8593_s30 }
  0xa9   : > { %p290_p6 = scmp.eq.s32.totalorder %s289_s22, 0  ;;  %p300_p9 = scmp.eq.s32.totalorder %s8601_s16, 0 }
  0xaa   : > { %p305_p1 = scmp.ne.s32.totalorder %s8593_s30, %s8589_s29  ;;  %p9708_p10 = scmp.eq.s32.totalorder %s8726_s19, 0 }
  0xab   : > { %s8865_s2 = scalar_select %p290_p6, %s8597_s15, %s292_s24  }
  0xac   : > { %p301_p3 = por %p300_p9, %p299_p8  ;;  %p8869_p11 = por %p9708_p10, %p305_p1 }
  0xad   : > { %p7490_p12 = scmp.lt.s32.totalorder %s8601_s16, 5  ;;  %s513_s23 = sand.u32 1, %s8601_s16  }
  0xae   : > { %s9709_s4 = scalar_select %p8869_p11, 1, 0 }
  0xaf   : > { %s9682_s9 = sand.u32 1, %s8597_s15   ;;  %p8878_p13 = pnand %p7490_p12, %p301_p3 }
  0xb0   : > { %s7386_s11 = smul.u32 2560, %s9682_s9  ;;  %s8890_s0 = scalar_lea.sflag [#allocation20], %s513_s23 }
  0xb1   : > { %s9710_s18 = scalar_select %p8878_p13, 1, 0 }
  0xb2   : > { %s7223_s29 = smul.u32 320, %s8601_s16  ;;  %s517_s17 = scalar_lea.vmem [#allocation19], %s7386_s11 }
  0xb3   : > { %s524_s28 = sshll.u32 %s517_s17, 4  ;;  %p9683_p2 = pneg %p8878_p13  ;;  %s8888_s28 = int_to_ptr.vmem [resolvable:$true] %s524_s28 }
  0xb4   : > { %s8886_s27 = scalar_lea.hbm %s9670_s12, %s7223_s29  ;;  %s8320_s29 = scalar_lea.hbm %s9670_s12, 204800 }
  0xb5   : > { %s8315_s26 = scalar_lea.hbm %s8886_s27, 40960  ;;  %p8321_p8 = scmp.lt.u32.totalorder %s8886_s27, %s9670_s12 }
  0xb6   : > { %p8316_p0 = scmp.ne.s32.totalorder %s8886_s27, %s8315_s26  ;;  %p8322_p9 = scmp.lt.u32.totalorder %s8320_s29, %s8315_s26 }
  0xb7   : > { %p8324_p3 = scmp.lt.u32.totalorder %s8315_s26, %s8886_s27 }
  0xb8   : > { %p8318_p4 = pnand %p9683_p2, %p8316_p0  ;;  %p8323_p1 = por %p8322_p9, %p8321_p8 }
  0xba   : > { %p8319_p6 = pneg %p8318_p4  ;;  %p8325_p10 = por %p8324_p3, %p8323_p1 }
  0xbc   : > { %p8326_p12 = pnand %p8325_p10, %p8319_p6 }
  0xbe   : > { %8329 = shalt.err (!%p8326_p12)
}
  0xbf   : > { %s8330_s23 = scalar_lea.vmem %s8888_s28, 40960  ;;  %s8610_s11 = smov [#allocation19]  }
  0xc0   : > { %p8331_p0 = scmp.ne.s32.totalorder %s8888_s28, %s8330_s23  ;;  %s8335_s17 = sshll.u32 %s8610_s11, 4  ;;  %s8336_s17 = int_to_ptr.vmem [resolvable:$false] %s8335_s17 }
  0xc1   : > { %s8337_s22 = scalar_lea.vmem %s8336_s17, 81920  ;;  %p8338_p5 = scmp.lt.s32.totalorder %s8888_s28, %s8336_s17 }
  0xc2   : > { %p8333_p4 = pnand %p8331_p0, %p9683_p2  ;;  %p8339_p8 = scmp.lt.s32.totalorder %s8337_s22, %s8330_s23 }
  0xc4   : > { %p8334_p11 = pneg %p8333_p4  ;;  %p8340_p9 = por %p8339_p8, %p8338_p5 }
  0xc6   : > { %p8341_p1 = pnand %p8340_p9, %p8334_p11 }
  0xc8   : > { %8344 = shalt.err (!%p8341_p1)
}
  0xc9   : > { %s8611_s26 = smov 1600   ;;  %s8612_s24 = smov 320  }
  0xca   : > { %s8613_s29 = smov 20   ;;  %s8614_s13 = smov [#allocation2]  }
  0xcb   : > { %7475 = dma.hbm_to_vmem [thread:$0]  (!%p8878_p13), %s8886_s27, 40960, %s8888_s28, %s8890_s0, %s8611_s26, %s8612_s24, %s8613_s29  }
  0xcc   : > { %s383_s20 = sshll.u32 %s8614_s13, 4  ;;  %s9711_s1 = sld [smem:[#allocation31_spill]]  ;;  %s384_s20 = int_to_ptr.vmem [resolvable:$true] %s383_s20 }
  0xd2   : > { %s8345_s23 = scalar_lea.hbm %s9711_s1, 1024 }
  0xd3   : > { %p8346_p5 = scmp.ne.s32.totalorder %s9711_s1, %s8345_s23  ;;  %p8352_p3 = scmp.lt.u32.totalorder %s8345_s23, %s9711_s1 }
  0xd5   : > { %p8348_p11 = pnand %p8346_p5, %p8755_p7 }
  0xd7   : > { %p8349_p6 = pneg %p8348_p11 }
  0xd9   : > { %p8354_p10 = pnand %p8352_p3, %p8349_p6 }
  0xdb   : > { %8357 = shalt.err (!%p8354_p10)
}
  0xdc   : > { %s8358_s27 = scalar_lea.vmem %s384_s20, 1024  ;;  %p8366_p8 = scmp.lt.s32.totalorder %s384_s20, %s384_s20 }
  0xdd   : > { %p8359_p12 = scmp.ne.s32.totalorder %s384_s20, %s8358_s27  ;;  %p8367_p9 = scmp.lt.s32.totalorder %s8358_s27, %s8358_s27 }
  0xdf   : > { %p8361_p0 = pnand %p8359_p12, %p8755_p7  ;;  %p8368_p1 = por %p8367_p9, %p8366_p8 }
  0xe1   : > { %p8362_p4 = pneg %p8361_p0 }
  0xe3   : > { %p8369_p2 = pnand %p8368_p1, %p8362_p4 }
  0xe5   : > { %8372 = shalt.err (!%p8369_p2)
}
  0xe6   : > { %s8615_s9 = smov 64   ;;  %s8616_s28 = smov 4  }
  0xe7   : > { %p9712_p5 = scmp.ne.s32.totalorder %s9701_s25, 0  ;;  %s8617_s26 = smov [#allocation6]  }
  0xe8   : > { %s407_s24 = sshll.u32 %s8617_s26, 4  ;;  %s9713_s3 = sld [smem:[#allocation33_spill]]  ;;  %s408_s24 = int_to_ptr.vmem [resolvable:$true] %s407_s24 }
  0xe9   : > { %7441 = dma.hbm_to_vmem [thread:$0]  (!%p9712_p5), %s9711_s1, 1024, %s384_s20, [#allocation3], %s8615_s9, %s8615_s9, %s8616_s28  }
  0xee   : > { %s8373_s11 = scalar_lea.hbm %s9713_s3, 2048 }
  0xef   : > { %p8374_p2 = scmp.ne.s32.totalorder %s9713_s3, %s8373_s11  ;;  %p8380_p3 = scmp.lt.u32.totalorder %s8373_s11, %s9713_s3 }
  0xf1   : > { %p8376_p11 = pnand %p8374_p2, %p8755_p7 }
  0xf3   : > { %p8377_p6 = pneg %p8376_p11 }
  0xf5   : > { %p8382_p10 = pnand %p8380_p3, %p8377_p6 }
  0xf7   : > { %8385 = shalt.err (!%p8382_p10)
}
  0xf8   : > { %s8386_s20 = scalar_lea.vmem %s408_s24, 2048  ;;  %p8394_p8 = scmp.lt.s32.totalorder %s408_s24, %s408_s24 }
  0xf9   : > { %p8387_p12 = scmp.ne.s32.totalorder %s408_s24, %s8386_s20  ;;  %p8395_p9 = scmp.lt.s32.totalorder %s8386_s20, %s8386_s20 }
  0xfb   : > { %p8389_p0 = pnand %p8387_p12, %p8755_p7  ;;  %p8396_p1 = por %p8395_p9, %p8394_p8 }
  0xfd   : > { %p8390_p4 = pneg %p8389_p0 }
  0xff   : > { %p8397_p13 = pnand %p8396_p1, %p8390_p4 }
 0x101   : > { %8400 = shalt.err (!%p8397_p13)
}
 0x102   : > { %s8618_s9 = smov 128   ;;  %s8619_s28 = smov 8  }
 0x103   : > { %7447 = dma.hbm_to_vmem [thread:$0]  (!%p9712_p5), %s9713_s3, 2048, %s408_s24, [#allocation5], %s8618_s9, %s8618_s9, %s8619_s28  }
 0x104   : > { %s8620_s26 = smov [#allocation9]   ;;  %s8621_s13 = smov [#allocation12]  }
 0x105   : > { %s432_s29 = sshll.u32 %s8620_s26, 4  ;;  %s456_s11 = sshll.u32 %s8621_s13, 4  ;;  %s433_s29 = int_to_ptr.vmem [resolvable:$true] %s432_s29  ;;  %s457_s11 = int_to_ptr.vmem [resolvable:$true] %s456_s11 }
 0x106   : > { %s9714_s5 = sld [smem:[#allocation35_spill]] }
 0x10c   : > { %s8401_s22 = scalar_lea.hbm %s9714_s5, 32 }
 0x10d   : > { %p8402_p13 = scmp.ne.s32.totalorder %s9714_s5, %s8401_s22  ;;  %p8408_p6 = scmp.lt.u32.totalorder %s8401_s22, %s9714_s5 }
 0x10f   : > { %p8404_p2 = pnand %p8402_p13, %p8755_p7 }
 0x111   : > { %p8405_p11 = pneg %p8404_p2 }
 0x113   : > { %p8410_p3 = pnand %p8408_p6, %p8405_p11 }
 0x115   : > { %8413 = shalt.err (!%p8410_p3)
}
 0x116   : > { %s8414_s24 = scalar_lea.vmem %s433_s29, 32  ;;  %p8422_p4 = scmp.lt.s32.totalorder %s433_s29, %s433_s29 }
 0x117   : > { %p8415_p10 = scmp.ne.s32.totalorder %s433_s29, %s8414_s24  ;;  %p8423_p8 = scmp.lt.s32.totalorder %s8414_s24, %s8414_s24 }
 0x119   : > { %p8417_p12 = pnand %p8415_p10, %p8755_p7  ;;  %p8424_p9 = por %p8423_p8, %p8422_p4 }
 0x11b   : > { %p8418_p0 = pneg %p8417_p12 }
 0x11d   : > { %p8425_p1 = pnand %p8424_p9, %p8418_p0 }
 0x11f   : > { %8428 = shalt.err (!%p8425_p1)
}
 0x120   : > { %7453 = dma.hbm_to_vmem [thread:$0]  (!%p9712_p5), %s9714_s5, 32, %s433_s29, [#allocation8]  }
 0x121   : > { %s8429_s6 = scalar_lea.hbm %s9665_s7, 64 }
 0x122   : > { %p8430_p13 = scmp.ne.s32.totalorder %s9665_s7, %s8429_s6  ;;  %p8436_p6 = scmp.lt.u32.totalorder %s8429_s6, %s9665_s7 }
 0x124   : > { %p8432_p2 = pnand %p8430_p13, %p8755_p7 }
 0x126   : > { %p8433_p11 = pneg %p8432_p2 }
 0x128   : > { %p8438_p3 = pnand %p8436_p6, %p8433_p11 }
 0x12a   : > { %8441 = shalt.err (!%p8438_p3)
}
 0x12b   : > { %s8442_s17 = scalar_lea.vmem %s457_s11, 64  ;;  %p8450_p4 = scmp.lt.s32.totalorder %s457_s11, %s457_s11 }
 0x12c   : > { %p8443_p10 = scmp.ne.s32.totalorder %s457_s11, %s8442_s17  ;;  %p8451_p8 = scmp.lt.s32.totalorder %s8442_s17, %s8442_s17 }
 0x12e   : > { %p8445_p12 = pnand %p8443_p10, %p8755_p7  ;;  %p8452_p9 = por %p8451_p8, %p8450_p4 }
 0x130   : > { %p8446_p0 = pneg %p8445_p12 }
 0x132   : > { %p8453_p1 = pnand %p8452_p9, %p8446_p0 }
 0x134   : > { %8456 = shalt.err (!%p8453_p1)
}
 0x135   : > { %7459 = dma.hbm_to_vmem [thread:$0]  (!%p9712_p5), %s9665_s7, 64, %s457_s11, [#allocation11]  }
 0x136   : > { %s8622_s27 = smov [#allocation15]   ;;  %s9715_s28 = sld [smem:[#allocation38_spill]] }
 0x137   : > { %s477_s20 = sshll.u32 %s8622_s27, 4  ;;  %s478_s20 = int_to_ptr.vmem [resolvable:$true] %s477_s20 }
 0x13c   : > { %s8457_s1 = scalar_lea.hbm %s9715_s28, 32768 }
 0x13d   : > { %p8458_p13 = scmp.ne.s32.totalorder %s9715_s28, %s8457_s1  ;;  %p8464_p6 = scmp.lt.u32.totalorder %s8457_s1, %s9715_s28 }
 0x13f   : > { %p8460_p2 = pnand %p8458_p13, %p8755_p7 }
 0x141   : > { %p8461_p11 = pneg %p8460_p2 }
 0x143   : > { %p8466_p3 = pnand %p8464_p6, %p8461_p11 }
 0x145   : > { %8469 = shalt.err (!%p8466_p3)
}
 0x146   : > { %s8470_s11 = scalar_lea.vmem %s478_s20, 32768  ;;  %p8478_p4 = scmp.lt.s32.totalorder %s478_s20, %s478_s20 }
 0x147   : > { %p8471_p10 = scmp.ne.s32.totalorder %s478_s20, %s8470_s11  ;;  %p8479_p8 = scmp.lt.s32.totalorder %s8470_s11, %s8470_s11 }
 0x149   : > { %p8473_p12 = pnand %p8471_p10, %p8755_p7  ;;  %p8480_p9 = por %p8479_p8, %p8478_p4 }
 0x14b   : > { %p8474_p0 = pneg %p8473_p12 }
 0x14d   : > { %p8481_p1 = pnand %p8480_p9, %p8474_p0 }
 0x14f   : > { %8484 = shalt.err (!%p8481_p1)
}
 0x150   : > { %s8623_s13 = smov 512   ;;  %s8624_s23 = smov 32  }
 0x151   : > { %7465 = dma.hbm_to_vmem [thread:$0]  (!%p9712_p5), %s9715_s28, 32768, %s478_s20, [#allocation14], %s8623_s13, %s8623_s13, %s8624_s23  }
 0x152   : > { %s9716_s22 = sand.u32 1, %s8597_s15   ;;  %s8625_s24 = smov [#allocation18]  }
 0x153   : > { %s7387_s27 = smul.u32 5, %s9716_s22  ;;  %s502_s9 = sshll.u32 %s8625_s24, 4  ;;  %s503_s9 = int_to_ptr.vmem [resolvable:$true] %s502_s9 }
 0x154   : > { %s7224_s1 = smul.u32 80, %s8601_s16  ;;  %s9717_s8 = sld [smem:[#allocation40_spill]] }
 0x15a   : > { %s8485_s26 = scalar_lea.hbm %s9717_s8, 128 }
 0x15b   : > { %p8486_p13 = scmp.ne.s32.totalorder %s9717_s8, %s8485_s26  ;;  %p8492_p6 = scmp.lt.u32.totalorder %s8485_s26, %s9717_s8 }
 0x15d   : > { %p8488_p2 = pnand %p8486_p13, %p8755_p7 }
 0x15f   : > { %p8489_p11 = pneg %p8488_p2 }
 0x161   : > { %p8494_p3 = pnand %p8492_p6, %p8489_p11 }
 0x163   : > { %8497 = shalt.err (!%p8494_p3)
}
 0x164   : > { %s8498_s20 = scalar_lea.vmem %s503_s9, 128  ;;  %p8506_p4 = scmp.lt.s32.totalorder %s503_s9, %s503_s9 }
 0x165   : > { %p8499_p10 = scmp.ne.s32.totalorder %s503_s9, %s8498_s20  ;;  %p8507_p8 = scmp.lt.s32.totalorder %s8498_s20, %s8498_s20 }
 0x167   : > { %p8501_p12 = pnand %p8499_p10, %p8755_p7  ;;  %p8508_p9 = por %p8507_p8, %p8506_p4 }
 0x169   : > { %p8502_p0 = pneg %p8501_p12 }
 0x16b   : > { %p8509_p1 = pnand %p8508_p9, %p8502_p0 }
 0x16d   : > { %8512 = shalt.err (!%p8509_p1)
}
 0x16e   : > { %7471 = dma.hbm_to_vmem [thread:$0]  (!%p9712_p5), %s9717_s8, 128, %s503_s9, [#allocation17]  }
 0x16f   : > { %s9718_s23 = sld [smem:[#allocation41_spill]]  ;;  %s538_s21 = scalar_lea.vmem [#allocation21], %s7387_s27 }
 0x170   : > { %s546_s22 = sshll.u32 %s538_s21, 4  ;;  %p9719_p13 = scmp.ne.s32.totalorder %s9710_s18, 0  ;;  %s547_s22 = int_to_ptr.vmem [resolvable:$true] %s546_s22 }
 0x172   : > { %p9720_p2 = pneg %p9719_p13 }
 0x175   : > { %s9032_s29 = scalar_lea.hbm %s9718_s23, %s7224_s1  ;;  %s8518_s10 = scalar_lea.hbm %s9718_s23, 400 }
 0x176   : > { %s8513_s24 = scalar_lea.hbm %s9032_s29, 80  ;;  %p8519_p5 = scmp.lt.u32.totalorder %s9032_s29, %s9718_s23 }
 0x177   : > { %p8514_p7 = scmp.ne.s32.totalorder %s9032_s29, %s8513_s24  ;;  %p8520_p3 = scmp.lt.u32.totalorder %s8518_s10, %s8513_s24 }
 0x178   : > { %p8522_p12 = scmp.lt.u32.totalorder %s8513_s24, %s9032_s29 }
 0x179   : > { %p8516_p11 = pnand %p8514_p7, %p9720_p2  ;;  %p8521_p10 = por %p8520_p3, %p8519_p5 }
 0x17b   : > { %p8517_p6 = pneg %p8516_p11  ;;  %p8523_p0 = por %p8522_p12, %p8521_p10 }
 0x17d   : > { %p8524_p4 = pnand %p8523_p0, %p8517_p6 }
 0x17f   : > { %8527 = shalt.err (!%p8524_p4)
}
 0x180   : > { %s8528_s27 = scalar_lea.vmem %s547_s22, 80  ;;  %p9721_p9 = pmov %p9720_p2 }
 0x181   : > { %p8529_p8 = scmp.ne.s32.totalorder %s547_s22, %s8528_s27  ;;  %s8626_s26 = smov [#allocation21]  }
 0x182   : > { %s8533_s11 = sshll.u32 %s8626_s26, 4  ;;  %s8534_s11 = int_to_ptr.vmem [resolvable:$false] %s8533_s11 }
 0x183   : > { %p8531_p1 = pnand %p8529_p8, %p9721_p9  ;;  %s8535_s17 = scalar_lea.vmem %s8534_s11, 160 }
 0x184   : > { %p8536_p2 = scmp.lt.s32.totalorder %s547_s22, %s8534_s11  ;;  %p8537_p11 = scmp.lt.s32.totalorder %s8535_s17, %s8528_s27 }
 0x185   : > { %p8532_p7 = pneg %p8531_p1 }
 0x186   : > { %p8538_p3 = por %p8537_p11, %p8536_p2 }
 0x188   : > { %p8539_p5 = pnand %p8538_p3, %p8532_p7 }
 0x18a   : > { %8542 = shalt.err (!%p8539_p5)
}
 0x18b   : > { %7478 = dma.hbm_to_vmem [thread:$0]  (!%p9719_p13), %s9032_s29, 80, %s547_s22, %s8890_s0  }
 0x18c   : > { %s9722_s20 = sld [smem:[#allocation29_spill]] }
 0x192   : > { %p9723_p6 = scmp.ne.s32.totalorder %s9722_s20, 0 }
 0x193   : > { %p9724_p10 = scmp.eq.s32.totalorder (!%p9723_p6), %s8726_s19, 0 }
 0x194   : > { %555 = sbr.rel (%p9723_p6) target bundleno = 2046 (0x7fe), region = 76 }
 0x19b   : > { %8560 = dma.done.wait (%p9724_p10), [#allocation3], 1024   ;;  %p9725_p12 = pmov %p9724_p10 }
 0x19c   : > { %p9726_p0 = pmov %p9724_p10 }
 0x19d   : > { %8562 = vsyncadd (%p9725_p12), [#allocation3], 4294966272 }
 0x19e   : > { %8564 = dma.done.wait (%p9726_p0), [#allocation5], 2064   ;;  %p9727_p4 = pmov %p9726_p0 }
 0x19f   : > { %p9728_p8 = pmov %p9726_p0 }
 0x1a0   : > { %8566 = vsyncadd (%p9727_p4), [#allocation5], 4294965232 }
 0x1a1   : > { %8568 = dma.done.wait (%p9728_p8), [#allocation8], 64   ;;  %p9729_p13 = pmov %p9726_p0 }
 0x1a2   : > { %p9730_p9 = pmov %p9726_p0 }
 0x1a3   : > { %8570 = vsyncadd (%p9729_p13), [#allocation8], 4294967232 }
 0x1a4   : > { %8572 = dma.done.wait (%p9730_p9), [#allocation11], 8256   ;;  %p9731_p1 = pmov %p9726_p0 }
 0x1a5   : > { %p9732_p7 = pmov %p9726_p0 }
 0x1a6   : > { %8574 = vsyncadd (%p9731_p1), [#allocation11], 4294959040 }
 0x1a7   : > { %8576 = dma.done.wait (%p9732_p7), [#allocation14], 32832   ;;  %p9733_p2 = pmov %p9726_p0 }
 0x1a8   : > { %p9734_p11 = pmov %p9726_p0 }
 0x1a9   : > { %8578 = vsyncadd (%p9733_p2), [#allocation14], 4294934464 }
 0x1aa   : > { %8580 = dma.done.wait (%p9734_p11), [#allocation17], 256   ;;  %p9735_p3 = pmov %p9726_p0 }
 0x1ab   : > { %s601_s18 = sand.u32 1, %s8726_s19   ;;  %s603_s0 = sand.u32 1, %s8593_s30  }
 0x1ac   : > { %8582 = vsyncadd (%p9735_p3), [#allocation17], 4294967040  ;;  %s7388_s3 = smul.u32 2560, %s603_s0  ;;  %s602_s16 = scalar_lea.sflag [#allocation20], %s601_s18 }
 0x1ad   : > { %p9736_p5 = scmp.ne.s32.totalorder %s9709_s4, 0 }
 0x1ae   : > { %s9084_s5 = scalar_lea.vmem [#allocation19], %s7388_s3 }
 0x1af   : > { %8584 = dma.done.wait (%p9736_p5), %s602_s16, 41040  }
 0x1b0   : > { %8586 = vsyncadd (%p9736_p5), %s602_s16, 4294926256  ;;  %v8627_v0 = vmov 0.0   ;;  %vm8628_vm0 = vmmov 0   ;;  %v7559_v1 = vld [vmem:[#allocation2] sm:$0xff]   ;;  %v7560_v2 = vld [vmem:[#allocation2 + $0x8] sm:$0xff]   ;;  %s9737_s29 = sld [smem:[#allocation30_spill]] }
 0x1b1   : > { %7322 = vmatprep.subr.bf16.mxu0 %v8627_v0  ;;  %7338 = vmatprep.mubr.msk.bf16.mxu0 %vm8628_vm0, %v8627_v0  ;;  %v7561_v3 = vld [vmem:[#allocation2 + $0x10] sm:$0xff]   ;;  %v7569_v5 = vld [vmem:[#allocation6] ss:$8 sps:$4 sm:$0xff]   ;;  %v7562_v6 = vld [vmem:[#allocation2 + $0x18] sm:$0xff]   ;;  %v8629_v26 = vmov 0   ;;  %s7389_s21 = smul.u32 5, %s603_s0 }
 0x1b2   : > { %7323 = vmatpush3.bf16.msra.mxu0 %v7559_v1  ;;  %v7567_v4 = vld [vmem:[#allocation6 + $0x4] ss:$8 sps:$4 sm:$0xff]   ;;  %v7570_v7 = vld [vmem:[#allocation6 + $0x14] ss:$8 sps:$4 sm:$0xff]   ;;  %v7572_v8 = vld [vmem:[#allocation6 + $0x10] ss:$8 sps:$4 sm:$0xff]   ;;  %917 = vmatprep.mubr.bf16.mxu1 %v8629_v26 }
 0x1b3   : > { %7324 = vmatprep.subr.bf16.mxu0 %v8627_v0  ;;  %885 = vmatprep.subr.bf16.mxu1 %v7567_v4  ;;  %v7573_v9 = vld [vmem:[#allocation6 + $0x24] ss:$8 sps:$4 sm:$0xff]   ;;  %v7575_v12 = vld [vmem:[#allocation6 + $0x20] ss:$8 sps:$4 sm:$0xff]   ;;  %v7576_v13 = vld [vmem:[#allocation6 + $0x34] ss:$8 sps:$4 sm:$0xff]  }
 0x1b4   : > { %886 = vmatpush1.bf16.msra.mxu1 %v7569_v5  ;;  %v7563_v10 = vld [vmem:[#allocation2 + $0x20] sm:$0xff]   ;;  %v7564_v11 = vld [vmem:[#allocation2 + $0x28] sm:$0xff]   ;;  %v7578_v14 = vld [vmem:[#allocation6 + $0x30] ss:$8 sps:$4 sm:$0xff]   ;;  %s614_s22 = scalar_lea.vmem [#allocation21], %s7389_s21  ;;  %s666_s24 = smul.u32 5, %s8726_s19 }
 0x1b5   : > { %887 = vmatprep.subr.bf16.mxu1 %v7570_v7  ;;  %v7579_v15 = vld [vmem:[#allocation6 + $0x44] ss:$8 sps:$4 sm:$0xff]   ;;  %v7581_v17 = vld [vmem:[#allocation6 + $0x40] ss:$8 sps:$4 sm:$0xff]   ;;  %v7582_v18 = vld [vmem:[#allocation6 + $0x54] ss:$8 sps:$4 sm:$0xff]  }
 0x1b6   : > { %7325 = vmatpush3.bf16.msra.mxu0 %v7560_v2  ;;  %v7565_v16 = vld [vmem:[#allocation2 + $0x30] sm:$0xff]   ;;  %v7566_v19 = vld [vmem:[#allocation2 + $0x38] sm:$0xff]   ;;  %v673_v21 = vld [vmem:[%s9737_s29] sm:$0xf]  ;;  %p9628_p6 = scmp.lt.s32.totalorder %s666_s24, 24  ;;  %s9739_s6 = sld [smem:[#allocation42_spill]] }
 0x1b7   : > { %7326 = vmatprep.subr.bf16.mxu0 %v8627_v0  ;;  %v7584_v20 = vld [vmem:[#allocation6 + $0x50] ss:$8 sps:$4 sm:$0xff]   ;;  %v7585_v22 = vld [vmem:[#allocation6 + $0x64] ss:$8 sps:$4 sm:$0xff]   ;;  %v7587_v23 = vld [vmem:[#allocation6 + $0x60] ss:$8 sps:$4 sm:$0xff]  }
 0x1b8   : > { %888 = vmatpush1.bf16.msra.mxu1 %v7572_v8  ;;  %v7588_v24 = vld [vmem:[#allocation6 + $0x74] ss:$8 sps:$4 sm:$0xff]   ;;  %v7590_v25 = vld [vmem:[#allocation6 + $0x70] ss:$8 sps:$4 sm:$0xff]   ;;  %s9745_s24 = smov (!%p9628_p6, %s666_s24), 24 }
 0x1b9   : > { %889 = vmatprep.subr.bf16.mxu1 %v7573_v9  ;;  %v7591_v27 = vld [vmem:[#allocation10] ss:$16 sps:$4 sm:$0xff]   ;;  %v7593_v28 = vld [vmem:[#allocation10 + $0x4] ss:$16 sps:$4 sm:$0xff]   ;;  %v7596_v29 = vld [vmem:[#allocation10 + $0xc] ss:$16 sps:$4 sm:$0xff]  }
 0x1ba   : > { %7327 = vmatpush3.bf16.msra.mxu0 %v7561_v3  ;;  %v7599_v30 = vld [vmem:[#allocation10 + $0x24] ss:$16 sps:$4 sm:$0xff]   ;;  %v7597_v31 = vld [vmem:[#allocation10 + $0x20] ss:$16 sps:$4 sm:$0xff]   ;;  %v6556_v32 = vld [vmem:[#allocation4] ss:$0 sm:$0xff] }
 0x1bb   : > { %7328 = vmatprep.subr.bf16.mxu0 %v8627_v0  ;;  %v7594_v40 = vld [vmem:[#allocation10 + $0x8] ss:$16 sps:$4 sm:$0xff]   ;;  %v7602_v42 = vld [vmem:[#allocation10 + $0x2c] ss:$16 sps:$4 sm:$0xff]   ;;  %v7605_v44 = vld [vmem:[#allocation10 + $0x44] ss:$16 sps:$4 sm:$0xff]  }
 0x1bc   : > { %890 = vmatpush1.bf16.msra.mxu1 %v7575_v12  ;;  %v7600_v43 = vld [vmem:[#allocation10 + $0x28] ss:$16 sps:$4 sm:$0xff]   ;;  %v7608_v45 = vld [vmem:[#allocation10 + $0x4c] ss:$16 sps:$4 sm:$0xff]   ;;  %v7603_v46 = vld [vmem:[#allocation10 + $0x40] ss:$16 sps:$4 sm:$0xff]  }
 0x1bd   : > { %891 = vmatprep.subr.bf16.mxu1 %v7576_v13  ;;  %v7606_v47 = vld [vmem:[#allocation10 + $0x48] ss:$16 sps:$4 sm:$0xff]   ;;  %v7611_v48 = vld [vmem:[#allocation10 + $0x64] ss:$16 sps:$4 sm:$0xff]   ;;  %v7614_v49 = vld [vmem:[#allocation10 + $0x6c] ss:$16 sps:$4 sm:$0xff]  }
 0x1be   : > { %7329 = vmatpush3.bf16.msra.mxu0 %v7562_v6  ;;  %v7609_v50 = vld [vmem:[#allocation10 + $0x60] ss:$16 sps:$4 sm:$0xff]   ;;  %v7612_v51 = vld [vmem:[#allocation10 + $0x68] ss:$16 sps:$4 sm:$0xff]   ;;  %v7617_v52 = vld [vmem:[#allocation10 + $0x84] ss:$16 sps:$4 sm:$0xff]  }
 0x1bf   : > { %7330 = vmatprep.subr.bf16.mxu0 %v8627_v0  ;;  %v7620_v53 = vld [vmem:[#allocation10 + $0x8c] ss:$16 sps:$4 sm:$0xff]   ;;  %v7615_v54 = vld [vmem:[#allocation10 + $0x80] ss:$16 sps:$4 sm:$0xff]   ;;  %v7618_v55 = vld [vmem:[#allocation10 + $0x88] ss:$16 sps:$4 sm:$0xff]  }
 0x1c0   : > { %892 = vmatpush1.bf16.msra.mxu1 %v7578_v14  ;;  %v7623_v56 = vld [vmem:[#allocation10 + $0xa4] ss:$16 sps:$4 sm:$0xff]   ;;  %v7626_v57 = vld [vmem:[#allocation10 + $0xac] ss:$16 sps:$4 sm:$0xff]   ;;  %v7621_v58 = vld [vmem:[#allocation10 + $0xa0] ss:$16 sps:$4 sm:$0xff]  }
 0x1c1   : > { %893 = vmatprep.subr.bf16.mxu1 %v7579_v15  ;;  %v7624_v59 = vld [vmem:[#allocation10 + $0xa8] ss:$16 sps:$4 sm:$0xff]   ;;  %v7629_v60 = vld [vmem:[#allocation10 + $0xc4] ss:$16 sps:$4 sm:$0xff]   ;;  %v7632_v61 = vld [vmem:[#allocation10 + $0xcc] ss:$16 sps:$4 sm:$0xff]  }
 0x1c2   : > { %7331 = vmatpush3.bf16.msra.mxu0 %v7563_v10  ;;  %v7627_v62 = vld [vmem:[#allocation10 + $0xc0] ss:$16 sps:$4 sm:$0xff]   ;;  %v7630_v63 = vld [vmem:[#allocation10 + $0xc8] ss:$16 sps:$4 sm:$0xff]   ;;  %v7638_v1 = vld [vmem:[#allocation10 + $0xec] ss:$16 sps:$4 sm:$0xff]  }
 0x1c3   : > { %7332 = vmatprep.subr.bf16.mxu0 %v8627_v0  ;;  %v7633_v2 = vld [vmem:[#allocation10 + $0xe0] ss:$16 sps:$4 sm:$0xff]   ;;  %v7636_v3 = vld [vmem:[#allocation10 + $0xe8] ss:$16 sps:$4 sm:$0xff]   ;;  %v7641_v4 = vld [vmem:[#allocation10 + $0x104] ss:$16 sps:$4 sm:$0xff]  }
 0x1c4   : > { %894 = vmatpush1.bf16.msra.mxu1 %v7581_v17  ;;  %v7644_v5 = vld [vmem:[#allocation10 + $0x10c] ss:$16 sps:$4 sm:$0xff]   ;;  %v7639_v6 = vld [vmem:[#allocation10 + $0x100] ss:$16 sps:$4 sm:$0xff]   ;;  %v7642_v7 = vld [vmem:[#allocation10 + $0x108] ss:$16 sps:$4 sm:$0xff]  }
 0x1c5   : > { %895 = vmatprep.subr.bf16.mxu1 %v7582_v18  ;;  %v7647_v8 = vld [vmem:[#allocation10 + $0x124] ss:$16 sps:$4 sm:$0xff]   ;;  %v7650_v9 = vld [vmem:[#allocation10 + $0x12c] ss:$16 sps:$4 sm:$0xff]   ;;  %v7645_v10 = vld [vmem:[#allocation10 + $0x120] ss:$16 sps:$4 sm:$0xff]  }
 0x1c6   : > { %7333 = vmatpush3.bf16.msra.mxu0 %v7564_v11  ;;  %v7648_v11 = vld [vmem:[#allocation10 + $0x128] ss:$16 sps:$4 sm:$0xff]   ;;  %v7653_v12 = vld [vmem:[#allocation10 + $0x144] ss:$16 sps:$4 sm:$0xff]   ;;  %v7656_v13 = vld [vmem:[#allocation10 + $0x14c] ss:$16 sps:$4 sm:$0xff]  }
 0x1c7   : > { %7334 = vmatprep.subr.bf16.mxu0 %v8627_v0  ;;  %v7651_v14 = vld [vmem:[#allocation10 + $0x140] ss:$16 sps:$4 sm:$0xff]   ;;  %v7654_v15 = vld [vmem:[#allocation10 + $0x148] ss:$16 sps:$4 sm:$0xff]   ;;  %v7662_v17 = vld [vmem:[#allocation10 + $0x16c] ss:$16 sps:$4 sm:$0xff]  }
 0x1c8   : > { %896 = vmatpush1.bf16.msra.mxu1 %v7584_v20  ;;  %v7657_v18 = vld [vmem:[#allocation10 + $0x160] ss:$16 sps:$4 sm:$0xff]   ;;  %v7665_v20 = vld [vmem:[#allocation10 + $0x184] ss:$16 sps:$4 sm:$0xff]   ;;  %s6555_s19 = sshll.u32 %s9745_s24, 3 }
 0x1c9   : > { %897 = vmatprep.subr.bf16.mxu1 %v7585_v22  ;;  %v7663_v22 = vld [vmem:[#allocation10 + $0x180] ss:$16 sps:$4 sm:$0xff]   ;;  %s9637_s1 = scalar_lea.vmem %s9739_s6, %s6555_s19 }
 0x1ca   : > { %7335 = vmatpush3.bf16.msra.mxu0 %v7565_v16  ;;  %v7659_v16 = vld [vmem:[#allocation10 + $0x164] ss:$16 sps:$4 sm:$0xff]   ;;  %v7669_v26 = vld [vmem:[#allocation10 + $0x1a0] ss:$16 sps:$4 sm:$0xff]  }
 0x1cb   : > { %7336 = vmatprep.subr.bf16.mxu0 %v8627_v0  ;;  %v7635_v0 = vld [vmem:[#allocation10 + $0xe4] ss:$16 sps:$4 sm:$0xff]  }
 0x1cc   : > { %898 = vmatpush1.bf16.msra.mxu1 %v7587_v23  ;;  %v7666_v23 = vld [vmem:[#allocation10 + $0x188] ss:$16 sps:$4 sm:$0xff]  }
 0x1cd   : > { %899 = vmatprep.subr.bf16.mxu1 %v7588_v24  ;;  %v7671_v24 = vld [vmem:[#allocation10 + $0x1a4] ss:$16 sps:$4 sm:$0xff]  }
 0x1ce   : > { %7337 = vmatpush3.bf16.msra.mxu0 %v7566_v19  ;;  %v7660_v19 = vld [vmem:[#allocation10 + $0x168] ss:$16 sps:$4 sm:$0xff]  }
 0x1cf   : > { %1385 = vmatprep.subr.bf16.mxu0 %v7593_v28  ;;  %v7677_v28 = vld [vmem:[#allocation10 + $0x1c4] ss:$16 sps:$4 sm:$0xff]  }
 0x1d0   : > { %900 = vmatpush1.bf16.msra.mxu1 %v7590_v25  ;;  %v7674_v25 = vld [vmem:[#allocation10 + $0x1ac] ss:$16 sps:$4 sm:$0xff]  }
 0x1d1   : > { %7339 = vmatmul.mubr.bf16.vlgmr.msra.gmra.mrb[0].mxu0 %v673_v21  ;;  %1426 = vmatprep.subr.bf16.mxu1 %v7596_v29  ;;  %v7668_v21 = vld [vmem:[#allocation10 + $0x18c] ss:$16 sps:$4 sm:$0xff]  }
 0x1d2   : > { %1386 = vmatpush1.bf16.msra.mxu0 %v7591_v27  ;;  %v7672_v27 = vld [vmem:[#allocation10 + $0x1a8] ss:$16 sps:$4 sm:$0xff]   ;;  %v7680_v29 = vld [vmem:[#allocation10 + $0x1cc] ss:$16 sps:$4 sm:$0xff]  }
 0x1d3   : > { %1387 = vmatprep.subr.bf16.mxu0 %v7599_v30  ;;  %v7675_v30 = vld [vmem:[#allocation10 + $0x1c0] ss:$16 sps:$4 sm:$0xff]  }
 0x1d6   : > { %1388 = vmatpush1.bf16.msra.mxu0 %v7597_v31  ;;  %v7678_v31 = vld [vmem:[#allocation10 + $0x1c8] ss:$16 sps:$4 sm:$0xff]  }
 0x1d7   : > { %1389 = vmatprep.subr.bf16.mxu0 %v7605_v44 }
 0x1da   : > { %1390 = vmatpush1.bf16.msra.mxu0 %v7603_v46 }
 0x1db   : > { %1391 = vmatprep.subr.bf16.mxu0 %v7611_v48 }
 0x1de   : > { %1392 = vmatpush1.bf16.msra.mxu0 %v7609_v50 }
 0x1df   : > { %1393 = vmatprep.subr.bf16.mxu0 %v7617_v52 }
 0x1e2   : > { %1394 = vmatpush1.bf16.msra.mxu0 %v7615_v54 }
 0x1e3   : > { %1395 = vmatprep.subr.bf16.mxu0 %v7623_v56 }
 0x1e6   : > { %1396 = vmatpush1.bf16.msra.mxu0 %v7621_v58 }
 0x1e7   : > { %1397 = vmatprep.subr.bf16.mxu0 %v7629_v60 }
 0x1ea   : > { %1398 = vmatpush1.bf16.msra.mxu0 %v7627_v62 }
 0x1eb   : > { %1399 = vmatprep.subr.bf16.mxu0 %v7635_v0 }
 0x1ee   : > { %1400 = vmatpush1.bf16.msra.mxu0 %v7633_v2 }
 0x1ef   : > { %1401 = vmatprep.subr.bf16.mxu0 %v7641_v4 }
 0x1f2   : > { %1402 = vmatpush1.bf16.msra.mxu0 %v7639_v6 }
 0x1f3   : > { %1403 = vmatprep.subr.bf16.mxu0 %v7647_v8 }
 0x1f6   : > { %1404 = vmatpush1.bf16.msra.mxu0 %v7645_v10 }
 0x1f7   : > { %1405 = vmatprep.subr.bf16.mxu0 %v7653_v12 }
 0x1fa   : > { %1406 = vmatpush1.bf16.msra.mxu0 %v7651_v14 }
 0x1fb   : > { %1407 = vmatprep.subr.bf16.mxu0 %v7659_v16 }
 0x1fe   : > { %1408 = vmatpush1.bf16.msra.mxu0 %v7657_v18 }
 0x1ff   : > { %1409 = vmatprep.subr.bf16.mxu0 %v7665_v20 }
 0x202   : > { %1410 = vmatpush1.bf16.msra.mxu0 %v7663_v22 }
 0x203   : > { %1411 = vmatprep.subr.bf16.mxu0 %v7671_v24 }
 0x206   : > { %1412 = vmatpush1.bf16.msra.mxu0 %v7669_v26 }
 0x207   : > { %1413 = vmatprep.subr.bf16.mxu0 %v7677_v28 }
 0x20a   : > { %1414 = vmatpush1.bf16.msra.mxu0 %v7675_v30 }
 0x2a4   : > { %v779_v33 = vpop.f32.mrb[0].mxu0 }
 0x2a5   : > { %v780_v34 = vadd.f32 %v6556_v32, %v779_v33  ;;  %v7340_v35 = vpop.f32.mrb[1].mxu0  ;;  %v7683_v32 = vld [vmem:[#allocation10 + $0x1e4] ss:$16 sps:$4 sm:$0xff]   ;;  %v7686_v33 = vld [vmem:[#allocation10 + $0x1ec] ss:$16 sps:$4 sm:$0xff]  }
 0x2a6   : > { %v782_v36 = vpop.f32.mrb[2].mxu0  ;;  %v7684_v35 = vld [vmem:[#allocation10 + $0x1e8] ss:$16 sps:$4 sm:$0xff]   ;;  %1415 = vmatprep.subr.bf16.mxu0 %v7683_v32 }
 0x2a7   : > { %vm785_vm1 = vcmp.gt.f32.partialorder %v780_v34, 0.0  ;;  %v786_v37 = vmul.f32 0.2, %v780_v34  ;;  %v7341_v38 = vpop.f32.mrb[3].mxu0  ;;  %v9093_v36 = vld [vmem:[#allocation15] sm:$0xff] }
 0x2a8   : > { %v9097_v38 = vld [vmem:[#allocation15 + $0x8] sm:$0xff] }
 0x2a9   : > { %v787_v39 = vsel %vm785_vm1, %v780_v34, %v786_v37  ;;  %v7681_v34 = vld [vmem:[#allocation10 + $0x1e0] ss:$16 sps:$4 sm:$0xff]   ;;  %v9095_v37 = vld [vmem:[#allocation15 + $0x20] sm:$0xff] }
 0x2aa   : > { %v788_v41 = vpack.c.bf16 %v787_v39, %v787_v39  ;;  %1416 = vmatpush1.bf16.msra.mxu0 %v7681_v34  ;;  %v6645_v39 = vcombine.low %v9093_v36, %v9095_v37 }
 0x2ac   : > { %918 = vmatmul.mubr.bf16.vlgmr.msra.gmra.mrb[0].mxu1 %v788_v41  ;;  %v9103_v41 = vld [vmem:[#allocation15 + $0x28] sm:$0xff] }
 0x2ad   : > { %1427 = vmatpush1.bf16.msra.mxu1 %v7594_v40  ;;  %v6646_v40 = vcombine.high %v9093_v36, %v9095_v37  ;;  %v1635_v36 = vld [vmem:[#allocation15 + $0xc0] sm:$0xff] }
 0x2ae   : > { %1428 = vmatprep.subr.bf16.mxu1 %v7602_v42  ;;  %v6647_v42 = vcombine.low %v9097_v38, %v9103_v41  ;;  %v1639_v37 = vld [vmem:[#allocation15 + $0xe0] sm:$0xff] }
 0x2af   : > { %3147 = vmatprep.subr.bf16.mxu0 %v6646_v40 }
 0x2b1   : > { %1429 = vmatpush1.bf16.msra.mxu1 %v7600_v43  ;;  %v6648_v43 = vcombine.high %v9097_v38, %v9103_v41  ;;  %v1636_v38 = vld [vmem:[#allocation15 + $0xc8] sm:$0xff] }
 0x2b2   : > { %1430 = vmatprep.subr.bf16.mxu1 %v7608_v45  ;;  %v1640_v41 = vld [vmem:[#allocation15 + $0xe8] sm:$0xff] }
 0x2b5   : > { %1431 = vmatpush1.bf16.msra.mxu1 %v7606_v47 }
 0x2b6   : > { %1432 = vmatprep.subr.bf16.mxu1 %v7614_v49 }
 0x2b9   : > { %1433 = vmatpush1.bf16.msra.mxu1 %v7612_v51 }
 0x2ba   : > { %1434 = vmatprep.subr.bf16.mxu1 %v7620_v53 }
 0x2bd   : > { %1435 = vmatpush1.bf16.msra.mxu1 %v7618_v55 }
 0x2be   : > { %1436 = vmatprep.subr.bf16.mxu1 %v7626_v57 }
 0x2c1   : > { %1437 = vmatpush1.bf16.msra.mxu1 %v7624_v59 }
 0x2c2   : > { %1438 = vmatprep.subr.bf16.mxu1 %v7632_v61 }
 0x2c5   : > { %1439 = vmatpush1.bf16.msra.mxu1 %v7630_v63 }
 0x2c6   : > { %1440 = vmatprep.subr.bf16.mxu1 %v7638_v1 }
 0x2c9   : > { %1441 = vmatpush1.bf16.msra.mxu1 %v7636_v3 }
 0x2ca   : > { %1442 = vmatprep.subr.bf16.mxu1 %v7644_v5 }
 0x2cd   : > { %1443 = vmatpush1.bf16.msra.mxu1 %v7642_v7 }
 0x2ce   : > { %1444 = vmatprep.subr.bf16.mxu1 %v7650_v9 }
 0x2d1   : > { %1445 = vmatpush1.bf16.msra.mxu1 %v7648_v11 }
 0x2d2   : > { %1446 = vmatprep.subr.bf16.mxu1 %v7656_v13 }
 0x2d5   : > { %1447 = vmatpush1.bf16.msra.mxu1 %v7654_v15  ;;  %v968_v15 = vlaneseq }
 0x2d6   : > { %1448 = vmatprep.subr.bf16.mxu1 %v7662_v17 }
 0x2d9   : > { %1449 = vmatpush1.bf16.msra.mxu1 %v7660_v19  ;;  %v9109_v19 = vshrl.u32 %v968_v15, 7 }
 0x2da   : > { %1450 = vmatprep.subr.bf16.mxu1 %v7668_v21  ;;  %v926_v21 = vld [vmem:[#allocation7] sm:$0x3] }
 0x2db   : > { %v9112_v20 = vsub.s32 0, %v9109_v19  ;;  %v9115_v22 = vsub.s32 1, %v9109_v19 }
 0x2dd   : > { %1451 = vmatpush1.bf16.msra.mxu1 %v7666_v23  ;;  %v927_v23 = vld [vmem:[#allocation9] sm:$0x3]  ;;  %v971_v24 = vrot.slane %v926_v21, %v9112_v20  ;;  %v975_v26 = vrot.slane %v926_v21, %v9115_v22  ;;  %v1663_v21 = vld [vmem:[#allocation15 + $0x1a0] sm:$0xff] }
 0x2de   : > { %1452 = vmatprep.subr.bf16.mxu1 %v7674_v25 }
 0x2e1   : > { %1453 = vmatpush1.bf16.msra.mxu1 %v7672_v27 }
 0x2e2   : > { %1454 = vmatprep.subr.bf16.mxu1 %v7680_v29  ;;  %v984_v29 = vrot.slane %v927_v23, %v9112_v20 }
 0x2e5   : > { %1455 = vmatpush1.bf16.msra.mxu1 %v7678_v31  ;;  %v988_v31 = vrot.slane %v927_v23, %v9115_v22  ;;  %v1660_v23 = vld [vmem:[#allocation15 + $0x188] sm:$0xff] }
 0x2e6   : > { %1456 = vmatprep.subr.bf16.mxu1 %v7686_v33 }
 0x2e9   : > { %1457 = vmatpush1.bf16.msra.mxu1 %v7684_v35 }
 0x2ea   : > { %3229 = vmatprep.subr.bf16.mxu1 %v6648_v43 }
 0x37f   : > { %v919_v44 = vpop.f32.mrb[0].mxu1 }
 0x380   : > { %v928_v45 = vrot.slane %v919_v44, 4  ;;  %v921_v46 = vpop.f32.mrb[1].mxu1 }
 0x381   : > { %v934_v47 = vrot.slane %v921_v46, 4  ;;  %v923_v48 = vpop.f32.mrb[2].mxu1 }
 0x382   : > { %v929_v49 = vadd.f32 %v928_v45, %v919_v44  ;;  %v924_v50 = vpop.f32.mrb[3].mxu1  ;;  %v1624_v48 = vld [vmem:[#allocation15 + $0x68] sm:$0xff] }
 0x383   : > { %v935_v51 = vadd.f32 %v934_v47, %v921_v46  ;;  %v1620_v47 = vld [vmem:[#allocation15 + $0x48] sm:$0xff] }
 0x384   : > { %v930_v52 = vrot.slane %v929_v49, 2 }
 0x385   : > { %v936_v53 = vrot.slane %v935_v51, 2 }
 0x386   : > { %v931_v54 = vadd.f32 %v930_v52, %v929_v49 }
 0x387   : > { %v937_v55 = vadd.f32 %v936_v53, %v935_v51  ;;  %v6656_v53 = vcombine.high %v1620_v47, %v1624_v48 }
 0x388   : > { %v932_v56 = vrot.slane %v931_v54, 1 }
 0x389   : > { %v938_v57 = vrot.slane %v937_v55, 1 }
 0x38a   : > { %v933_v58 = vadd.f32 %v932_v56, %v931_v54  ;;  %v1627_v56 = vld [vmem:[#allocation15 + $0x80] sm:$0xff] }
 0x38b   : > { %v939_v59 = vadd.f32 %v938_v57, %v937_v55  ;;  %v6655_v55 = vcombine.low %v1620_v47, %v1624_v48  ;;  %v1631_v57 = vld [vmem:[#allocation15 + $0xa0] sm:$0xff]  ;;  %v1680_v47 = vld [vmem:[#allocation15 + $0x228] sm:$0xff] }
 0x38c   : > { %v941_v60 = vmul.f32 0.125, %v933_v58  ;;  %v1628_v58 = vld [vmem:[#allocation15 + $0x88] sm:$0xff] }
 0x38d   : > { %v942_v61 = vmul.f32 0.125, %v939_v59  ;;  %v6662_v59 = vcombine.high %v1627_v56, %v1631_v57 }
 0x38e   : > { %v943_v62 = vsub.f32 %v919_v44, %v941_v60  ;;  %v1619_v44 = vld [vmem:[#allocation15 + $0x40] sm:$0xff]  ;;  %v1632_v60 = vld [vmem:[#allocation15 + $0xa8] sm:$0xff] }
 0x38f   : > { %v944_v63 = vsub.f32 %v921_v46, %v942_v61  ;;  %v1623_v46 = vld [vmem:[#allocation15 + $0x60] sm:$0xff]  ;;  %v6661_v61 = vcombine.low %v1627_v56, %v1631_v57 }
 0x390   : > { %v945_v0 = vmul.f32 %v943_v62, %v943_v62  ;;  %v6654_v52 = vcombine.high %v1619_v44, %v1623_v46  ;;  %v6653_v54 = vcombine.low %v1619_v44, %v1623_v46  ;;  %v1679_v44 = vld [vmem:[#allocation15 + $0x220] sm:$0xff] }
 0x391   : > { %v946_v1 = vmul.f32 %v944_v63, %v944_v63 }
 0x392   : > { %v947_v2 = vrot.slane %v945_v0, 4 }
 0x393   : > { %v953_v3 = vrot.slane %v946_v1, 4 }
 0x394   : > { %v948_v4 = vadd.f32 %v947_v2, %v945_v0  ;;  %v6671_v0 = vcombine.low %v1636_v38, %v1640_v41  ;;  %v1643_v2 = vld [vmem:[#allocation15 + $0x100] sm:$0xff] }
 0x395   : > { %v954_v5 = vadd.f32 %v953_v3, %v946_v1  ;;  %v6672_v1 = vcombine.high %v1636_v38, %v1640_v41  ;;  %v1647_v3 = vld [vmem:[#allocation15 + $0x120] sm:$0xff] }
 0x396   : > { %v949_v6 = vrot.slane %v948_v4, 2  ;;  %v1703_v41 = vld [vmem:[#allocation15 + $0x2e0] sm:$0xff] }
 0x397   : > { %v955_v7 = vrot.slane %v954_v5, 2 }
 0x398   : > { %v950_v8 = vadd.f32 %v949_v6, %v948_v4  ;;  %v1644_v4 = vld [vmem:[#allocation15 + $0x108] sm:$0xff] }
 0x399   : > { %v956_v9 = vadd.f32 %v955_v7, %v954_v5  ;;  %v6678_v5 = vcombine.high %v1643_v2, %v1647_v3  ;;  %v1648_v6 = vld [vmem:[#allocation15 + $0x128] sm:$0xff]  ;;  %v6677_v7 = vcombine.low %v1643_v2, %v1647_v3 }
 0x39a   : > { %v951_v10 = vrot.slane %v950_v8, 1 }
 0x39b   : > { %v957_v11 = vrot.slane %v956_v9, 1 }
 0x39c   : > { %v952_v12 = vadd.f32 %v951_v10, %v950_v8  ;;  %v6679_v8 = vcombine.low %v1644_v4, %v1648_v6  ;;  %v1651_v10 = vld [vmem:[#allocation15 + $0x140] sm:$0xff] }
 0x39d   : > { %v958_v13 = vadd.f32 %v957_v11, %v956_v9  ;;  %v6680_v9 = vcombine.high %v1644_v4, %v1648_v6  ;;  %v1655_v11 = vld [vmem:[#allocation15 + $0x160] sm:$0xff] }
 0x39e   : > { %v959_v14 = vmul.f32 0.125, %v952_v12  ;;  %v1652_v12 = vld [vmem:[#allocation15 + $0x148] sm:$0xff]  ;;  %v6685_v15 = vcombine.low %v1651_v10, %v1655_v11  ;;  %v1711_v6 = vld [vmem:[#allocation15 + $0x320] sm:$0xff] }
 0x39f   : > { %v960_v16 = vmul.f32 0.125, %v958_v13  ;;  %v6686_v13 = vcombine.high %v1651_v10, %v1655_v11 }
 0x3a0   : > { %v961_v17 = vadd.f32 0.8, %v959_v14  ;;  %v1656_v14 = vld [vmem:[#allocation15 + $0x168] sm:$0xff] }
 0x3a1   : > { %v962_v18 = vadd.f32 0.8, %v960_v16  ;;  %v6687_v16 = vcombine.low %v1652_v12, %v1656_v14 }
 0x3a2   : > { %8135 = vrsqrt.f32 %v961_v17  ;;  %v6688_v17 = vcombine.high %v1652_v12, %v1656_v14  ;;  %v1719_v14 = vld [vmem:[#allocation15 + $0x360] sm:$0xff] }
 0x3a3   : > { %8137 = vrsqrt.f32 %v962_v18  ;;  %v1659_v18 = vld [vmem:[#allocation15 + $0x180] sm:$0xff] }
 0x3ac   : > { %v8136_v25 = vpop.eup %8135 }
 0x3ad   : > { %v8138_v27 = vpop.eup %8137  ;;  %v965_v28 = vmul.f32 %v8136_v25, %v943_v62  ;;  %v6663_v62 = vcombine.low %v1628_v58, %v1632_v60  ;;  %v1664_v25 = vld [vmem:[#allocation15 + $0x1a8] sm:$0xff] }
 0x3ae   : > { %v966_v30 = vmul.f32 %v8138_v27, %v944_v63  ;;  %v6664_v63 = vcombine.high %v1628_v58, %v1632_v60  ;;  %v6695_v27 = vcombine.low %v1660_v23, %v1664_v25  ;;  %v1695_v60 = vld [vmem:[#allocation15 + $0x2a0] sm:$0xff] }
 0x3af   : > { %v978_v32 = vmul.f32 %v971_v24, %v965_v28  ;;  %v6694_v24 = vcombine.high %v1659_v18, %v1663_v21  ;;  %v6696_v28 = vcombine.high %v1660_v23, %v1664_v25  ;;  %v1727_v25 = vld [vmem:[#allocation15 + $0x3a0] sm:$0xff] }
 0x3b0   : > { %v979_v33 = vmul.f32 %v975_v26, %v966_v30  ;;  %v6693_v26 = vcombine.low %v1659_v18, %v1663_v21  ;;  %v1671_v30 = vld [vmem:[#allocation15 + $0x1e0] sm:$0xff] }
 0x3b1   : > { %v991_v34 = vadd.f32 %v984_v29, %v978_v32  ;;  %v1667_v29 = vld [vmem:[#allocation15 + $0x1c0] sm:$0xff] }
 0x3b2   : > { %v992_v35 = vadd.f32 %v988_v31, %v979_v33  ;;  %v1668_v31 = vld [vmem:[#allocation15 + $0x1c8] sm:$0xff]  ;;  %v6702_v32 = vcombine.high %v1667_v29, %v1671_v30 }
 0x3b3   : > { %vm993_vm2 = vcmp.gt.f32.partialorder %v991_v34, 0.0  ;;  %v995_v40 = vmul.f32 0.2, %v991_v34  ;;  %v1672_v33 = vld [vmem:[#allocation15 + $0x1e8] sm:$0xff] }
 0x3b4   : > { %vm994_vm3 = vcmp.gt.f32.partialorder %v992_v35, 0.0  ;;  %v996_v43 = vmul.f32 0.2, %v992_v35 }
 0x3b5   : > { %v997_v45 = vsel %vm993_vm2, %v991_v34, %v995_v40  ;;  %v6701_v34 = vcombine.low %v1667_v29, %v1671_v30  ;;  %v6704_v40 = vcombine.high %v1668_v31, %v1672_v33 }
 0x3b6   : > { %v998_v49 = vsel %vm994_vm3, %v992_v35, %v996_v43  ;;  %v999_v51 = vpack.c.bf16 %v997_v45, %v997_v45  ;;  %v6703_v35 = vcombine.low %v1668_v31, %v1672_v33  ;;  %v1675_v43 = vld [vmem:[#allocation15 + $0x200] sm:$0xff]  ;;  %v1676_v45 = vld [vmem:[#allocation15 + $0x208] sm:$0xff] }
 0x3b7   : > { %v1000_v50 = vpack.c.bf16 %v998_v49, %v998_v49  ;;  %v6710_v46 = vcombine.high %v1675_v43, %v1679_v44  ;;  %v6709_v48 = vcombine.low %v1675_v43, %v1679_v44  ;;  %v6711_v49 = vcombine.low %v1676_v45, %v1680_v47  ;;  %v1735_v33 = vld [vmem:[#allocation15 + $0x3e0] sm:$0xff]  ;;  %v1736_v43 = vld [vmem:[#allocation15 + $0x3e8] sm:$0xff] }
 0x3b9   : > { %1417 = vmatprep.mubr.bf16.mxu0 %v1000_v50  ;;  %1458 = vmatprep.mubr.bf16.mxu1 %v1000_v50  ;;  %v6712_v50 = vcombine.high %v1676_v45, %v1680_v47  ;;  %v9129_v47 = vld [vmem:[#allocation15 + $0x420] sm:$0xff] }
 0x3ba   : > { %1418 = vmatmul.mubr.bf16.vlgmr.msra.gmra.mrb[4].mxu0 %v999_v51  ;;  %1459 = vmatmul.mubr.bf16.vlgmr.msra.gmra.mrb[4].mxu1 %v999_v51  ;;  %v1683_v51 = vld [vmem:[#allocation15 + $0x240] sm:$0xff] }
 0x3bb   : > { %3148 = vmatpush1.bf16.msra.mxu0 %v6645_v39  ;;  %3230 = vmatpush1.bf16.msra.mxu1 %v6647_v42  ;;  %v6670_v39 = vcombine.high %v1635_v36, %v1639_v37  ;;  %v6669_v42 = vcombine.low %v1635_v36, %v1639_v37 }
 0x3bc   : > { %3149 = vmatprep.subr.bf16.mxu0 %v6654_v52  ;;  %3231 = vmatprep.subr.bf16.mxu1 %v6656_v53  ;;  %v1687_v52 = vld [vmem:[#allocation15 + $0x260] sm:$0xff]  ;;  %v1684_v53 = vld [vmem:[#allocation15 + $0x248] sm:$0xff] }
 0x3bd   : > { %v6717_v56 = vcombine.low %v1683_v51, %v1687_v52 }
 0x3bf   : > { %3150 = vmatpush1.bf16.msra.mxu0 %v6653_v54  ;;  %3232 = vmatpush1.bf16.msra.mxu1 %v6655_v55  ;;  %v6718_v54 = vcombine.high %v1683_v51, %v1687_v52  ;;  %v1688_v55 = vld [vmem:[#allocation15 + $0x268] sm:$0xff] }
 0x3c0   : > { %3151 = vmatprep.subr.bf16.mxu0 %v6662_v59  ;;  %3233 = vmatprep.subr.bf16.mxu1 %v6664_v63  ;;  %v6719_v57 = vcombine.low %v1684_v53, %v1688_v55  ;;  %v6720_v58 = vcombine.high %v1684_v53, %v1688_v55  ;;  %v1691_v59 = vld [vmem:[#allocation15 + $0x280] sm:$0xff]  ;;  %v1696_v63 = vld [vmem:[#allocation15 + $0x2a8] sm:$0xff] }
 0x3c1   : > { %v6725_v36 = vcombine.low %v1691_v59, %v1695_v60 }
 0x3c3   : > { %3152 = vmatpush1.bf16.msra.mxu0 %v6661_v61  ;;  %3234 = vmatpush1.bf16.msra.mxu1 %v6663_v62  ;;  %v1692_v61 = vld [vmem:[#allocation15 + $0x288] sm:$0xff]  ;;  %v6726_v62 = vcombine.high %v1691_v59, %v1695_v60 }
 0x3c4   : > { %3153 = vmatprep.subr.bf16.mxu0 %v6670_v39  ;;  %3235 = vmatprep.subr.bf16.mxu1 %v6672_v1  ;;  %v6727_v37 = vcombine.low %v1692_v61, %v1696_v63  ;;  %v6728_v38 = vcombine.high %v1692_v61, %v1696_v63  ;;  %v1699_v39 = vld [vmem:[#allocation15 + $0x2c0] sm:$0xff]  ;;  %v1704_v1 = vld [vmem:[#allocation15 + $0x2e8] sm:$0xff] }
 0x3c5   : > { %v6733_v2 = vcombine.low %v1699_v39, %v1703_v41 }
 0x3c7   : > { %3154 = vmatpush1.bf16.msra.mxu0 %v6669_v42  ;;  %3236 = vmatpush1.bf16.msra.mxu1 %v6671_v0  ;;  %v1700_v42 = vld [vmem:[#allocation15 + $0x2c8] sm:$0xff]  ;;  %v6734_v0 = vcombine.high %v1699_v39, %v1703_v41 }
 0x3c8   : > { %3155 = vmatprep.subr.bf16.mxu0 %v6678_v5  ;;  %3237 = vmatprep.subr.bf16.mxu1 %v6680_v9  ;;  %v6735_v3 = vcombine.low %v1700_v42, %v1704_v1  ;;  %v6736_v4 = vcombine.high %v1700_v42, %v1704_v1  ;;  %v1707_v5 = vld [vmem:[#allocation15 + $0x300] sm:$0xff]  ;;  %v1712_v9 = vld [vmem:[#allocation15 + $0x328] sm:$0xff] }
 0x3c9   : > { %v6741_v10 = vcombine.low %v1707_v5, %v1711_v6 }
 0x3cb   : > { %3156 = vmatpush1.bf16.msra.mxu0 %v6677_v7  ;;  %3238 = vmatpush1.bf16.msra.mxu1 %v6679_v8  ;;  %v1708_v7 = vld [vmem:[#allocation15 + $0x308] sm:$0xff]  ;;  %v6742_v8 = vcombine.high %v1707_v5, %v1711_v6 }
 0x3cc   : > { %3157 = vmatprep.subr.bf16.mxu0 %v6686_v13  ;;  %3239 = vmatprep.subr.bf16.mxu1 %v6688_v17  ;;  %v6743_v11 = vcombine.low %v1708_v7, %v1712_v9  ;;  %v6744_v12 = vcombine.high %v1708_v7, %v1712_v9  ;;  %v1715_v13 = vld [vmem:[#allocation15 + $0x340] sm:$0xff]  ;;  %v1720_v17 = vld [vmem:[#allocation15 + $0x368] sm:$0xff] }
 0x3cd   : > { %v6749_v18 = vcombine.low %v1715_v13, %v1719_v14 }
 0x3cf   : > { %3158 = vmatpush1.bf16.msra.mxu0 %v6685_v15  ;;  %3240 = vmatpush1.bf16.msra.mxu1 %v6687_v16  ;;  %v1716_v15 = vld [vmem:[#allocation15 + $0x348] sm:$0xff]  ;;  %v6750_v16 = vcombine.high %v1715_v13, %v1719_v14 }
 0x3d0   : > { %3159 = vmatprep.subr.bf16.mxu0 %v6694_v24  ;;  %3241 = vmatprep.subr.bf16.mxu1 %v6696_v28  ;;  %v6751_v21 = vcombine.low %v1716_v15, %v1720_v17  ;;  %v6752_v23 = vcombine.high %v1716_v15, %v1720_v17  ;;  %v1723_v24 = vld [vmem:[#allocation15 + $0x380] sm:$0xff]  ;;  %v1728_v28 = vld [vmem:[#allocation15 + $0x3a8] sm:$0xff] }
 0x3d1   : > { %v6757_v29 = vcombine.low %v1723_v24, %v1727_v25 }
 0x3d3   : > { %3160 = vmatpush1.bf16.msra.mxu0 %v6693_v26  ;;  %3242 = vmatpush1.bf16.msra.mxu1 %v6695_v27  ;;  %v1724_v26 = vld [vmem:[#allocation15 + $0x388] sm:$0xff]  ;;  %v6758_v27 = vcombine.high %v1723_v24, %v1727_v25 }
 0x3d4   : > { %3161 = vmatprep.subr.bf16.mxu0 %v6702_v32  ;;  %3243 = vmatprep.subr.bf16.mxu1 %v6704_v40  ;;  %v6759_v30 = vcombine.low %v1724_v26, %v1728_v28  ;;  %v6760_v31 = vcombine.high %v1724_v26, %v1728_v28  ;;  %v1731_v32 = vld [vmem:[#allocation15 + $0x3c0] sm:$0xff] }
 0x3d5   : > { %v6766_v40 = vcombine.high %v1731_v32, %v1735_v33 }
 0x3d7   : > { %3162 = vmatpush1.bf16.msra.mxu0 %v6701_v34  ;;  %3244 = vmatpush1.bf16.msra.mxu1 %v6703_v35  ;;  %v1732_v34 = vld [vmem:[#allocation15 + $0x3c8] sm:$0xff]  ;;  %v6765_v35 = vcombine.low %v1731_v32, %v1735_v33 }
 0x3d8   : > { %3163 = vmatprep.subr.bf16.mxu0 %v6710_v46  ;;  %3245 = vmatprep.subr.bf16.mxu1 %v6712_v50  ;;  %v6767_v44 = vcombine.low %v1732_v34, %v1736_v43  ;;  %v6768_v45 = vcombine.high %v1732_v34, %v1736_v43  ;;  %v9127_v46 = vld [vmem:[#allocation15 + $0x400] sm:$0xff]  ;;  %v9135_v50 = vld [vmem:[#allocation15 + $0x428] sm:$0xff] }
 0x3d9   : > { %v6773_v51 = vcombine.low %v9127_v46, %v9129_v47 }
 0x3db   : > { %3164 = vmatpush1.bf16.msra.mxu0 %v6709_v48  ;;  %3246 = vmatpush1.bf16.msra.mxu1 %v6711_v49  ;;  %v9131_v48 = vld [vmem:[#allocation15 + $0x408] sm:$0xff]  ;;  %v6774_v49 = vcombine.high %v9127_v46, %v9129_v47 }
 0x3dc   : > { %3165 = vmatprep.subr.bf16.mxu0 %v6718_v54  ;;  %3247 = vmatprep.subr.bf16.mxu1 %v6720_v58  ;;  %v6775_v52 = vcombine.low %v9131_v48, %v9135_v50  ;;  %v6776_v53 = vcombine.high %v9131_v48, %v9135_v50 }
 0x3df   : > { %3166 = vmatpush1.bf16.msra.mxu0 %v6717_v56  ;;  %3248 = vmatpush1.bf16.msra.mxu1 %v6719_v57 }
 0x3e0   : > { %3167 = vmatprep.subr.bf16.mxu0 %v6726_v62  ;;  %3249 = vmatprep.subr.bf16.mxu1 %v6728_v38 }
 0x3e3   : > { %3168 = vmatpush1.bf16.msra.mxu0 %v6725_v36  ;;  %3250 = vmatpush1.bf16.msra.mxu1 %v6727_v37 }
 0x3e4   : > { %3169 = vmatprep.subr.bf16.mxu0 %v6734_v0  ;;  %3251 = vmatprep.subr.bf16.mxu1 %v6736_v4 }
 0x3e7   : > { %3170 = vmatpush1.bf16.msra.mxu0 %v6733_v2  ;;  %3252 = vmatpush1.bf16.msra.mxu1 %v6735_v3 }
 0x3e8   : > { %3171 = vmatprep.subr.bf16.mxu0 %v6742_v8  ;;  %3253 = vmatprep.subr.bf16.mxu1 %v6744_v12 }
 0x3eb   : > { %3172 = vmatpush1.bf16.msra.mxu0 %v6741_v10  ;;  %3254 = vmatpush1.bf16.msra.mxu1 %v6743_v11 }
 0x3ec   : > { %3173 = vmatprep.subr.bf16.mxu0 %v6750_v16  ;;  %3255 = vmatprep.subr.bf16.mxu1 %v6752_v23 }
 0x3ef   : > { %3174 = vmatpush1.bf16.msra.mxu0 %v6749_v18  ;;  %3256 = vmatpush1.bf16.msra.mxu1 %v6751_v21 }
 0x3f0   : > { %3175 = vmatprep.subr.bf16.mxu0 %v6758_v27  ;;  %3257 = vmatprep.subr.bf16.mxu1 %v6760_v31 }
 0x3f3   : > { %3176 = vmatpush1.bf16.msra.mxu0 %v6757_v29  ;;  %3258 = vmatpush1.bf16.msra.mxu1 %v6759_v30 }
 0x3f4   : > { %3177 = vmatprep.subr.bf16.mxu0 %v6766_v40  ;;  %3259 = vmatprep.subr.bf16.mxu1 %v6768_v45 }
 0x3f7   : > { %3178 = vmatpush1.bf16.msra.mxu0 %v6765_v35  ;;  %3260 = vmatpush1.bf16.msra.mxu1 %v6767_v44 }
 0x3f8   : > { %3188 = vmatprep.subr.bf16.mxu0 %v6774_v49  ;;  %3270 = vmatprep.subr.bf16.mxu1 %v6776_v53 }
 0x48d   : > { %v1419_v54 = vpop.f32.mrb[4].mxu0  ;;  %v1460_v55 = vpop.f32.mrb[4].mxu1 }
 0x48e   : > { %v1469_v56 = vrot.slane %v1419_v54, 4  ;;  %v1481_v57 = vrot.slane %v1460_v55, 4  ;;  %v1421_v58 = vpop.f32.mrb[5].mxu0  ;;  %v1462_v59 = vpop.f32.mrb[5].mxu1 }
 0x48f   : > { %v1475_v60 = vrot.slane %v1421_v58, 4  ;;  %v1487_v61 = vrot.slane %v1462_v59, 4  ;;  %v1423_v62 = vpop.f32.mrb[6].mxu0  ;;  %v1464_v63 = vpop.f32.mrb[6].mxu1 }
 0x490   : > { %v1470_v36 = vadd.f32 %v1469_v56, %v1419_v54  ;;  %v1482_v37 = vadd.f32 %v1481_v57, %v1460_v55  ;;  %v1424_v38 = vpop.f32.mrb[7].mxu0  ;;  %v1465_v39 = vpop.f32.mrb[7].mxu1 }
 0x491   : > { %v1476_v41 = vadd.f32 %v1475_v60, %v1421_v58  ;;  %v1488_v42 = vadd.f32 %v1487_v61, %v1462_v59 }
 0x492   : > { %v1471_v0 = vrot.slane %v1470_v36, 2  ;;  %v1483_v1 = vrot.slane %v1482_v37, 2 }
 0x493   : > { %v1477_v2 = vrot.slane %v1476_v41, 2  ;;  %v1489_v3 = vrot.slane %v1488_v42, 2 }
 0x494   : > { %v1472_v4 = vadd.f32 %v1471_v0, %v1470_v36  ;;  %v1484_v5 = vadd.f32 %v1483_v1, %v1482_v37 }
 0x495   : > { %v1478_v6 = vadd.f32 %v1477_v2, %v1476_v41  ;;  %v1490_v7 = vadd.f32 %v1489_v3, %v1488_v42 }
 0x496   : > { %v1473_v8 = vrot.slane %v1472_v4, 1  ;;  %v1485_v9 = vrot.slane %v1484_v5, 1 }
 0x497   : > { %v1479_v10 = vrot.slane %v1478_v6, 1  ;;  %v1491_v11 = vrot.slane %v1490_v7, 1 }
 0x498   : > { %v1474_v12 = vadd.f32 %v1473_v8, %v1472_v4  ;;  %v1486_v13 = vadd.f32 %v1485_v9, %v1484_v5  ;;  %v1467_v5 = vld [vmem:[#allocation12] sm:$0xf]  ;;  %v9147_v8 = vsub.s32 3, %v9109_v19 }
 0x499   : > { %v1480_v14 = vadd.f32 %v1479_v10, %v1478_v6  ;;  %v1492_v15 = vadd.f32 %v1491_v11, %v1490_v7  ;;  %v9144_v6 = vsub.s32 2, %v9109_v19  ;;  %v1468_v7 = vld [vmem:[#allocation13] sm:$0xf]  ;;  %v1549_v9 = vrot.slane %v1467_v5, %v9112_v20 }
 0x49a   : > { %v1493_v16 = vmul.f32 0.125, %v1474_v12  ;;  %v1495_v17 = vmul.f32 0.125, %v1486_v13 }
 0x49b   : > { %v1494_v18 = vmul.f32 0.125, %v1480_v14  ;;  %v1496_v21 = vmul.f32 0.125, %v1492_v15  ;;  %v1557_v11 = vrot.slane %v1467_v5, %v9144_v6  ;;  %v1574_v14 = vrot.slane %v1468_v7, %v9112_v20 }
 0x49c   : > { %v1497_v23 = vsub.f32 %v1419_v54, %v1493_v16  ;;  %v1499_v24 = vsub.f32 %v1460_v55, %v1495_v17  ;;  %v1553_v15 = vrot.slane %v1467_v5, %v9115_v22 }
 0x49d   : > { %v1498_v25 = vsub.f32 %v1421_v58, %v1494_v18  ;;  %v1500_v26 = vsub.f32 %v1462_v59, %v1496_v21  ;;  %v1582_v18 = vrot.slane %v1468_v7, %v9144_v6  ;;  %v1561_v21 = vrot.slane %v1467_v5, %v9147_v8  ;;  %v1772_v5 = vld [vmem:[#allocation15 + $0x508] sm:$0xff] }
 0x49e   : > { %v1501_v27 = vmul.f32 %v1497_v23, %v1497_v23  ;;  %v1503_v28 = vmul.f32 %v1499_v24, %v1499_v24 }
 0x49f   : > { %v1502_v29 = vmul.f32 %v1498_v25, %v1498_v25  ;;  %v1504_v30 = vmul.f32 %v1500_v26, %v1500_v26 }
 0x4a0   : > { %v1505_v31 = vrot.slane %v1501_v27, 4  ;;  %v1517_v32 = vrot.slane %v1503_v28, 4 }
 0x4a1   : > { %v1511_v33 = vrot.slane %v1502_v29, 4  ;;  %v1523_v34 = vrot.slane %v1504_v30, 4 }
 0x4a2   : > { %v1506_v35 = vadd.f32 %v1505_v31, %v1501_v27  ;;  %v1518_v40 = vadd.f32 %v1517_v32, %v1503_v28 }
 0x4a3   : > { %v1512_v43 = vadd.f32 %v1511_v33, %v1502_v29  ;;  %v1524_v44 = vadd.f32 %v1523_v34, %v1504_v30  ;;  %v1578_v30 = vrot.slane %v1468_v7, %v9115_v22  ;;  %v1586_v33 = vrot.slane %v1468_v7, %v9147_v8  ;;  %v1776_v7 = vld [vmem:[#allocation15 + $0x528] sm:$0xff] }
 0x4a4   : > { %v1507_v45 = vrot.slane %v1506_v35, 2  ;;  %v1519_v49 = vrot.slane %v1518_v40, 2 }
 0x4a5   : > { %v1513_v53 = vrot.slane %v1512_v43, 2  ;;  %v1525_v56 = vrot.slane %v1524_v44, 2 }
 0x4a6   : > { %v1508_v54 = vadd.f32 %v1507_v45, %v1506_v35  ;;  %v1520_v55 = vadd.f32 %v1519_v49, %v1518_v40 }
 0x4a7   : > { %v1514_v57 = vadd.f32 %v1513_v53, %v1512_v43  ;;  %v1526_v58 = vadd.f32 %v1525_v56, %v1524_v44  ;;  %v1747_v53 = vld [vmem:[#allocation15 + $0x440] sm:$0xff] }
 0x4a8   : > { %v1509_v59 = vrot.slane %v1508_v54, 1  ;;  %v1521_v60 = vrot.slane %v1520_v55, 1 }
 0x4a9   : > { %v1515_v61 = vrot.slane %v1514_v57, 1  ;;  %v1527_v62 = vrot.slane %v1526_v58, 1 }
 0x4aa   : > { %v1510_v63 = vadd.f32 %v1509_v59, %v1508_v54  ;;  %v1522_v36 = vadd.f32 %v1521_v60, %v1520_v55  ;;  %v1751_v54 = vld [vmem:[#allocation15 + $0x460] sm:$0xff]  ;;  %v1752_v55 = vld [vmem:[#allocation15 + $0x468] sm:$0xff] }
 0x4ab   : > { %v1516_v37 = vadd.f32 %v1515_v61, %v1514_v57  ;;  %v1528_v38 = vadd.f32 %v1527_v62, %v1526_v58  ;;  %v1755_v60 = vld [vmem:[#allocation15 + $0x480] sm:$0xff]  ;;  %v6782_v61 = vcombine.high %v1747_v53, %v1751_v54 }
 0x4ac   : > { %v1529_v39 = vmul.f32 0.125, %v1510_v63  ;;  %v1531_v41 = vmul.f32 0.125, %v1522_v36  ;;  %v1759_v63 = vld [vmem:[#allocation15 + $0x4a0] sm:$0xff]  ;;  %v1756_v36 = vld [vmem:[#allocation15 + $0x488] sm:$0xff] }
 0x4ad   : > { %v1530_v42 = vmul.f32 0.125, %v1516_v37  ;;  %v1532_v0 = vmul.f32 0.125, %v1528_v38  ;;  %v1760_v37 = vld [vmem:[#allocation15 + $0x4a8] sm:$0xff]  ;;  %v6789_v46 = vcombine.low %v1755_v60, %v1759_v63 }
 0x4ae   : > { %v1533_v1 = vadd.f32 0.8, %v1529_v39  ;;  %v1535_v2 = vadd.f32 0.8, %v1531_v41  ;;  %v6781_v39 = vcombine.low %v1747_v53, %v1751_v54  ;;  %v6791_v47 = vcombine.low %v1756_v36, %v1760_v37  ;;  %v1807_v54 = vld [vmem:[#allocation15 + $0x620] sm:$0xff] }
 0x4af   : > { %v1534_v3 = vadd.f32 0.8, %v1530_v42  ;;  %v1536_v4 = vadd.f32 0.8, %v1532_v0  ;;  %v6790_v42 = vcombine.high %v1755_v60, %v1759_v63  ;;  %v6792_v0 = vcombine.high %v1756_v36, %v1760_v37  ;;  %v1811_v63 = vld [vmem:[#allocation15 + $0x640] sm:$0xff]  ;;  %v1812_v37 = vld [vmem:[#allocation15 + $0x648] sm:$0xff] }
 0x4b0   : > { %8139 = vrsqrt.f32 %v1533_v1  ;;  %v1763_v1 = vld [vmem:[#allocation15 + $0x4c0] sm:$0xff] }
 0x4b1   : > { %8141 = vrsqrt.f32 %v1535_v2  ;;  %v1767_v2 = vld [vmem:[#allocation15 + $0x4e0] sm:$0xff] }
 0x4b2   : > { %8143 = vrsqrt.f32 %v1534_v3  ;;  %v1764_v3 = vld [vmem:[#allocation15 + $0x4c8] sm:$0xff]  ;;  %v6798_v48 = vcombine.high %v1763_v1, %v1767_v2  ;;  %v1815_v36 = vld [vmem:[#allocation15 + $0x660] sm:$0xff] }
 0x4b3   : > { %8145 = vrsqrt.f32 %v1536_v4  ;;  %v1768_v4 = vld [vmem:[#allocation15 + $0x4e8] sm:$0xff] }
 0x4b4   : > { %v6800_v50 = vcombine.high %v1764_v3, %v1768_v4 }
 0x4ba   : > { %v8140_v10 = vpop.eup %8139 }
 0x4bb   : > { %v8142_v12 = vpop.eup %8141  ;;  %v1541_v13 = vmul.f32 %v8140_v10, %v1497_v23  ;;  %v6799_v10 = vcombine.low %v1764_v3, %v1768_v4  ;;  %v1823_v3 = vld [vmem:[#allocation15 + $0x6a0] sm:$0xff]  ;;  %v1820_v4 = vld [vmem:[#allocation15 + $0x688] sm:$0xff] }
 0x4bc   : > { %v8144_v16 = vpop.eup %8143  ;;  %v1543_v17 = vmul.f32 %v8142_v12, %v1499_v24  ;;  %v6808_v12 = vcombine.high %v1772_v5, %v1776_v7 }
 0x4bd   : > { %v8146_v27 = vpop.eup %8145  ;;  %v1566_v28 = vmul.f32 %v1549_v9, %v1541_v13  ;;  %v1542_v29 = vmul.f32 %v8144_v16, %v1498_v25  ;;  %v6797_v9 = vcombine.low %v1763_v1, %v1767_v2  ;;  %v1779_v13 = vld [vmem:[#allocation15 + $0x540] sm:$0xff]  ;;  %v1784_v16 = vld [vmem:[#allocation15 + $0x568] sm:$0xff] }
 0x4be   : > { %v1568_v31 = vmul.f32 %v1557_v11, %v1543_v17  ;;  %v1544_v32 = vmul.f32 %v8146_v27, %v1500_v26  ;;  %v1748_v26 = vld [vmem:[#allocation15 + $0x448] sm:$0xff]  ;;  %v1819_v2 = vld [vmem:[#allocation15 + $0x680] sm:$0xff] }
 0x4bf   : > { %v1591_v23 = vadd.f32 %v1574_v14, %v1566_v28  ;;  %v1567_v34 = vmul.f32 %v1553_v15, %v1542_v29  ;;  %v6784_v62 = vcombine.high %v1748_v26, %v1752_v55  ;;  %v6783_v41 = vcombine.low %v1748_v26, %v1752_v55  ;;  %v1783_v14 = vld [vmem:[#allocation15 + $0x560] sm:$0xff]  ;;  %v1780_v15 = vld [vmem:[#allocation15 + $0x548] sm:$0xff] }
 0x4c0   : > { %v9157_v35 = vadd.f32 %v1582_v18, %v1568_v31  ;;  %v1569_v40 = vmul.f32 %v1561_v21, %v1544_v32  ;;  %v6807_v18 = vcombine.low %v1772_v5, %v1776_v7  ;;  %v6814_v21 = vcombine.high %v1779_v13, %v1783_v14  ;;  %v1787_v28 = vld [vmem:[#allocation15 + $0x580] sm:$0xff]  ;;  %v1792_v31 = vld [vmem:[#allocation15 + $0x5a8] sm:$0xff] }
 0x4c1   : > { %v1592_v43 = vadd.f32 %v1578_v30, %v1567_v34  ;;  %vm1595_vm4 = vcmp.gt.f32.partialorder %v1591_v23, 0.0  ;;  %v1599_v24 = vmul.f32 0.2, %v1591_v23  ;;  %v6816_v27 = vcombine.high %v1780_v15, %v1784_v16  ;;  %v1791_v29 = vld [vmem:[#allocation15 + $0x5a0] sm:$0xff]  ;;  %v1788_v30 = vld [vmem:[#allocation15 + $0x588] sm:$0xff] }
 0x4c2   : > { %v1594_v44 = vadd.f32 %v1586_v33, %v1569_v40  ;;  %v6813_v32 = vcombine.low %v1779_v13, %v1783_v14  ;;  %v6815_v33 = vcombine.low %v1780_v15, %v1784_v16  ;;  %v6824_v34 = vcombine.high %v1788_v30, %v1792_v31  ;;  %v1795_v40 = vld [vmem:[#allocation15 + $0x5c0] sm:$0xff]  ;;  %v1804_v26 = vld [vmem:[#allocation15 + $0x608] sm:$0xff] }
 0x4c3   : > { %vm1596_vm5 = vcmp.gt.f32.partialorder %v1592_v43, 0.0  ;;  %v1600_v45 = vmul.f32 0.2, %v1592_v43  ;;  %v1603_v49 = vsel %vm1595_vm4, %v1591_v23, %v1599_v24  ;;  %v6822_v23 = vcombine.high %v1787_v28, %v1791_v29  ;;  %v1796_v24 = vld [vmem:[#allocation15 + $0x5c8] sm:$0xff]  ;;  %v1831_v5 = vld [vmem:[#allocation15 + $0x6e0] sm:$0xff] }
 0x4c4   : > { %vm1598_vm6 = vcmp.gt.f32.partialorder %v1594_v44, 0.0  ;;  %v1602_v25 = vmul.f32 0.2, %v1594_v44  ;;  %v9161_v59 = vpack.c.bf16 %v1603_v49, %v1603_v49  ;;  %v6823_v49 = vcombine.low %v1788_v30, %v1792_v31  ;;  %v1808_v55 = vld [vmem:[#allocation15 + $0x628] sm:$0xff]  ;;  %v1835_v14 = vld [vmem:[#allocation15 + $0x700] sm:$0xff] }
 0x4c5   : > { %v1604_v56 = vsel %vm1596_vm5, %v1592_v43, %v1600_v45  ;;  %v1799_v43 = vld [vmem:[#allocation15 + $0x5e0] sm:$0xff]  ;;  %v6821_v45 = vcombine.low %v1787_v28, %v1791_v29  ;;  %v1828_v7 = vld [vmem:[#allocation15 + $0x6c8] sm:$0xff]  ;;  %vm1597_vm7 = vcmp.gt.f32.partialorder %v9157_v35, 0.0 }
 0x4c6   : > { %v9159_v57 = vpack.c.bf16 %v1604_v56, %v1604_v56  ;;  %v1606_v58 = vsel %vm1598_vm6, %v1594_v44, %v1602_v25  ;;  %v1800_v44 = vld [vmem:[#allocation15 + $0x5e8] sm:$0xff]  ;;  %v6830_v25 = vcombine.high %v1795_v40, %v1799_v43  ;;  %v1803_v56 = vld [vmem:[#allocation15 + $0x600] sm:$0xff] }
 0x4c7   : > { %v9167_v38 = vpack.c.bf16 %v1606_v58, %v1606_v58  ;;  %v6832_v53 = vcombine.high %v1796_v24, %v1800_v44  ;;  %v6829_v58 = vcombine.low %v1795_v40, %v1799_v43  ;;  %v6831_v60 = vcombine.low %v1796_v24, %v1800_v44  ;;  %v1839_v15 = vld [vmem:[#allocation15 + $0x720] sm:$0xff]  ;;  %v1836_v16 = vld [vmem:[#allocation15 + $0x708] sm:$0xff] }
 0x4c8   : > { %3179 = vmatprep.mubr.bf16.mxu0 %v9159_v57  ;;  %3261 = vmatprep.mubr.bf16.mxu1 %v9159_v57  ;;  %v1843_v29 = vld [vmem:[#allocation15 + $0x740] sm:$0xff]  ;;  %v1844_v31 = vld [vmem:[#allocation15 + $0x748] sm:$0xff] }
 0x4c9   : > { %3180 = vmatmul.mubr.bf16.vlgmr.msra.gmra.mrb[8].mxu0 %v9161_v59  ;;  %3262 = vmatmul.mubr.bf16.vlgmr.msra.gmra.mrb[8].mxu1 %v9161_v59  ;;  %v1847_v30 = vld [vmem:[#allocation15 + $0x760] sm:$0xff]  ;;  %v1852_v44 = vld [vmem:[#allocation15 + $0x788] sm:$0xff] }
 0x4ca   : > { %3189 = vmatpush1.bf16.msra.mxu0 %v6773_v51  ;;  %3271 = vmatpush1.bf16.msra.mxu1 %v6775_v52  ;;  %v1771_v51 = vld [vmem:[#allocation15 + $0x500] sm:$0xff] }
 0x4cb   : > { %3220 = vmatprep.mubr.bf16.mxu0 %v9167_v38  ;;  %3302 = vmatprep.mubr.bf16.mxu1 %v9167_v38  ;;  %v1775_v52 = vld [vmem:[#allocation15 + $0x520] sm:$0xff] }
 0x4cc   : > { %3190 = vmatprep.subr.bf16.mxu0 %v6782_v61  ;;  %3272 = vmatprep.subr.bf16.mxu1 %v6784_v62  ;;  %v6806_v11 = vcombine.high %v1771_v51, %v1775_v52  ;;  %v6805_v17 = vcombine.low %v1771_v51, %v1775_v52  ;;  %v6838_v61 = vcombine.high %v1803_v56, %v1807_v54  ;;  %v1827_v52 = vld [vmem:[#allocation15 + $0x6c0] sm:$0xff] }
 0x4cd   : > { %v6840_v62 = vcombine.high %v1804_v26, %v1808_v55  ;;  %v1851_v43 = vld [vmem:[#allocation15 + $0x780] sm:$0xff] }
 0x4ce   : > { %3191 = vmatpush1.bf16.msra.mxu0 %v6781_v39  ;;  %3273 = vmatpush1.bf16.msra.mxu1 %v6783_v41  ;;  %v1816_v39 = vld [vmem:[#allocation15 + $0x668] sm:$0xff]  ;;  %v6837_v41 = vcombine.low %v1803_v56, %v1807_v54  ;;  %v1855_v24 = vld [vmem:[#allocation15 + $0x7a0] sm:$0xff] }
 0x4cf   : > { %3192 = vmatprep.subr.bf16.mxu0 %v6790_v42  ;;  %3274 = vmatprep.subr.bf16.mxu1 %v6792_v0  ;;  %v6839_v42 = vcombine.low %v1804_v26, %v1808_v55  ;;  %v6846_v0 = vcombine.high %v1811_v63, %v1815_v36  ;;  %v6848_v1 = vcombine.high %v1812_v37, %v1816_v39  ;;  %v1859_v54 = vld [vmem:[#allocation15 + $0x7c0] sm:$0xff]  ;;  %v1860_v55 = vld [vmem:[#allocation15 + $0x7c8] sm:$0xff] }
 0x4d0   : > { %v1863_v26 = vld [vmem:[#allocation15 + $0x7e0] sm:$0xff] }
 0x4d2   : > { %3193 = vmatpush1.bf16.msra.mxu0 %v6789_v46  ;;  %3275 = vmatpush1.bf16.msra.mxu1 %v6791_v47  ;;  %v1824_v46 = vld [vmem:[#allocation15 + $0x6a8] sm:$0xff]  ;;  %v6845_v47 = vcombine.low %v1811_v63, %v1815_v36  ;;  %v1613_v36 = vld [vmem:[#allocation15 + $0x10] sm:$0xff] }
 0x4d3   : > { %3194 = vmatprep.subr.bf16.mxu0 %v6798_v48  ;;  %3276 = vmatprep.subr.bf16.mxu1 %v6800_v50  ;;  %v6847_v48 = vcombine.low %v1812_v37, %v1816_v39  ;;  %v6854_v50 = vcombine.high %v1819_v2, %v1823_v3  ;;  %v6856_v51 = vcombine.high %v1820_v4, %v1824_v46  ;;  %v1601_v37 = vmul.f32 0.2, %v9157_v35  ;;  %v1617_v39 = vld [vmem:[#allocation15 + $0x30] sm:$0xff] }
 0x4d6   : > { %3195 = vmatpush1.bf16.msra.mxu0 %v6797_v9  ;;  %3277 = vmatpush1.bf16.msra.mxu1 %v6799_v10  ;;  %v1832_v9 = vld [vmem:[#allocation15 + $0x6e8] sm:$0xff]  ;;  %v6853_v10 = vcombine.low %v1819_v2, %v1823_v3  ;;  %v6650_v2 = vcombine.high %v1613_v36, %v1617_v39 }
 0x4d7   : > { %3196 = vmatprep.subr.bf16.mxu0 %v6806_v11  ;;  %3278 = vmatprep.subr.bf16.mxu1 %v6808_v12  ;;  %v6855_v11 = vcombine.low %v1820_v4, %v1824_v46  ;;  %v6862_v12 = vcombine.high %v1827_v52, %v1831_v5  ;;  %v6864_v13 = vcombine.high %v1828_v7, %v1832_v9  ;;  %v1621_v46 = vld [vmem:[#allocation15 + $0x50] sm:$0xff] }
 0x4d8   : > { %v1605_v4 = vsel %vm1597_vm7, %v9157_v35, %v1601_v37  ;;  %v1630_v35 = vld [vmem:[#allocation15 + $0x98] sm:$0xff] }
 0x4da   : > { %3197 = vmatpush1.bf16.msra.mxu0 %v6805_v17  ;;  %3279 = vmatpush1.bf16.msra.mxu1 %v6807_v18  ;;  %v1840_v17 = vld [vmem:[#allocation15 + $0x728] sm:$0xff]  ;;  %v6861_v18 = vcombine.low %v1827_v52, %v1831_v5  ;;  %v9180_v52 = vpack.c.bf16 %v1605_v4, %v1605_v4 }
 0x4db   : > { %3198 = vmatprep.subr.bf16.mxu0 %v6814_v21  ;;  %3280 = vmatprep.subr.bf16.mxu1 %v6816_v27  ;;  %v6863_v21 = vcombine.low %v1828_v7, %v1832_v9  ;;  %v6870_v27 = vcombine.high %v1835_v14, %v1839_v15  ;;  %v6872_v28 = vcombine.high %v1836_v16, %v1840_v17 }
 0x4de   : > { %3199 = vmatpush1.bf16.msra.mxu0 %v6813_v32  ;;  %3281 = vmatpush1.bf16.msra.mxu1 %v6815_v33  ;;  %v1848_v32 = vld [vmem:[#allocation15 + $0x768] sm:$0xff]  ;;  %v6869_v33 = vcombine.low %v1835_v14, %v1839_v15 }
 0x4df   : > { %3200 = vmatprep.subr.bf16.mxu0 %v6822_v23  ;;  %3282 = vmatprep.subr.bf16.mxu1 %v6824_v34  ;;  %v6871_v23 = vcombine.low %v1836_v16, %v1840_v17  ;;  %v6878_v34 = vcombine.high %v1843_v29, %v1847_v30  ;;  %v6880_v40 = vcombine.high %v1844_v31, %v1848_v32  ;;  %v1637_v17 = vld [vmem:[#allocation15 + $0xd0] sm:$0xff] }
 0x4e2   : > { %3201 = vmatpush1.bf16.msra.mxu0 %v6821_v45  ;;  %3283 = vmatpush1.bf16.msra.mxu1 %v6823_v49  ;;  %v1856_v45 = vld [vmem:[#allocation15 + $0x7a8] sm:$0xff]  ;;  %v6877_v49 = vcombine.low %v1843_v29, %v1847_v30 }
 0x4e3   : > { %3202 = vmatprep.subr.bf16.mxu0 %v6830_v25  ;;  %3284 = vmatprep.subr.bf16.mxu1 %v6832_v53  ;;  %v6879_v25 = vcombine.low %v1844_v31, %v1848_v32  ;;  %v6886_v53 = vcombine.high %v1851_v43, %v1855_v24  ;;  %v6888_v56 = vcombine.high %v1852_v44, %v1856_v45  ;;  %v1645_v32 = vld [vmem:[#allocation15 + $0x110] sm:$0xff] }
 0x4e6   : > { %3203 = vmatpush1.bf16.msra.mxu0 %v6829_v58  ;;  %3285 = vmatpush1.bf16.msra.mxu1 %v6831_v60  ;;  %v1864_v58 = vld [vmem:[#allocation15 + $0x7e8] sm:$0xff]  ;;  %v6885_v60 = vcombine.low %v1851_v43, %v1855_v24 }
 0x4e7   : > { %3204 = vmatprep.subr.bf16.mxu0 %v6838_v61  ;;  %3286 = vmatprep.subr.bf16.mxu1 %v6840_v62  ;;  %v6887_v61 = vcombine.low %v1852_v44, %v1856_v45  ;;  %v6894_v62 = vcombine.high %v1859_v54, %v1863_v26  ;;  %v6896_v63 = vcombine.high %v1860_v55, %v1864_v58  ;;  %v1653_v44 = vld [vmem:[#allocation15 + $0x150] sm:$0xff] }
 0x4e8   : > { %v1657_v45 = vld [vmem:[#allocation15 + $0x170] sm:$0xff] }
 0x4ea   : > { %3205 = vmatpush1.bf16.msra.mxu0 %v6837_v41  ;;  %3287 = vmatpush1.bf16.msra.mxu1 %v6839_v42  ;;  %v1614_v41 = vld [vmem:[#allocation15 + $0x18] sm:$0xff] }
 0x4eb   : > { %3206 = vmatprep.subr.bf16.mxu0 %v6846_v0  ;;  %3288 = vmatprep.subr.bf16.mxu1 %v6848_v1  ;;  %v1618_v42 = vld [vmem:[#allocation15 + $0x38] sm:$0xff]  ;;  %v6893_v0 = vcombine.low %v1859_v54, %v1863_v26  ;;  %v6895_v1 = vcombine.low %v1860_v55, %v1864_v58  ;;  %v6690_v54 = vcombine.high %v1653_v44, %v1657_v45  ;;  %v1661_v55 = vld [vmem:[#allocation15 + $0x190] sm:$0xff] }
 0x4ec   : > { %v6652_v3 = vcombine.high %v1614_v41, %v1618_v42  ;;  %v6651_v5 = vcombine.low %v1614_v41, %v1618_v42  ;;  %v1665_v58 = vld [vmem:[#allocation15 + $0x1b0] sm:$0xff]  ;;  %v1670_v42 = vld [vmem:[#allocation15 + $0x1d8] sm:$0xff] }
 0x4ed   : > { %v1673_v41 = vld [vmem:[#allocation15 + $0x1f0] sm:$0xff] }
 0x4ee   : > { %3207 = vmatpush1.bf16.msra.mxu0 %v6845_v47  ;;  %3289 = vmatpush1.bf16.msra.mxu1 %v6847_v48  ;;  %v1625_v47 = vld [vmem:[#allocation15 + $0x70] sm:$0xff]  ;;  %v1622_v48 = vld [vmem:[#allocation15 + $0x58] sm:$0xff] }
 0x4ef   : > { %3208 = vmatprep.subr.bf16.mxu0 %v6854_v50  ;;  %3290 = vmatprep.subr.bf16.mxu1 %v6856_v51  ;;  %v1626_v50 = vld [vmem:[#allocation15 + $0x78] sm:$0xff]  ;;  %v6649_v51 = vcombine.low %v1613_v36, %v1617_v39  ;;  %v6658_v7 = vcombine.high %v1621_v46, %v1625_v47  ;;  %v6698_v36 = vcombine.high %v1661_v55, %v1665_v58  ;;  %v1669_v39 = vld [vmem:[#allocation15 + $0x1d0] sm:$0xff] }
 0x4f0   : > { %v6660_v9 = vcombine.high %v1622_v48, %v1626_v50  ;;  %v6659_v14 = vcombine.low %v1622_v48, %v1626_v50  ;;  %v1678_v48 = vld [vmem:[#allocation15 + $0x218] sm:$0xff] }
 0x4f1   : > { %v1682_v50 = vld [vmem:[#allocation15 + $0x238] sm:$0xff] }
 0x4f2   : > { %3209 = vmatpush1.bf16.msra.mxu0 %v6853_v10  ;;  %3291 = vmatpush1.bf16.msra.mxu1 %v6855_v11  ;;  %v1629_v10 = vld [vmem:[#allocation15 + $0x90] sm:$0xff] }
 0x4f3   : > { %3210 = vmatprep.subr.bf16.mxu0 %v6862_v12  ;;  %3292 = vmatprep.subr.bf16.mxu1 %v6864_v13  ;;  %v1633_v11 = vld [vmem:[#allocation15 + $0xb0] sm:$0xff]  ;;  %v1634_v12 = vld [vmem:[#allocation15 + $0xb8] sm:$0xff]  ;;  %v6657_v13 = vcombine.low %v1621_v46, %v1625_v47 }
 0x4f4   : > { %v6666_v15 = vcombine.high %v1629_v10, %v1633_v11  ;;  %v6668_v16 = vcombine.high %v1630_v35, %v1634_v12  ;;  %v6667_v29 = vcombine.low %v1630_v35, %v1634_v12  ;;  %v1677_v46 = vld [vmem:[#allocation15 + $0x210] sm:$0xff]  ;;  %v1686_v35 = vld [vmem:[#allocation15 + $0x258] sm:$0xff] }
 0x4f5   : > { %v1681_v47 = vld [vmem:[#allocation15 + $0x230] sm:$0xff]  ;;  %v1690_v12 = vld [vmem:[#allocation15 + $0x278] sm:$0xff] }
 0x4f6   : > { %3211 = vmatpush1.bf16.msra.mxu0 %v6861_v18  ;;  %3293 = vmatpush1.bf16.msra.mxu1 %v6863_v21  ;;  %v1641_v18 = vld [vmem:[#allocation15 + $0xf0] sm:$0xff]  ;;  %v1638_v21 = vld [vmem:[#allocation15 + $0xd8] sm:$0xff] }
 0x4f7   : > { %3212 = vmatprep.subr.bf16.mxu0 %v6870_v27  ;;  %3294 = vmatprep.subr.bf16.mxu1 %v6872_v28  ;;  %v1642_v27 = vld [vmem:[#allocation15 + $0xf8] sm:$0xff]  ;;  %v6665_v28 = vcombine.low %v1629_v10, %v1633_v11  ;;  %v6674_v30 = vcombine.high %v1637_v17, %v1641_v18  ;;  %v1685_v10 = vld [vmem:[#allocation15 + $0x250] sm:$0xff] }
 0x4f8   : > { %v6676_v31 = vcombine.high %v1638_v21, %v1642_v27  ;;  %v1689_v11 = vld [vmem:[#allocation15 + $0x270] sm:$0xff] }
 0x4fa   : > { %3213 = vmatpush1.bf16.msra.mxu0 %v6869_v33  ;;  %3295 = vmatpush1.bf16.msra.mxu1 %v6871_v23  ;;  %v1649_v33 = vld [vmem:[#allocation15 + $0x130] sm:$0xff]  ;;  %v1650_v23 = vld [vmem:[#allocation15 + $0x138] sm:$0xff] }
 0x4fb   : > { %3214 = vmatprep.subr.bf16.mxu0 %v6878_v34  ;;  %3296 = vmatprep.subr.bf16.mxu1 %v6880_v40  ;;  %v6673_v34 = vcombine.low %v1637_v17, %v1641_v18  ;;  %v6675_v40 = vcombine.low %v1638_v21, %v1642_v27  ;;  %v6682_v43 = vcombine.high %v1645_v32, %v1649_v33  ;;  %v1693_v17 = vld [vmem:[#allocation15 + $0x290] sm:$0xff]  ;;  %v1694_v21 = vld [vmem:[#allocation15 + $0x298] sm:$0xff] }
 0x4fc   : > { %v1697_v18 = vld [vmem:[#allocation15 + $0x2b0] sm:$0xff]  ;;  %v1698_v27 = vld [vmem:[#allocation15 + $0x2b8] sm:$0xff] }
 0x4fe   : > { %3215 = vmatpush1.bf16.msra.mxu0 %v6877_v49  ;;  %3297 = vmatpush1.bf16.msra.mxu1 %v6879_v25  ;;  %v1654_v49 = vld [vmem:[#allocation15 + $0x158] sm:$0xff] }
 0x4ff   : > { %3216 = vmatprep.subr.bf16.mxu0 %v6886_v53  ;;  %3298 = vmatprep.subr.bf16.mxu1 %v6888_v56  ;;  %v1658_v25 = vld [vmem:[#allocation15 + $0x178] sm:$0xff]  ;;  %v6681_v53 = vcombine.low %v1645_v32, %v1649_v33  ;;  %v1701_v32 = vld [vmem:[#allocation15 + $0x2d0] sm:$0xff] }
 0x500   : > { %v6692_v26 = vcombine.high %v1654_v49, %v1658_v25  ;;  %v1705_v33 = vld [vmem:[#allocation15 + $0x2f0] sm:$0xff] }
 0x502   : > { %3217 = vmatpush1.bf16.msra.mxu0 %v6885_v60  ;;  %3299 = vmatpush1.bf16.msra.mxu1 %v6887_v61  ;;  %v1662_v60 = vld [vmem:[#allocation15 + $0x198] sm:$0xff] }
 0x503   : > { %3218 = vmatprep.subr.bf16.mxu0 %v6894_v62  ;;  %3300 = vmatprep.subr.bf16.mxu1 %v6896_v63  ;;  %v1666_v61 = vld [vmem:[#allocation15 + $0x1b8] sm:$0xff]  ;;  %v6689_v62 = vcombine.low %v1653_v44, %v1657_v45  ;;  %v6691_v63 = vcombine.low %v1654_v49, %v1658_v25  ;;  %v1709_v44 = vld [vmem:[#allocation15 + $0x310] sm:$0xff] }
 0x504   : > { %v6700_v37 = vcombine.high %v1662_v60, %v1666_v61  ;;  %v1713_v45 = vld [vmem:[#allocation15 + $0x330] sm:$0xff]  ;;  %v1710_v49 = vld [vmem:[#allocation15 + $0x318] sm:$0xff] }
 0x505   : > { %v1714_v25 = vld [vmem:[#allocation15 + $0x338] sm:$0xff] }
 0x506   : > { %3219 = vmatpush1.bf16.msra.mxu0 %v6893_v0  ;;  %3301 = vmatpush1.bf16.msra.mxu1 %v6895_v1  ;;  %v1674_v0 = vld [vmem:[#allocation15 + $0x1f8] sm:$0xff]  ;;  %v6697_v1 = vcombine.low %v1661_v55, %v1665_v58  ;;  %v1717_v55 = vld [vmem:[#allocation15 + $0x350] sm:$0xff] }
 0x507   : > { %3311 = vmatprep.subr.bf16.mxu0 %v6650_v2  ;;  %3393 = vmatprep.subr.bf16.mxu1 %v6652_v3  ;;  %v6699_v2 = vcombine.low %v1662_v60, %v1666_v61  ;;  %v6706_v3 = vcombine.high %v1669_v39, %v1673_v41  ;;  %v6708_v4 = vcombine.high %v1670_v42, %v1674_v0  ;;  %v1721_v58 = vld [vmem:[#allocation15 + $0x370] sm:$0xff]  ;;  %v1718_v60 = vld [vmem:[#allocation15 + $0x358] sm:$0xff] }
 0x508   : > { %v1722_v61 = vld [vmem:[#allocation15 + $0x378] sm:$0xff] }
 0x509   : > { %3221 = vmatmul.mubr.bf16.vlgmr.msra.gmra.mrb[8].mxu0 %v9180_v52  ;;  %3303 = vmatmul.mubr.bf16.vlgmr.msra.gmra.mrb[8].mxu1 %v9180_v52 }
 0x50a   : > { %3312 = vmatpush1.bf16.msra.mxu0 %v6649_v51  ;;  %3343 = vmatprep.mubr.bf16.mxu0 %v9159_v57  ;;  %v6705_v51 = vcombine.low %v1669_v39, %v1673_v41  ;;  %v1725_v39 = vld [vmem:[#allocation15 + $0x390] sm:$0xff] }
 0x50b   : > { %3394 = vmatpush1.bf16.msra.mxu1 %v6651_v5  ;;  %3425 = vmatprep.mubr.bf16.mxu1 %v9159_v57  ;;  %v1646_v57 = vld [vmem:[#allocation15 + $0x118] sm:$0xff]  ;;  %v6707_v5 = vcombine.low %v1670_v42, %v1674_v0  ;;  %v1729_v41 = vld [vmem:[#allocation15 + $0x3b0] sm:$0xff] }
 0x50c   : > { %3313 = vmatprep.subr.bf16.mxu0 %v6658_v7  ;;  %3395 = vmatprep.subr.bf16.mxu1 %v6660_v9  ;;  %v6684_v24 = vcombine.high %v1646_v57, %v1650_v23  ;;  %v6683_v56 = vcombine.low %v1646_v57, %v1650_v23  ;;  %v6714_v7 = vcombine.high %v1677_v46, %v1681_v47  ;;  %v1702_v57 = vld [vmem:[#allocation15 + $0x2d8] sm:$0xff] }
 0x50d   : > { %v6716_v9 = vcombine.high %v1678_v48, %v1682_v50  ;;  %v1706_v23 = vld [vmem:[#allocation15 + $0x2f8] sm:$0xff] }
 0x50e   : > { %3314 = vmatpush1.bf16.msra.mxu0 %v6657_v13  ;;  %v6713_v13 = vcombine.low %v1677_v46, %v1681_v47  ;;  %v1726_v42 = vld [vmem:[#allocation15 + $0x398] sm:$0xff]  ;;  %v1733_v46 = vld [vmem:[#allocation15 + $0x3d0] sm:$0xff] }
 0x50f   : > { %3396 = vmatpush1.bf16.msra.mxu1 %v6659_v14  ;;  %3315 = vmatprep.subr.bf16.mxu0 %v6666_v15  ;;  %v6715_v14 = vcombine.low %v1678_v48, %v1682_v50  ;;  %v6722_v15 = vcombine.high %v1685_v10, %v1689_v11  ;;  %v1730_v0 = vld [vmem:[#allocation15 + $0x3b8] sm:$0xff]  ;;  %v1737_v47 = vld [vmem:[#allocation15 + $0x3f0] sm:$0xff] }
 0x510   : > { %3397 = vmatprep.subr.bf16.mxu1 %v6668_v16  ;;  %v6724_v16 = vcombine.high %v1686_v35, %v1690_v12  ;;  %v1734_v48 = vld [vmem:[#allocation15 + $0x3d8] sm:$0xff] }
 0x511   : > { %v1738_v50 = vld [vmem:[#allocation15 + $0x3f8] sm:$0xff] }
 0x512   : > { %3316 = vmatpush1.bf16.msra.mxu0 %v6665_v28  ;;  %v6721_v28 = vcombine.low %v1685_v10, %v1689_v11  ;;  %v1741_v10 = vld [vmem:[#allocation15 + $0x410] sm:$0xff] }
 0x513   : > { %3398 = vmatpush1.bf16.msra.mxu1 %v6667_v29  ;;  %3317 = vmatprep.subr.bf16.mxu0 %v6674_v30  ;;  %v6723_v29 = vcombine.low %v1686_v35, %v1690_v12  ;;  %v6730_v30 = vcombine.high %v1693_v17, %v1697_v18  ;;  %v1745_v11 = vld [vmem:[#allocation15 + $0x430] sm:$0xff]  ;;  %v1742_v35 = vld [vmem:[#allocation15 + $0x418] sm:$0xff] }
 0x514   : > { %3399 = vmatprep.subr.bf16.mxu1 %v6676_v31  ;;  %v6732_v31 = vcombine.high %v1694_v21, %v1698_v27  ;;  %v1746_v12 = vld [vmem:[#allocation15 + $0x438] sm:$0xff] }
 0x516   : > { %3318 = vmatpush1.bf16.msra.mxu0 %v6673_v34  ;;  %v6729_v34 = vcombine.low %v1693_v17, %v1697_v18  ;;  %v1749_v17 = vld [vmem:[#allocation15 + $0x450] sm:$0xff] }
 0x517   : > { %3400 = vmatpush1.bf16.msra.mxu1 %v6675_v40  ;;  %3319 = vmatprep.subr.bf16.mxu0 %v6682_v43  ;;  %v6731_v40 = vcombine.low %v1694_v21, %v1698_v27  ;;  %v6738_v43 = vcombine.high %v1701_v32, %v1705_v33  ;;  %v1753_v18 = vld [vmem:[#allocation15 + $0x470] sm:$0xff]  ;;  %v6777_v21 = vcombine.low %v1741_v10, %v1745_v11  ;;  %v1750_v27 = vld [vmem:[#allocation15 + $0x458] sm:$0xff] }
 0x518   : > { %3401 = vmatprep.subr.bf16.mxu1 %v6684_v24  ;;  %v6740_v24 = vcombine.high %v1702_v57, %v1706_v23 }
 0x51a   : > { %3320 = vmatpush1.bf16.msra.mxu0 %v6681_v53  ;;  %v6737_v53 = vcombine.low %v1701_v32, %v1705_v33  ;;  %v1761_v32 = vld [vmem:[#allocation15 + $0x4b0] sm:$0xff] }
 0x51b   : > { %3402 = vmatpush1.bf16.msra.mxu1 %v6683_v56  ;;  %3321 = vmatprep.subr.bf16.mxu0 %v6690_v54  ;;  %v6739_v56 = vcombine.low %v1702_v57, %v1706_v23  ;;  %v6746_v54 = vcombine.high %v1709_v44, %v1713_v45  ;;  %v1758_v57 = vld [vmem:[#allocation15 + $0x498] sm:$0xff] }
 0x51c   : > { %3403 = vmatprep.subr.bf16.mxu1 %v6692_v26  ;;  %v6748_v26 = vcombine.high %v1710_v49, %v1714_v25  ;;  %v1762_v23 = vld [vmem:[#allocation15 + $0x4b8] sm:$0xff] }
 0x51e   : > { %3322 = vmatpush1.bf16.msra.mxu0 %v6689_v62  ;;  %v6745_v62 = vcombine.low %v1709_v44, %v1713_v45  ;;  %v1765_v44 = vld [vmem:[#allocation15 + $0x4d0] sm:$0xff] }
 0x51f   : > { %3404 = vmatpush1.bf16.msra.mxu1 %v6691_v63  ;;  %3323 = vmatprep.subr.bf16.mxu0 %v6698_v36  ;;  %v6747_v63 = vcombine.low %v1710_v49, %v1714_v25  ;;  %v6754_v36 = vcombine.high %v1717_v55, %v1721_v58  ;;  %v1769_v45 = vld [vmem:[#allocation15 + $0x4f0] sm:$0xff]  ;;  %v1766_v49 = vld [vmem:[#allocation15 + $0x4d8] sm:$0xff] }
 0x520   : > { %3405 = vmatprep.subr.bf16.mxu1 %v6700_v37  ;;  %v6756_v37 = vcombine.high %v1718_v60, %v1722_v61  ;;  %v1770_v25 = vld [vmem:[#allocation15 + $0x4f8] sm:$0xff] }
 0x522   : > { %3324 = vmatpush1.bf16.msra.mxu0 %v6697_v1  ;;  %v6753_v1 = vcombine.low %v1717_v55, %v1721_v58  ;;  %v1777_v55 = vld [vmem:[#allocation15 + $0x530] sm:$0xff]  ;;  %v1774_v58 = vld [vmem:[#allocation15 + $0x518] sm:$0xff] }
 0x523   : > { %3406 = vmatpush1.bf16.msra.mxu1 %v6699_v2  ;;  %3325 = vmatprep.subr.bf16.mxu0 %v6706_v3  ;;  %v6755_v2 = vcombine.low %v1718_v60, %v1722_v61  ;;  %v6762_v3 = vcombine.high %v1725_v39, %v1729_v41  ;;  %v1778_v60 = vld [vmem:[#allocation15 + $0x538] sm:$0xff]  ;;  %v6803_v61 = vcombine.low %v1766_v49, %v1770_v25 }
 0x524   : > { %3407 = vmatprep.subr.bf16.mxu1 %v6708_v4  ;;  %v6764_v4 = vcombine.high %v1726_v42, %v1730_v0 }
 0x526   : > { %3326 = vmatpush1.bf16.msra.mxu0 %v6705_v51  ;;  %v6761_v51 = vcombine.low %v1725_v39, %v1729_v41  ;;  %v1782_v39 = vld [vmem:[#allocation15 + $0x558] sm:$0xff] }
 0x527   : > { %3408 = vmatpush1.bf16.msra.mxu1 %v6707_v5  ;;  %3327 = vmatprep.subr.bf16.mxu0 %v6714_v7  ;;  %v6763_v5 = vcombine.low %v1726_v42, %v1730_v0  ;;  %v6770_v7 = vcombine.high %v1733_v46, %v1737_v47  ;;  %v1786_v41 = vld [vmem:[#allocation15 + $0x578] sm:$0xff]  ;;  %v6811_v0 = vcombine.low %v1774_v58, %v1778_v60 }
 0x528   : > { %3409 = vmatprep.subr.bf16.mxu1 %v6716_v9  ;;  %v6772_v9 = vcombine.high %v1734_v48, %v1738_v50 }
 0x52a   : > { %3328 = vmatpush1.bf16.msra.mxu0 %v6713_v13  ;;  %v6769_v13 = vcombine.low %v1733_v46, %v1737_v47  ;;  %v1790_v46 = vld [vmem:[#allocation15 + $0x598] sm:$0xff] }
 0x52b   : > { %3410 = vmatpush1.bf16.msra.mxu1 %v6715_v14  ;;  %3329 = vmatprep.subr.bf16.mxu0 %v6722_v15  ;;  %v6771_v14 = vcombine.low %v1734_v48, %v1738_v50  ;;  %v6778_v15 = vcombine.high %v1741_v10, %v1745_v11  ;;  %v1794_v47 = vld [vmem:[#allocation15 + $0x5b8] sm:$0xff]  ;;  %v6819_v50 = vcombine.low %v1782_v39, %v1786_v41 }
 0x52c   : > { %3411 = vmatprep.subr.bf16.mxu1 %v6724_v16  ;;  %v6780_v16 = vcombine.high %v1742_v35, %v1746_v12  ;;  %v1798_v10 = vld [vmem:[#allocation15 + $0x5d8] sm:$0xff] }
 0x52d   : > { %v1802_v11 = vld [vmem:[#allocation15 + $0x5f8] sm:$0xff] }
 0x52e   : > { %3330 = vmatpush1.bf16.msra.mxu0 %v6721_v28  ;;  %v1754_v28 = vld [vmem:[#allocation15 + $0x478] sm:$0xff] }
 0x52f   : > { %3412 = vmatpush1.bf16.msra.mxu1 %v6723_v29  ;;  %3331 = vmatprep.subr.bf16.mxu0 %v6730_v30  ;;  %v6779_v29 = vcombine.low %v1742_v35, %v1746_v12  ;;  %v6786_v30 = vcombine.high %v1749_v17, %v1753_v18  ;;  %v6788_v33 = vcombine.high %v1750_v27, %v1754_v28 }
 0x530   : > { %3413 = vmatprep.subr.bf16.mxu1 %v6732_v31  ;;  %v1757_v31 = vld [vmem:[#allocation15 + $0x490] sm:$0xff]  ;;  %v6827_v12 = vcombine.low %v1790_v46, %v1794_v47 }
 0x532   : > { %3332 = vmatpush1.bf16.msra.mxu0 %v6729_v34  ;;  %v6785_v34 = vcombine.low %v1749_v17, %v1753_v18  ;;  %v1806_v17 = vld [vmem:[#allocation15 + $0x618] sm:$0xff] }
 0x533   : > { %3414 = vmatpush1.bf16.msra.mxu1 %v6731_v40  ;;  %3333 = vmatprep.subr.bf16.mxu0 %v6738_v43  ;;  %v6787_v40 = vcombine.low %v1750_v27, %v1754_v28  ;;  %v6794_v43 = vcombine.high %v1757_v31, %v1761_v32  ;;  %v1810_v18 = vld [vmem:[#allocation15 + $0x638] sm:$0xff]  ;;  %v6835_v27 = vcombine.low %v1798_v10, %v1802_v11 }
 0x534   : > { %3415 = vmatprep.subr.bf16.mxu1 %v6740_v24  ;;  %v6796_v24 = vcombine.high %v1758_v57, %v1762_v23 }
 0x536   : > { %3334 = vmatpush1.bf16.msra.mxu0 %v6737_v53  ;;  %v6793_v53 = vcombine.low %v1757_v31, %v1761_v32  ;;  %v1817_v31 = vld [vmem:[#allocation15 + $0x670] sm:$0xff]  ;;  %v1814_v32 = vld [vmem:[#allocation15 + $0x658] sm:$0xff] }
 0x537   : > { %3416 = vmatpush1.bf16.msra.mxu1 %v6739_v56  ;;  %3335 = vmatprep.subr.bf16.mxu0 %v6746_v54  ;;  %v6802_v56 = vcombine.high %v1765_v44, %v1769_v45  ;;  %v6804_v54 = vcombine.high %v1766_v49, %v1770_v25 }
 0x538   : > { %3417 = vmatprep.subr.bf16.mxu1 %v6748_v26  ;;  %v1773_v26 = vld [vmem:[#allocation15 + $0x510] sm:$0xff] }
 0x539   : > { %v6809_v42 = vcombine.low %v1773_v26, %v1777_v55 }
 0x53a   : > { %3336 = vmatpush1.bf16.msra.mxu0 %v6745_v62  ;;  %v6810_v62 = vcombine.high %v1773_v26, %v1777_v55  ;;  %v1830_v26 = vld [vmem:[#allocation15 + $0x6d8] sm:$0xff] }
 0x53b   : > { %3418 = vmatpush1.bf16.msra.mxu1 %v6747_v63  ;;  %3337 = vmatprep.subr.bf16.mxu0 %v6754_v36  ;;  %v6812_v63 = vcombine.high %v1774_v58, %v1778_v60  ;;  %v1781_v36 = vld [vmem:[#allocation15 + $0x550] sm:$0xff]  ;;  %v1834_v55 = vld [vmem:[#allocation15 + $0x6f8] sm:$0xff] }
 0x53c   : > { %3419 = vmatprep.subr.bf16.mxu1 %v6756_v37  ;;  %v1785_v37 = vld [vmem:[#allocation15 + $0x570] sm:$0xff] }
 0x53d   : > { %v6817_v48 = vcombine.low %v1781_v36, %v1785_v37 }
 0x53e   : > { %3338 = vmatpush1.bf16.msra.mxu0 %v6753_v1  ;;  %v6818_v1 = vcombine.high %v1781_v36, %v1785_v37  ;;  %v1838_v36 = vld [vmem:[#allocation15 + $0x718] sm:$0xff] }
 0x53f   : > { %3420 = vmatpush1.bf16.msra.mxu1 %v6755_v2  ;;  %3339 = vmatprep.subr.bf16.mxu0 %v6762_v3  ;;  %v6820_v2 = vcombine.high %v1782_v39, %v1786_v41  ;;  %v1789_v3 = vld [vmem:[#allocation15 + $0x590] sm:$0xff]  ;;  %v1842_v37 = vld [vmem:[#allocation15 + $0x738] sm:$0xff]  ;;  %v6867_v41 = vcombine.low %v1830_v26, %v1834_v55 }
 0x540   : > { %3421 = vmatprep.subr.bf16.mxu1 %v6764_v4  ;;  %v1793_v4 = vld [vmem:[#allocation15 + $0x5b0] sm:$0xff] }
 0x541   : > { %v6825_v35 = vcombine.low %v1789_v3, %v1793_v4 }
 0x542   : > { %3340 = vmatpush1.bf16.msra.mxu0 %v6761_v51  ;;  %v6826_v51 = vcombine.high %v1789_v3, %v1793_v4  ;;  %v1846_v3 = vld [vmem:[#allocation15 + $0x758] sm:$0xff] }
 0x543   : > { %3422 = vmatpush1.bf16.msra.mxu1 %v6763_v5  ;;  %3341 = vmatprep.subr.bf16.mxu0 %v6770_v7  ;;  %v6828_v5 = vcombine.high %v1790_v46, %v1794_v47  ;;  %v1797_v7 = vld [vmem:[#allocation15 + $0x5d0] sm:$0xff]  ;;  %v1850_v4 = vld [vmem:[#allocation15 + $0x778] sm:$0xff]  ;;  %v6875_v47 = vcombine.low %v1838_v36, %v1842_v37 }
 0x544   : > { %3423 = vmatprep.subr.bf16.mxu1 %v6772_v9  ;;  %v1801_v9 = vld [vmem:[#allocation15 + $0x5f0] sm:$0xff] }
 0x546   : > { %3342 = vmatpush1.bf16.msra.mxu0 %v6769_v13  ;;  %v6834_v13 = vcombine.high %v1797_v7, %v1801_v9 }
 0x547   : > { %3424 = vmatpush1.bf16.msra.mxu1 %v6771_v14  ;;  %3352 = vmatprep.subr.bf16.mxu0 %v6778_v15  ;;  %v6836_v14 = vcombine.high %v1798_v10, %v1802_v11  ;;  %v1805_v15 = vld [vmem:[#allocation15 + $0x610] sm:$0xff]  ;;  %v6883_v11 = vcombine.low %v1846_v3, %v1850_v4 }
 0x548   : > { %3434 = vmatprep.subr.bf16.mxu1 %v6780_v16  ;;  %v1809_v16 = vld [vmem:[#allocation15 + $0x630] sm:$0xff] }
 0x549   : > { %3344 = vmatmul.mubr.bf16.vlgmr.msra.gmra.mrb[12].mxu0 %v9161_v59  ;;  %v6842_v28 = vcombine.high %v1805_v15, %v1809_v16 }
 0x54a   : > { %3426 = vmatmul.mubr.bf16.vlgmr.msra.gmra.mrb[12].mxu1 %v9161_v59  ;;  %3353 = vmatpush1.bf16.msra.mxu0 %v6777_v21  ;;  %v6795_v59 = vcombine.low %v1758_v57, %v1762_v23  ;;  %v6833_v21 = vcombine.low %v1797_v7, %v1801_v9  ;;  %v6841_v57 = vcombine.low %v1805_v15, %v1809_v16  ;;  %v1854_v7 = vld [vmem:[#allocation15 + $0x798] sm:$0xff] }
 0x54b   : > { %3384 = vmatprep.mubr.bf16.mxu0 %v9167_v38  ;;  %3435 = vmatpush1.bf16.msra.mxu1 %v6779_v29  ;;  %v6844_v29 = vcombine.high %v1806_v17, %v1810_v18  ;;  %v6843_v23 = vcombine.low %v1806_v17, %v1810_v18  ;;  %v1858_v9 = vld [vmem:[#allocation15 + $0x7b8] sm:$0xff] }
 0x54c   : > { %3466 = vmatprep.mubr.bf16.mxu1 %v9167_v38  ;;  %3354 = vmatprep.subr.bf16.mxu0 %v6786_v30  ;;  %v6801_v38 = vcombine.low %v1765_v44, %v1769_v45  ;;  %v1813_v30 = vld [vmem:[#allocation15 + $0x650] sm:$0xff]  ;;  %v1822_v44 = vld [vmem:[#allocation15 + $0x698] sm:$0xff]  ;;  %v6891_v18 = vcombine.low %v1854_v7, %v1858_v9 }
 0x54d   : > { %3436 = vmatprep.subr.bf16.mxu1 %v6788_v33  ;;  %v1818_v33 = vld [vmem:[#allocation15 + $0x678] sm:$0xff]  ;;  %v6849_v49 = vcombine.low %v1813_v30, %v1817_v31 }
 0x54e   : > { %3355 = vmatpush1.bf16.msra.mxu0 %v6785_v34  ;;  %v6850_v34 = vcombine.high %v1813_v30, %v1817_v31  ;;  %v1826_v45 = vld [vmem:[#allocation15 + $0x6b8] sm:$0xff]  ;;  %v6851_v25 = vcombine.low %v1814_v32, %v1818_v33  ;;  %v7689_v30 = vld [vmem:[%s9084_s5 + $0x4] ss:$20 sps:$4 sm:$0xff]  }
 0x54f   : > { %3437 = vmatpush1.bf16.msra.mxu1 %v6787_v40  ;;  %3356 = vmatprep.subr.bf16.mxu0 %v6794_v43  ;;  %v6852_v40 = vcombine.high %v1814_v32, %v1818_v33  ;;  %v1821_v43 = vld [vmem:[#allocation15 + $0x690] sm:$0xff]  ;;  %v6859_v60 = vcombine.low %v1822_v44, %v1826_v45  ;;  %v1862_v15 = vld [vmem:[#allocation15 + $0x7d8] sm:$0xff] }
 0x550   : > { %3438 = vmatprep.subr.bf16.mxu1 %v6796_v24  ;;  %v1825_v24 = vld [vmem:[#allocation15 + $0x6b0] sm:$0xff]  ;;  %v1866_v16 = vld [vmem:[#allocation15 + $0x7f8] sm:$0xff] }
 0x551   : > { %v6857_v58 = vcombine.low %v1821_v43, %v1825_v24  ;;  %v7692_v31 = vld [vmem:[%s9084_s5 + $0xc] ss:$20 sps:$4 sm:$0xff]   ;;  %v7690_v33 = vld [vmem:[%s9084_s5 + $0x8] ss:$20 sps:$4 sm:$0xff]  }
 0x552   : > { %3357 = vmatpush1.bf16.msra.mxu0 %v6793_v53  ;;  %v6858_v53 = vcombine.high %v1821_v43, %v1825_v24  ;;  %v7687_v32 = vld [vmem:[%s9084_s5] ss:$20 sps:$4 sm:$0xff]   ;;  %v7704_v24 = vld [vmem:[%s9084_s5 + $0x5c] ss:$20 sps:$4 sm:$0xff]  }
 0x553   : > { %3439 = vmatpush1.bf16.msra.mxu1 %v6795_v59  ;;  %3358 = vmatprep.subr.bf16.mxu0 %v6802_v56  ;;  %v6860_v59 = vcombine.high %v1822_v44, %v1826_v45  ;;  %v1829_v56 = vld [vmem:[#allocation15 + $0x6d0] sm:$0xff]  ;;  %v7701_v43 = vld [vmem:[%s9084_s5 + $0x54] ss:$20 sps:$4 sm:$0xff]   ;;  %v7702_v45 = vld [vmem:[%s9084_s5 + $0x58] ss:$20 sps:$4 sm:$0xff]  }
 0x554   : > { %3440 = vmatprep.subr.bf16.mxu1 %v6804_v54  ;;  %v1833_v54 = vld [vmem:[#allocation15 + $0x6f0] sm:$0xff] }
 0x555   : > { %v6865_v39 = vcombine.low %v1829_v56, %v1833_v54  ;;  %v7699_v44 = vld [vmem:[%s9084_s5 + $0x50] ss:$20 sps:$4 sm:$0xff]  }
 0x556   : > { %3359 = vmatpush1.bf16.msra.mxu0 %v6801_v38  ;;  %v6866_v38 = vcombine.high %v1829_v56, %v1833_v54  ;;  %v7716_v56 = vld [vmem:[%s9084_s5 + $0xac] ss:$20 sps:$4 sm:$0xff]  }
 0x557   : > { %3441 = vmatpush1.bf16.msra.mxu1 %v6803_v61  ;;  %3360 = vmatprep.subr.bf16.mxu0 %v6810_v62  ;;  %v6868_v61 = vcombine.high %v1830_v26, %v1834_v55  ;;  %v1837_v62 = vld [vmem:[#allocation15 + $0x710] sm:$0xff]  ;;  %v7714_v26 = vld [vmem:[%s9084_s5 + $0xa8] ss:$20 sps:$4 sm:$0xff]  }
 0x558   : > { %3442 = vmatprep.subr.bf16.mxu1 %v6812_v63  ;;  %v1841_v63 = vld [vmem:[#allocation15 + $0x730] sm:$0xff] }
 0x559   : > { %v6873_v46 = vcombine.low %v1837_v62, %v1841_v63  ;;  %v7711_v54 = vld [vmem:[%s9084_s5 + $0xa0] ss:$20 sps:$4 sm:$0xff]  }
 0x55a   : > { %3361 = vmatpush1.bf16.msra.mxu0 %v6809_v42  ;;  %v6874_v42 = vcombine.high %v1837_v62, %v1841_v63  ;;  %v7719_v55 = vld [vmem:[%s9084_s5 + $0xcc] ss:$20 sps:$4 sm:$0xff]   ;;  %v7728_v62 = vld [vmem:[%s9084_s5 + $0xfc] ss:$20 sps:$4 sm:$0xff]  }
 0x55b   : > { %3443 = vmatpush1.bf16.msra.mxu1 %v6811_v0  ;;  %3362 = vmatprep.subr.bf16.mxu0 %v6818_v1  ;;  %v6876_v0 = vcombine.high %v1838_v36, %v1842_v37  ;;  %v1845_v1 = vld [vmem:[#allocation15 + $0x750] sm:$0xff]  ;;  %v7726_v36 = vld [vmem:[%s9084_s5 + $0xf8] ss:$20 sps:$4 sm:$0xff]   ;;  %v7731_v37 = vld [vmem:[%s9084_s5 + $0x11c] ss:$20 sps:$4 sm:$0xff]  }
 0x55c   : > { %3444 = vmatprep.subr.bf16.mxu1 %v6820_v2  ;;  %v1849_v2 = vld [vmem:[#allocation15 + $0x770] sm:$0xff] }
 0x55d   : > { %v6881_v10 = vcombine.low %v1845_v1, %v1849_v2  ;;  %v7723_v63 = vld [vmem:[%s9084_s5 + $0xf0] ss:$20 sps:$4 sm:$0xff]  }
 0x55e   : > { %3363 = vmatpush1.bf16.msra.mxu0 %v6817_v48  ;;  %v6882_v48 = vcombine.high %v1845_v1, %v1849_v2  ;;  %v7740_v1 = vld [vmem:[%s9084_s5 + $0x14c] ss:$20 sps:$4 sm:$0xff]  }
 0x55f   : > { %3445 = vmatpush1.bf16.msra.mxu1 %v6819_v50  ;;  %3364 = vmatprep.subr.bf16.mxu0 %v6826_v51  ;;  %v6884_v50 = vcombine.high %v1846_v3, %v1850_v4  ;;  %v1853_v51 = vld [vmem:[#allocation15 + $0x790] sm:$0xff]  ;;  %v7738_v3 = vld [vmem:[%s9084_s5 + $0x148] ss:$20 sps:$4 sm:$0xff]  }
 0x560   : > { %3446 = vmatprep.subr.bf16.mxu1 %v6828_v5  ;;  %v1857_v5 = vld [vmem:[#allocation15 + $0x7b0] sm:$0xff] }
 0x561   : > { %v6889_v17 = vcombine.low %v1853_v51, %v1857_v5  ;;  %v7735_v2 = vld [vmem:[%s9084_s5 + $0x140] ss:$20 sps:$4 sm:$0xff]  }
 0x562   : > { %3365 = vmatpush1.bf16.msra.mxu0 %v6825_v35  ;;  %v6890_v35 = vcombine.high %v1853_v51, %v1857_v5  ;;  %v7743_v4 = vld [vmem:[%s9084_s5 + $0x16c] ss:$20 sps:$4 sm:$0xff]   ;;  %v7752_v51 = vld [vmem:[%s9084_s5 + $0x19c] ss:$20 sps:$4 sm:$0xff]  }
 0x563   : > { %3447 = vmatpush1.bf16.msra.mxu1 %v6827_v12  ;;  %3366 = vmatprep.subr.bf16.mxu0 %v6834_v13  ;;  %v6892_v12 = vcombine.high %v1854_v7, %v1858_v9  ;;  %v1861_v13 = vld [vmem:[#allocation15 + $0x7d0] sm:$0xff]  ;;  %v7750_v7 = vld [vmem:[%s9084_s5 + $0x198] ss:$20 sps:$4 sm:$0xff]   ;;  %v7755_v9 = vld [vmem:[%s9084_s5 + $0x1bc] ss:$20 sps:$4 sm:$0xff]  }
 0x564   : > { %3448 = vmatprep.subr.bf16.mxu1 %v6836_v14  ;;  %v1865_v14 = vld [vmem:[#allocation15 + $0x7f0] sm:$0xff] }
 0x565   : > { %v7747_v5 = vld [vmem:[%s9084_s5 + $0x190] ss:$20 sps:$4 sm:$0xff]  }
 0x566   : > { %3367 = vmatpush1.bf16.msra.mxu0 %v6833_v21  ;;  %v6898_v21 = vcombine.high %v1861_v13, %v1865_v14 }
 0x567   : > { %3449 = vmatpush1.bf16.msra.mxu1 %v6835_v27  ;;  %3368 = vmatprep.subr.bf16.mxu0 %v6842_v28  ;;  %v6900_v27 = vcombine.high %v1862_v15, %v1866_v16  ;;  %v6897_v28 = vcombine.low %v1861_v13, %v1865_v14  ;;  %v7764_v13 = vld [vmem:[%s9084_s5 + $0x1ec] ss:$20 sps:$4 sm:$0xff]  }
 0x568   : > { %3450 = vmatprep.subr.bf16.mxu1 %v6844_v29  ;;  %v6899_v29 = vcombine.low %v1862_v15, %v1866_v16  ;;  %v7759_v14 = vld [vmem:[%s9084_s5 + $0x1e0] ss:$20 sps:$4 sm:$0xff]   ;;  %v7762_v15 = vld [vmem:[%s9084_s5 + $0x1e8] ss:$20 sps:$4 sm:$0xff]  }
 0x569   : > { %v7767_v16 = vld [vmem:[%s9084_s5 + $0x20c] ss:$20 sps:$4 sm:$0xff]  }
 0x56a   : > { %3369 = vmatpush1.bf16.msra.mxu0 %v6841_v57  ;;  %v7695_v57 = vld [vmem:[%s9084_s5 + $0x2c] ss:$20 sps:$4 sm:$0xff]  }
 0x56b   : > { %3451 = vmatpush1.bf16.msra.mxu1 %v6843_v23  ;;  %3370 = vmatprep.subr.bf16.mxu0 %v6850_v34  ;;  %v7698_v23 = vld [vmem:[%s9084_s5 + $0x34] ss:$20 sps:$4 sm:$0xff]  }
 0x56c   : > { %3452 = vmatprep.subr.bf16.mxu1 %v6852_v40  ;;  %v7693_v34 = vld [vmem:[%s9084_s5 + $0x28] ss:$20 sps:$4 sm:$0xff]   ;;  %v7696_v40 = vld [vmem:[%s9084_s5 + $0x30] ss:$20 sps:$4 sm:$0xff]  }
 0x56e   : > { %3371 = vmatpush1.bf16.msra.mxu0 %v6849_v49  ;;  %v7710_v49 = vld [vmem:[%s9084_s5 + $0x84] ss:$20 sps:$4 sm:$0xff]  }
 0x56f   : > { %3453 = vmatpush1.bf16.msra.mxu1 %v6851_v25  ;;  %3372 = vmatprep.subr.bf16.mxu0 %v6858_v53  ;;  %v7705_v25 = vld [vmem:[%s9084_s5 + $0x78] ss:$20 sps:$4 sm:$0xff]   ;;  %v7708_v53 = vld [vmem:[%s9084_s5 + $0x80] ss:$20 sps:$4 sm:$0xff]  }
 0x570   : > { %3454 = vmatprep.subr.bf16.mxu1 %v6860_v59  ;;  %v7713_v59 = vld [vmem:[%s9084_s5 + $0xa4] ss:$20 sps:$4 sm:$0xff]  }
 0x572   : > { %3373 = vmatpush1.bf16.msra.mxu0 %v6857_v58  ;;  %v7722_v58 = vld [vmem:[%s9084_s5 + $0xd4] ss:$20 sps:$4 sm:$0xff]  }
 0x573   : > { %3455 = vmatpush1.bf16.msra.mxu1 %v6859_v60  ;;  %3374 = vmatprep.subr.bf16.mxu0 %v6866_v38  ;;  %v7717_v60 = vld [vmem:[%s9084_s5 + $0xc8] ss:$20 sps:$4 sm:$0xff]   ;;  %v7720_v38 = vld [vmem:[%s9084_s5 + $0xd0] ss:$20 sps:$4 sm:$0xff]  }
 0x574   : > { %3456 = vmatprep.subr.bf16.mxu1 %v6868_v61  ;;  %v7725_v61 = vld [vmem:[%s9084_s5 + $0xf4] ss:$20 sps:$4 sm:$0xff]  }
 0x576   : > { %3375 = vmatpush1.bf16.msra.mxu0 %v6865_v39  ;;  %v7734_v39 = vld [vmem:[%s9084_s5 + $0x124] ss:$20 sps:$4 sm:$0xff]  }
 0x577   : > { %3457 = vmatpush1.bf16.msra.mxu1 %v6867_v41  ;;  %3376 = vmatprep.subr.bf16.mxu0 %v6874_v42  ;;  %v7729_v41 = vld [vmem:[%s9084_s5 + $0x118] ss:$20 sps:$4 sm:$0xff]   ;;  %v7732_v42 = vld [vmem:[%s9084_s5 + $0x120] ss:$20 sps:$4 sm:$0xff]  }
 0x578   : > { %3458 = vmatprep.subr.bf16.mxu1 %v6876_v0  ;;  %v7737_v0 = vld [vmem:[%s9084_s5 + $0x144] ss:$20 sps:$4 sm:$0xff]  }
 0x57a   : > { %3377 = vmatpush1.bf16.msra.mxu0 %v6873_v46  ;;  %v7746_v46 = vld [vmem:[%s9084_s5 + $0x174] ss:$20 sps:$4 sm:$0xff]  }
 0x57b   : > { %3459 = vmatpush1.bf16.msra.mxu1 %v6875_v47  ;;  %3378 = vmatprep.subr.bf16.mxu0 %v6882_v48  ;;  %v7741_v47 = vld [vmem:[%s9084_s5 + $0x168] ss:$20 sps:$4 sm:$0xff]   ;;  %v7744_v48 = vld [vmem:[%s9084_s5 + $0x170] ss:$20 sps:$4 sm:$0xff]  }
 0x57c   : > { %3460 = vmatprep.subr.bf16.mxu1 %v6884_v50  ;;  %v7749_v50 = vld [vmem:[%s9084_s5 + $0x194] ss:$20 sps:$4 sm:$0xff]  }
 0x57e   : > { %3379 = vmatpush1.bf16.msra.mxu0 %v6881_v10  ;;  %v7758_v10 = vld [vmem:[%s9084_s5 + $0x1c4] ss:$20 sps:$4 sm:$0xff]  }
 0x57f   : > { %3461 = vmatpush1.bf16.msra.mxu1 %v6883_v11  ;;  %3380 = vmatprep.subr.bf16.mxu0 %v6890_v35  ;;  %v7753_v11 = vld [vmem:[%s9084_s5 + $0x1b8] ss:$20 sps:$4 sm:$0xff]   ;;  %v7756_v35 = vld [vmem:[%s9084_s5 + $0x1c0] ss:$20 sps:$4 sm:$0xff]  }
 0x580   : > { %3462 = vmatprep.subr.bf16.mxu1 %v6892_v12  ;;  %v7761_v12 = vld [vmem:[%s9084_s5 + $0x1e4] ss:$20 sps:$4 sm:$0xff]  }
 0x582   : > { %3381 = vmatpush1.bf16.msra.mxu0 %v6889_v17  ;;  %v7770_v17 = vld [vmem:[%s9084_s5 + $0x214] ss:$20 sps:$4 sm:$0xff]  }
 0x583   : > { %3463 = vmatpush1.bf16.msra.mxu1 %v6891_v18  ;;  %3382 = vmatprep.subr.bf16.mxu0 %v6898_v21  ;;  %v7765_v18 = vld [vmem:[%s9084_s5 + $0x208] ss:$20 sps:$4 sm:$0xff]   ;;  %v7768_v21 = vld [vmem:[%s9084_s5 + $0x210] ss:$20 sps:$4 sm:$0xff]  }
 0x584   : > { %3464 = vmatprep.subr.bf16.mxu1 %v6900_v27  ;;  %v7773_v27 = vld [vmem:[%s9084_s5 + $0x234] ss:$20 sps:$4 sm:$0xff]  }
 0x586   : > { %3383 = vmatpush1.bf16.msra.mxu0 %v6897_v28  ;;  %v7776_v28 = vld [vmem:[%s9084_s5 + $0x23c] ss:$20 sps:$4 sm:$0xff]  }
 0x587   : > { %3465 = vmatpush1.bf16.msra.mxu1 %v6899_v29  ;;  %5834 = vmatprep.subr.bf16.mxu0 %v7689_v30  ;;  %v7771_v29 = vld [vmem:[%s9084_s5 + $0x230] ss:$20 sps:$4 sm:$0xff]   ;;  %v7774_v30 = vld [vmem:[%s9084_s5 + $0x238] ss:$20 sps:$4 sm:$0xff]  }
 0x588   : > { %5998 = vmatprep.subr.bf16.mxu1 %v7692_v31  ;;  %v7779_v31 = vld [vmem:[%s9084_s5 + $0x25c] ss:$20 sps:$4 sm:$0xff]  }
 0x589   : > { %3385 = vmatmul.mubr.bf16.vlgmr.msra.gmra.mrb[12].mxu0 %v9180_v52 }
 0x58a   : > { %3467 = vmatmul.mubr.bf16.vlgmr.msra.gmra.mrb[12].mxu1 %v9180_v52  ;;  %5835 = vmatpush1.bf16.msra.mxu0 %v7687_v32  ;;  %v7707_v52 = vld [vmem:[%s9084_s5 + $0x7c] ss:$20 sps:$4 sm:$0xff]   ;;  %v7782_v32 = vld [vmem:[%s9084_s5 + $0x264] ss:$20 sps:$4 sm:$0xff]  }
 0x58b   : > { %5999 = vmatpush1.bf16.msra.mxu1 %v7690_v33  ;;  %5836 = vmatprep.subr.bf16.mxu0 %v7695_v57  ;;  %v7777_v33 = vld [vmem:[%s9084_s5 + $0x258] ss:$20 sps:$4 sm:$0xff]   ;;  %v7780_v57 = vld [vmem:[%s9084_s5 + $0x260] ss:$20 sps:$4 sm:$0xff]  }
 0x58c   : > { %6000 = vmatprep.subr.bf16.mxu1 %v7698_v23  ;;  %v7785_v23 = vld [vmem:[%s9084_s5 + $0x284] ss:$20 sps:$4 sm:$0xff]  }
 0x58e   : > { %5837 = vmatpush1.bf16.msra.mxu0 %v7693_v34  ;;  %v7788_v34 = vld [vmem:[%s9084_s5 + $0x28c] ss:$20 sps:$4 sm:$0xff]  }
 0x58f   : > { %6001 = vmatpush1.bf16.msra.mxu1 %v7696_v40  ;;  %5838 = vmatprep.subr.bf16.mxu0 %v7701_v43 }
 0x590   : > { %6002 = vmatprep.subr.bf16.mxu1 %v7704_v24 }
 0x592   : > { %5839 = vmatpush1.bf16.msra.mxu0 %v7699_v44 }
 0x593   : > { %6003 = vmatpush1.bf16.msra.mxu1 %v7702_v45  ;;  %5840 = vmatprep.subr.bf16.mxu0 %v7707_v52 }
 0x594   : > { %6004 = vmatprep.subr.bf16.mxu1 %v7710_v49 }
 0x596   : > { %5841 = vmatpush1.bf16.msra.mxu0 %v7705_v25 }
 0x597   : > { %6005 = vmatpush1.bf16.msra.mxu1 %v7708_v53  ;;  %5842 = vmatprep.subr.bf16.mxu0 %v7713_v59 }
 0x598   : > { %6006 = vmatprep.subr.bf16.mxu1 %v7716_v56 }
 0x59a   : > { %5843 = vmatpush1.bf16.msra.mxu0 %v7711_v54 }
 0x59b   : > { %6007 = vmatpush1.bf16.msra.mxu1 %v7714_v26  ;;  %5844 = vmatprep.subr.bf16.mxu0 %v7719_v55 }
 0x59c   : > { %6008 = vmatprep.subr.bf16.mxu1 %v7722_v58 }
 0x59e   : > { %5845 = vmatpush1.bf16.msra.mxu0 %v7717_v60 }
 0x59f   : > { %6009 = vmatpush1.bf16.msra.mxu1 %v7720_v38  ;;  %5846 = vmatprep.subr.bf16.mxu0 %v7725_v61 }
 0x5a0   : > { %6010 = vmatprep.subr.bf16.mxu1 %v7728_v62 }
 0x5a2   : > { %5847 = vmatpush1.bf16.msra.mxu0 %v7723_v63 }
 0x5a3   : > { %6011 = vmatpush1.bf16.msra.mxu1 %v7726_v36  ;;  %5848 = vmatprep.subr.bf16.mxu0 %v7731_v37 }
 0x5a4   : > { %6012 = vmatprep.subr.bf16.mxu1 %v7734_v39 }
 0x5a6   : > { %5849 = vmatpush1.bf16.msra.mxu0 %v7729_v41 }
 0x5a7   : > { %6013 = vmatpush1.bf16.msra.mxu1 %v7732_v42  ;;  %5850 = vmatprep.subr.bf16.mxu0 %v7737_v0 }
 0x5a8   : > { %6014 = vmatprep.subr.bf16.mxu1 %v7740_v1 }
 0x5aa   : > { %5851 = vmatpush1.bf16.msra.mxu0 %v7735_v2 }
 0x5ab   : > { %6015 = vmatpush1.bf16.msra.mxu1 %v7738_v3  ;;  %5852 = vmatprep.subr.bf16.mxu0 %v7743_v4 }
 0x5ac   : > { %6016 = vmatprep.subr.bf16.mxu1 %v7746_v46 }
 0x5ae   : > { %5853 = vmatpush1.bf16.msra.mxu0 %v7741_v47 }
 0x5af   : > { %6017 = vmatpush1.bf16.msra.mxu1 %v7744_v48  ;;  %5854 = vmatprep.subr.bf16.mxu0 %v7749_v50 }
 0x5b0   : > { %6018 = vmatprep.subr.bf16.mxu1 %v7752_v51 }
 0x5b2   : > { %5855 = vmatpush1.bf16.msra.mxu0 %v7747_v5 }
 0x5b3   : > { %6019 = vmatpush1.bf16.msra.mxu1 %v7750_v7  ;;  %5856 = vmatprep.subr.bf16.mxu0 %v7755_v9 }
 0x5b4   : > { %6020 = vmatprep.subr.bf16.mxu1 %v7758_v10 }
 0x5b6   : > { %5857 = vmatpush1.bf16.msra.mxu0 %v7753_v11 }
 0x5b7   : > { %6021 = vmatpush1.bf16.msra.mxu1 %v7756_v35  ;;  %5858 = vmatprep.subr.bf16.mxu0 %v7761_v12 }
 0x5b8   : > { %6022 = vmatprep.subr.bf16.mxu1 %v7764_v13 }
 0x5ba   : > { %5859 = vmatpush1.bf16.msra.mxu0 %v7759_v14 }
 0x5bb   : > { %6023 = vmatpush1.bf16.msra.mxu1 %v7762_v15  ;;  %5860 = vmatprep.subr.bf16.mxu0 %v7767_v16 }
 0x5bc   : > { %6024 = vmatprep.subr.bf16.mxu1 %v7770_v17 }
 0x5be   : > { %5861 = vmatpush1.bf16.msra.mxu0 %v7765_v18 }
 0x5bf   : > { %6025 = vmatpush1.bf16.msra.mxu1 %v7768_v21  ;;  %5862 = vmatprep.subr.bf16.mxu0 %v7773_v27 }
 0x5c0   : > { %6026 = vmatprep.subr.bf16.mxu1 %v7776_v28 }
 0x5c2   : > { %5863 = vmatpush1.bf16.msra.mxu0 %v7771_v29 }
 0x5c3   : > { %6027 = vmatpush1.bf16.msra.mxu1 %v7774_v30  ;;  %5864 = vmatprep.subr.bf16.mxu0 %v7779_v31 }
 0x5c4   : > { %6028 = vmatprep.subr.bf16.mxu1 %v7782_v32 }
 0x5c6   : > { %5865 = vmatpush1.bf16.msra.mxu0 %v7777_v33 }
 0x5c7   : > { %6029 = vmatpush1.bf16.msra.mxu1 %v7780_v57  ;;  %5875 = vmatprep.subr.bf16.mxu0 %v7785_v23 }
 0x5c8   : > { %6039 = vmatprep.subr.bf16.mxu1 %v7788_v34 }
 0x5dc   : > { %v3222_v40 = vpop.f32.mrb[8].mxu0  ;;  %v9258_v43 = vpop.f32.mrb[8].mxu1 }
 0x5dd   : > { %v3477_v24 = vrot.slane %v3222_v40, 4  ;;  %v3224_v44 = vpop.f32.mrb[9].mxu0  ;;  %v3306_v45 = vpop.f32.mrb[9].mxu1  ;;  %v3489_v11 = vrot.slane %v9258_v43, 4 }
 0x5de   : > { %v3483_v52 = vrot.slane %v3224_v44, 4  ;;  %v3495_v49 = vrot.slane %v3306_v45, 4  ;;  %v3226_v25 = vpop.f32.mrb[10].mxu0  ;;  %v3308_v53 = vpop.f32.mrb[10].mxu1 }
 0x5df   : > { %v3478_v59 = vadd.f32 %v3477_v24, %v3222_v40  ;;  %v3227_v56 = vpop.f32.mrb[11].mxu0  ;;  %v3309_v54 = vpop.f32.mrb[11].mxu1  ;;  %v3490_v17 = vadd.f32 %v3489_v11, %v9258_v43  ;;  %v9264_v53 = vld [vmem:[#allocation18] sm:$0xff] }
 0x5e0   : > { %v3484_v26 = vadd.f32 %v3483_v52, %v3224_v44  ;;  %v3496_v55 = vadd.f32 %v3495_v49, %v3306_v45  ;;  %v9262_v49 = vld [vmem:[#allocation16] sm:$0xff] }
 0x5e1   : > { %v3479_v58 = vrot.slane %v3478_v59, 2  ;;  %v3491_v31 = vrot.slane %v3490_v17, 2 }
 0x5e2   : > { %v3485_v60 = vrot.slane %v3484_v26, 2  ;;  %v3497_v38 = vrot.slane %v3496_v55, 2 }
 0x5e3   : > { %v3480_v61 = vadd.f32 %v3479_v58, %v3478_v59  ;;  %v3492_v24 = vadd.f32 %v3491_v31, %v3490_v17  ;;  %v3633_v59 = vrot.slane %v9262_v49, %v9112_v20  ;;  %v3637_v58 = vrot.slane %v9262_v49, %v9115_v22  ;;  %v7797_v17 = vld [vmem:[%s9084_s5 + $0x2d4] ss:$20 sps:$4 sm:$0xff]   ;;  %v7801_v31 = vld [vmem:[%s9084_s5 + $0x2f8] ss:$20 sps:$4 sm:$0xff]  }
 0x5e4   : > { %v3486_v62 = vadd.f32 %v3485_v60, %v3484_v26  ;;  %v3498_v63 = vadd.f32 %v3497_v38, %v3496_v55  ;;  %v3682_v26 = vrot.slane %v9264_v53, %v9112_v20  ;;  %v3645_v38 = vrot.slane %v9262_v49, %v9147_v8 }
 0x5e5   : > { %v3481_v36 = vrot.slane %v3480_v61, 1  ;;  %v3493_v52 = vrot.slane %v3492_v24, 1 }
 0x5e6   : > { %v3487_v37 = vrot.slane %v3486_v62, 1  ;;  %v3499_v39 = vrot.slane %v3498_v63, 1 }
 0x5e7   : > { %v3482_v41 = vadd.f32 %v3481_v36, %v3480_v61  ;;  %v3494_v25 = vadd.f32 %v3493_v52, %v3492_v24  ;;  %v3686_v36 = vrot.slane %v9264_v53, %v9115_v22  ;;  %v7813_v52 = vld [vmem:[%s9084_s5 + $0x348] ss:$20 sps:$4 sm:$0xff]  }
 0x5e8   : > { %v3488_v42 = vadd.f32 %v3487_v37, %v3486_v62  ;;  %v3500_v0 = vadd.f32 %v3499_v39, %v3498_v63  ;;  %v3694_v39 = vrot.slane %v9264_v53, %v9147_v8 }
 0x5e9   : > { %v3525_v1 = vmul.f32 0.125, %v3482_v41  ;;  %v3527_v55 = vmul.f32 0.125, %v3494_v25  ;;  %v7816_v25 = vld [vmem:[%s9084_s5 + $0x350] ss:$20 sps:$4 sm:$0xff]  }
 0x5ea   : > { %v3526_v2 = vmul.f32 0.125, %v3488_v42  ;;  %v3528_v3 = vmul.f32 0.125, %v3500_v0 }
 0x5eb   : > { %v3533_v4 = vsub.f32 %v3222_v40, %v3525_v1  ;;  %v9279_v42 = vsub.f32 %v9258_v43, %v3527_v55  ;;  %v7822_v55 = vld [vmem:[%s9084_s5 + $0x378] ss:$20 sps:$4 sm:$0xff]  }
 0x5ec   : > { %v3534_v46 = vsub.f32 %v3224_v44, %v3526_v2  ;;  %v3536_v47 = vsub.f32 %v3306_v45, %v3528_v3 }
 0x5ed   : > { %v3541_v48 = vmul.f32 %v3533_v4, %v3533_v4 }
 0x5ee   : > { %v3542_v50 = vmul.f32 %v3534_v46, %v3534_v46  ;;  %v3544_v51 = vmul.f32 %v3536_v47, %v3536_v47 }
 0x5ef   : > { %v3549_v5 = vrot.slane %v3541_v48, 4 }
 0x5f0   : > { %v3555_v7 = vrot.slane %v3542_v50, 4  ;;  %v3567_v9 = vrot.slane %v3544_v51, 4 }
 0x5f1   : > { %v3550_v10 = vadd.f32 %v3549_v5, %v3541_v48  ;;  %v7783_v5 = vld [vmem:[%s9084_s5 + $0x280] ss:$20 sps:$4 sm:$0xff]  }
 0x5f2   : > { %v3556_v35 = vadd.f32 %v3555_v7, %v3542_v50  ;;  %v3568_v12 = vadd.f32 %v3567_v9, %v3544_v51  ;;  %v7786_v7 = vld [vmem:[%s9084_s5 + $0x288] ss:$20 sps:$4 sm:$0xff]  }
 0x5f3   : > { %v3551_v13 = vrot.slane %v3550_v10, 2 }
 0x5f4   : > { %v3557_v14 = vrot.slane %v3556_v35, 2  ;;  %v3569_v15 = vrot.slane %v3568_v12, 2 }
 0x5f5   : > { %v3552_v16 = vadd.f32 %v3551_v13, %v3550_v10 }
 0x5f6   : > { %v3558_v18 = vadd.f32 %v3557_v14, %v3556_v35  ;;  %v3570_v21 = vadd.f32 %v3569_v15, %v3568_v12  ;;  %v7791_v35 = vld [vmem:[%s9084_s5 + $0x2ac] ss:$20 sps:$4 sm:$0xff]   ;;  %v7794_v12 = vld [vmem:[%s9084_s5 + $0x2b4] ss:$20 sps:$4 sm:$0xff]   ;;  %v7792_v15 = vld [vmem:[%s9084_s5 + $0x2b0] ss:$20 sps:$4 sm:$0xff]  }
 0x5f7   : > { %v3553_v27 = vrot.slane %v3552_v16, 1  ;;  %v7789_v14 = vld [vmem:[%s9084_s5 + $0x2a8] ss:$20 sps:$4 sm:$0xff]  }
 0x5f8   : > { %v3559_v28 = vrot.slane %v3558_v18, 1  ;;  %v3571_v29 = vrot.slane %v3570_v21, 1 }
 0x5f9   : > { %v3554_v30 = vadd.f32 %v3553_v27, %v3552_v16  ;;  %v7798_v27 = vld [vmem:[%s9084_s5 + $0x2d8] ss:$20 sps:$4 sm:$0xff]  }
 0x5fa   : > { %v3560_v32 = vadd.f32 %v3559_v28, %v3558_v18  ;;  %v3572_v33 = vadd.f32 %v3571_v29, %v3570_v21  ;;  %v7800_v18 = vld [vmem:[%s9084_s5 + $0x2dc] ss:$20 sps:$4 sm:$0xff]  }
 0x5fb   : > { %v3597_v57 = vmul.f32 0.125, %v3554_v30  ;;  %v7795_v21 = vld [vmem:[%s9084_s5 + $0x2d0] ss:$20 sps:$4 sm:$0xff]  }
 0x5fc   : > { %v3598_v23 = vmul.f32 0.125, %v3560_v32  ;;  %v3600_v34 = vmul.f32 0.125, %v3572_v33  ;;  %v7803_v29 = vld [vmem:[%s9084_s5 + $0x2fc] ss:$20 sps:$4 sm:$0xff]   ;;  %v7806_v30 = vld [vmem:[%s9084_s5 + $0x304] ss:$20 sps:$4 sm:$0xff]  }
 0x5fd   : > { %v3605_v40 = vadd.f32 0.8, %v3597_v57  ;;  %v7804_v32 = vld [vmem:[%s9084_s5 + $0x300] ss:$20 sps:$4 sm:$0xff]   ;;  %v7809_v57 = vld [vmem:[%s9084_s5 + $0x324] ss:$20 sps:$4 sm:$0xff]  }
 0x5fe   : > { %v3606_v44 = vadd.f32 0.8, %v3598_v23  ;;  %v3608_v45 = vadd.f32 0.8, %v3600_v34  ;;  %v7812_v23 = vld [vmem:[%s9084_s5 + $0x32c] ss:$20 sps:$4 sm:$0xff]  }
 0x5ff   : > { %8147 = vrsqrt.f32 %v3605_v40  ;;  %v7807_v34 = vld [vmem:[%s9084_s5 + $0x320] ss:$20 sps:$4 sm:$0xff]   ;;  %v7810_v40 = vld [vmem:[%s9084_s5 + $0x328] ss:$20 sps:$4 sm:$0xff]  }
 0x600   : > { %8149 = vrsqrt.f32 %v3606_v44  ;;  %v7815_v44 = vld [vmem:[%s9084_s5 + $0x34c] ss:$20 sps:$4 sm:$0xff]  }
 0x601   : > { %8151 = vrsqrt.f32 %v3608_v45  ;;  %v7818_v45 = vld [vmem:[%s9084_s5 + $0x354] ss:$20 sps:$4 sm:$0xff]  }
 0x609   : > { %v8148_v56 = vpop.eup %8147 }
 0x60a   : > { %v3621_v54 = vmul.f32 %v8148_v56, %v3533_v4  ;;  %v8150_v60 = vpop.eup %8149  ;;  %v7821_v56 = vld [vmem:[%s9084_s5 + $0x374] ss:$20 sps:$4 sm:$0xff]  }
 0x60b   : > { %v8152_v61 = vpop.eup %8151  ;;  %v3622_v63 = vmul.f32 %v8150_v60, %v3534_v46  ;;  %v3543_v46 = vmul.f32 %v9279_v42, %v9279_v42  ;;  %v7827_v60 = vld [vmem:[%s9084_s5 + $0x39c] ss:$20 sps:$4 sm:$0xff]  }
 0x60c   : > { %v3670_v62 = vmul.f32 %v3633_v59, %v3621_v54  ;;  %v3624_v37 = vmul.f32 %v8152_v61, %v3536_v47  ;;  %v7824_v54 = vld [vmem:[%s9084_s5 + $0x37c] ss:$20 sps:$4 sm:$0xff]   ;;  %v7825_v61 = vld [vmem:[%s9084_s5 + $0x398] ss:$20 sps:$4 sm:$0xff]  }
 0x60d   : > { %v3671_v0 = vmul.f32 %v3637_v58, %v3622_v63  ;;  %v3561_v10 = vrot.slane %v3543_v46, 4 }
 0x60e   : > { %v3719_v41 = vadd.f32 %v3682_v26, %v3670_v62  ;;  %v3673_v1 = vmul.f32 %v3645_v38, %v3624_v37  ;;  %v7819_v26 = vld [vmem:[%s9084_s5 + $0x370] ss:$20 sps:$4 sm:$0xff]   ;;  %v7828_v62 = vld [vmem:[%s9084_s5 + $0x3a0] ss:$20 sps:$4 sm:$0xff]  }
 0x60f   : > { %v3720_v2 = vadd.f32 %v3686_v36, %v3671_v0  ;;  %v3562_v16 = vadd.f32 %v3561_v10, %v3543_v46  ;;  %v7830_v38 = vld [vmem:[%s9084_s5 + $0x3a4] ss:$20 sps:$4 sm:$0xff]   ;;  %v7836_v37 = vld [vmem:[%s9084_s5 + $0x3cc] ss:$20 sps:$4 sm:$0xff]   ;;  %v7848_v46 = vld [vmem:[%s9084_s5 + $0x41c] ss:$20 sps:$4 sm:$0xff]  }
 0x610   : > { %vm3727_vm8 = vcmp.gt.f32.partialorder %v3719_v41, 0.0  ;;  %v3735_v3 = vmul.f32 0.2, %v3719_v41  ;;  %v3722_v4 = vadd.f32 %v3694_v39, %v3673_v1  ;;  %v7833_v36 = vld [vmem:[%s9084_s5 + $0x3c4] ss:$20 sps:$4 sm:$0xff]  }
 0x611   : > { %vm3728_vm9 = vcmp.gt.f32.partialorder %v3720_v2, 0.0  ;;  %v3736_v47 = vmul.f32 0.2, %v3720_v2  ;;  %v3563_v28 = vrot.slane %v3562_v16, 2  ;;  %v7831_v39 = vld [vmem:[%s9084_s5 + $0x3c0] ss:$20 sps:$4 sm:$0xff]  }
 0x612   : > { %v3743_v48 = vsel %vm3727_vm8, %v3719_v41, %v3735_v3  ;;  %vm3730_vm10 = vcmp.gt.f32.partialorder %v3722_v4, 0.0  ;;  %v3738_v50 = vmul.f32 0.2, %v3722_v4  ;;  %v7834_v41 = vld [vmem:[%s9084_s5 + $0x3c8] ss:$20 sps:$4 sm:$0xff]  }
 0x613   : > { %v3744_v51 = vsel %vm3728_vm9, %v3720_v2, %v3736_v47  ;;  %v9287_v11 = vpack.c.bf16 %v3743_v48, %v3743_v48  ;;  %v3564_v33 = vadd.f32 %v3563_v28, %v3562_v16  ;;  %v7839_v0 = vld [vmem:[%s9084_s5 + $0x3ec] ss:$20 sps:$4 sm:$0xff]   ;;  %v7842_v1 = vld [vmem:[%s9084_s5 + $0x3f4] ss:$20 sps:$4 sm:$0xff]   ;;  %v7840_v3 = vld [vmem:[%s9084_s5 + $0x3f0] ss:$20 sps:$4 sm:$0xff]  }
 0x614   : > { %v9283_v43 = vpack.c.bf16 %v3744_v51, %v3744_v51  ;;  %v3746_v9 = vsel %vm3730_vm10, %v3722_v4, %v3738_v50  ;;  %v7837_v2 = vld [vmem:[%s9084_s5 + $0x3e8] ss:$20 sps:$4 sm:$0xff]   ;;  %v7843_v47 = vld [vmem:[%s9084_s5 + $0x410] ss:$20 sps:$4 sm:$0xff]   ;;  %v7846_v48 = vld [vmem:[%s9084_s5 + $0x418] ss:$20 sps:$4 sm:$0xff]  }
 0x615   : > { %v9295_v13 = vpack.c.bf16 %v3746_v9, %v3746_v9  ;;  %v3565_v24 = vrot.slane %v3564_v33, 1  ;;  %v7845_v4 = vld [vmem:[%s9084_s5 + $0x414] ss:$20 sps:$4 sm:$0xff]   ;;  %v7851_v50 = vld [vmem:[%s9084_s5 + $0x43c] ss:$20 sps:$4 sm:$0xff]  }
 0x616   : > { %5866 = vmatprep.mubr.bf16.mxu0 %v9283_v43  ;;  %6030 = vmatprep.mubr.bf16.mxu1 %v9283_v43  ;;  %v7854_v51 = vld [vmem:[%s9084_s5 + $0x444] ss:$20 sps:$4 sm:$0xff]   ;;  %v7852_v9 = vld [vmem:[%s9084_s5 + $0x440] ss:$20 sps:$4 sm:$0xff]   ;;  %v7858_v16 = vld [vmem:[%s9084_s5 + $0x468] ss:$20 sps:$4 sm:$0xff]  }
 0x617   : > { %5867 = vmatmul.mubr.bf16.vlgmr.msra.gmra.mrb[16].mxu0 %v9287_v11  ;;  %6031 = vmatmul.mubr.bf16.vlgmr.msra.gmra.mrb[16].mxu1 %v9287_v11  ;;  %v3566_v59 = vadd.f32 %v3565_v24, %v3564_v33  ;;  %v7857_v10 = vld [vmem:[%s9084_s5 + $0x464] ss:$20 sps:$4 sm:$0xff]   ;;  %v7876_v24 = vld [vmem:[%s9084_s5 + $0x4e0] ss:$20 sps:$4 sm:$0xff]  }
 0x618   : > { %5876 = vmatpush1.bf16.msra.mxu0 %v7783_v5  ;;  %6040 = vmatpush1.bf16.msra.mxu1 %v7786_v7  ;;  %v7849_v7 = vld [vmem:[%s9084_s5 + $0x438] ss:$20 sps:$4 sm:$0xff]   ;;  %v7864_v28 = vld [vmem:[%s9084_s5 + $0x490] ss:$20 sps:$4 sm:$0xff]  }
 0x619   : > { %5907 = vmatprep.mubr.bf16.mxu0 %v9295_v13  ;;  %6071 = vmatprep.mubr.bf16.mxu1 %v9295_v13  ;;  %v3599_v58 = vmul.f32 0.125, %v3566_v59  ;;  %v7870_v33 = vld [vmem:[%s9084_s5 + $0x4b8] ss:$20 sps:$4 sm:$0xff]   ;;  %v7882_v59 = vld [vmem:[%s9084_s5 + $0x508] ss:$20 sps:$4 sm:$0xff]  }
 0x61a   : > { %5877 = vmatprep.subr.bf16.mxu0 %v7791_v35  ;;  %6041 = vmatprep.subr.bf16.mxu1 %v7794_v12  ;;  %v7860_v35 = vld [vmem:[%s9084_s5 + $0x46c] ss:$20 sps:$4 sm:$0xff]  }
 0x61b   : > { %v3607_v63 = vadd.f32 0.8, %v3599_v58  ;;  %v7888_v58 = vld [vmem:[%s9084_s5 + $0x530] ss:$20 sps:$4 sm:$0xff]  }
 0x61c   : > { %5878 = vmatpush1.bf16.msra.mxu0 %v7789_v14  ;;  %6042 = vmatpush1.bf16.msra.mxu1 %v7792_v15  ;;  %v3641_v14 = vrot.slane %v9262_v49, %v9144_v6  ;;  %v7855_v15 = vld [vmem:[%s9084_s5 + $0x460] ss:$20 sps:$4 sm:$0xff]  }
 0x61d   : > { %5879 = vmatprep.subr.bf16.mxu0 %v7797_v17  ;;  %6043 = vmatprep.subr.bf16.mxu1 %v7800_v18  ;;  %8153 = vrsqrt.f32 %v3607_v63  ;;  %v7863_v17 = vld [vmem:[%s9084_s5 + $0x48c] ss:$20 sps:$4 sm:$0xff]   ;;  %v7866_v18 = vld [vmem:[%s9084_s5 + $0x494] ss:$20 sps:$4 sm:$0xff]  }
 0x61e   : > { %v7894_v63 = vld [vmem:[%s9084_s5 + $0x558] ss:$20 sps:$4 sm:$0xff]  }
 0x620   : > { %5880 = vmatpush1.bf16.msra.mxu0 %v7795_v21  ;;  %6044 = vmatpush1.bf16.msra.mxu1 %v7798_v27  ;;  %v3690_v27 = vrot.slane %v9264_v53, %v9144_v6 }
 0x621   : > { %5881 = vmatprep.subr.bf16.mxu0 %v7803_v29  ;;  %6045 = vmatprep.subr.bf16.mxu1 %v7806_v30  ;;  %v7869_v29 = vld [vmem:[%s9084_s5 + $0x4b4] ss:$20 sps:$4 sm:$0xff]   ;;  %v7872_v30 = vld [vmem:[%s9084_s5 + $0x4bc] ss:$20 sps:$4 sm:$0xff]  }
 0x624   : > { %5882 = vmatpush1.bf16.msra.mxu0 %v7801_v31  ;;  %6046 = vmatpush1.bf16.msra.mxu1 %v7804_v32  ;;  %v7867_v32 = vld [vmem:[%s9084_s5 + $0x4b0] ss:$20 sps:$4 sm:$0xff]  }
 0x625   : > { %5883 = vmatprep.subr.bf16.mxu0 %v7809_v57  ;;  %6047 = vmatprep.subr.bf16.mxu1 %v7812_v23  ;;  %v7875_v57 = vld [vmem:[%s9084_s5 + $0x4dc] ss:$20 sps:$4 sm:$0xff]   ;;  %v7878_v23 = vld [vmem:[%s9084_s5 + $0x4e4] ss:$20 sps:$4 sm:$0xff]  }
 0x627   : > { %v8154_v5 = vpop.eup %8153 }
 0x628   : > { %5884 = vmatpush1.bf16.msra.mxu0 %v7807_v34  ;;  %6048 = vmatpush1.bf16.msra.mxu1 %v7810_v40  ;;  %v3623_v12 = vmul.f32 %v8154_v5, %v9279_v42  ;;  %v7861_v42 = vld [vmem:[%s9084_s5 + $0x488] ss:$20 sps:$4 sm:$0xff]   ;;  %v7873_v40 = vld [vmem:[%s9084_s5 + $0x4d8] ss:$20 sps:$4 sm:$0xff]  }
 0x629   : > { %5885 = vmatprep.subr.bf16.mxu0 %v7815_v44  ;;  %6049 = vmatprep.subr.bf16.mxu1 %v7818_v45  ;;  %v7881_v44 = vld [vmem:[%s9084_s5 + $0x504] ss:$20 sps:$4 sm:$0xff]   ;;  %v7884_v45 = vld [vmem:[%s9084_s5 + $0x50c] ss:$20 sps:$4 sm:$0xff]  }
 0x62a   : > { %v3672_v21 = vmul.f32 %v3641_v14, %v3623_v12  ;;  %v7905_v12 = vld [vmem:[%s9084_s5 + $0x5a4] ss:$20 sps:$4 sm:$0xff]   ;;  %v7908_v14 = vld [vmem:[%s9084_s5 + $0x5ac] ss:$20 sps:$4 sm:$0xff]  }
 0x62c   : > { %5886 = vmatpush1.bf16.msra.mxu0 %v7813_v52  ;;  %6050 = vmatpush1.bf16.msra.mxu1 %v7816_v25  ;;  %v3721_v31 = vadd.f32 %v3690_v27, %v3672_v21  ;;  %v7879_v25 = vld [vmem:[%s9084_s5 + $0x500] ss:$20 sps:$4 sm:$0xff]  }
 0x62d   : > { %5887 = vmatprep.subr.bf16.mxu0 %v7821_v56  ;;  %6051 = vmatprep.subr.bf16.mxu1 %v7824_v54  ;;  %v7887_v54 = vld [vmem:[%s9084_s5 + $0x52c] ss:$20 sps:$4 sm:$0xff]  }
 0x62e   : > { %v3737_v34 = vmul.f32 0.2, %v3721_v31  ;;  %vm3729_vm11 = vcmp.gt.f32.partialorder %v3721_v31, 0.0  ;;  %v7903_v27 = vld [vmem:[%s9084_s5 + $0x5a0] ss:$20 sps:$4 sm:$0xff]  }
 0x630   : > { %5888 = vmatpush1.bf16.msra.mxu0 %v7819_v26  ;;  %6052 = vmatpush1.bf16.msra.mxu1 %v7822_v55  ;;  %v3745_v52 = vsel %vm3729_vm11, %v3721_v31, %v3737_v34  ;;  %v7890_v26 = vld [vmem:[%s9084_s5 + $0x534] ss:$20 sps:$4 sm:$0xff]  }
 0x631   : > { %5889 = vmatprep.subr.bf16.mxu0 %v7827_v60  ;;  %6053 = vmatprep.subr.bf16.mxu1 %v7830_v38  ;;  %v9366_v56 = vpack.c.bf16 %v3745_v52, %v3745_v52  ;;  %v7885_v55 = vld [vmem:[%s9084_s5 + $0x528] ss:$20 sps:$4 sm:$0xff]  }
 0x632   : > { %v7893_v60 = vld [vmem:[%s9084_s5 + $0x554] ss:$20 sps:$4 sm:$0xff]   ;;  %v7896_v38 = vld [vmem:[%s9084_s5 + $0x55c] ss:$20 sps:$4 sm:$0xff]  }
 0x633   : > { %v7909_v34 = vld [vmem:[%s9084_s5 + $0x5c8] ss:$20 sps:$4 sm:$0xff]  }
 0x634   : > { %5890 = vmatpush1.bf16.msra.mxu0 %v7825_v61  ;;  %6054 = vmatpush1.bf16.msra.mxu1 %v7828_v62  ;;  %v7891_v62 = vld [vmem:[%s9084_s5 + $0x550] ss:$20 sps:$4 sm:$0xff]  }
 0x635   : > { %5891 = vmatprep.subr.bf16.mxu0 %v7833_v36  ;;  %6055 = vmatprep.subr.bf16.mxu1 %v7836_v37 }
 0x638   : > { %5892 = vmatpush1.bf16.msra.mxu0 %v7831_v39  ;;  %6056 = vmatpush1.bf16.msra.mxu1 %v7834_v41  ;;  %v7899_v41 = vld [vmem:[%s9084_s5 + $0x57c] ss:$20 sps:$4 sm:$0xff]  }
 0x639   : > { %5893 = vmatprep.subr.bf16.mxu0 %v7839_v0  ;;  %6057 = vmatprep.subr.bf16.mxu1 %v7842_v1 }
 0x63c   : > { %5894 = vmatpush1.bf16.msra.mxu0 %v7837_v2  ;;  %6058 = vmatpush1.bf16.msra.mxu1 %v7840_v3  ;;  %v7902_v3 = vld [vmem:[%s9084_s5 + $0x584] ss:$20 sps:$4 sm:$0xff]  }
 0x63d   : > { %5895 = vmatprep.subr.bf16.mxu0 %v7845_v4  ;;  %6059 = vmatprep.subr.bf16.mxu1 %v7848_v46 }
 0x640   : > { %5896 = vmatpush1.bf16.msra.mxu0 %v7843_v47  ;;  %6060 = vmatpush1.bf16.msra.mxu1 %v7846_v48 }
 0x641   : > { %5897 = vmatprep.subr.bf16.mxu0 %v7851_v50  ;;  %6061 = vmatprep.subr.bf16.mxu1 %v7854_v51 }
 0x644   : > { %5898 = vmatpush1.bf16.msra.mxu0 %v7849_v7  ;;  %6062 = vmatpush1.bf16.msra.mxu1 %v7852_v9  ;;  %v7897_v9 = vld [vmem:[%s9084_s5 + $0x578] ss:$20 sps:$4 sm:$0xff]  }
 0x645   : > { %5899 = vmatprep.subr.bf16.mxu0 %v7857_v10  ;;  %6063 = vmatprep.subr.bf16.mxu1 %v7860_v35  ;;  %v7900_v10 = vld [vmem:[%s9084_s5 + $0x580] ss:$20 sps:$4 sm:$0xff]  }
 0x648   : > { %5900 = vmatpush1.bf16.msra.mxu0 %v7855_v15  ;;  %6064 = vmatpush1.bf16.msra.mxu1 %v7858_v16 }
 0x649   : > { %5901 = vmatprep.subr.bf16.mxu0 %v7863_v17  ;;  %6065 = vmatprep.subr.bf16.mxu1 %v7866_v18 }
 0x64c   : > { %5902 = vmatpush1.bf16.msra.mxu0 %v7861_v42  ;;  %6066 = vmatpush1.bf16.msra.mxu1 %v7864_v28  ;;  %v7906_v42 = vld [vmem:[%s9084_s5 + $0x5a8] ss:$20 sps:$4 sm:$0xff]  }
 0x64d   : > { %5903 = vmatprep.subr.bf16.mxu0 %v7869_v29  ;;  %6067 = vmatprep.subr.bf16.mxu1 %v7872_v30  ;;  %v7911_v29 = vld [vmem:[%s9084_s5 + $0x5cc] ss:$20 sps:$4 sm:$0xff]   ;;  %v7914_v30 = vld [vmem:[%s9084_s5 + $0x5d4] ss:$20 sps:$4 sm:$0xff]  }
 0x650   : > { %5904 = vmatpush1.bf16.msra.mxu0 %v7867_v32  ;;  %6068 = vmatpush1.bf16.msra.mxu1 %v7870_v33 }
 0x651   : > { %5905 = vmatprep.subr.bf16.mxu0 %v7875_v57  ;;  %6069 = vmatprep.subr.bf16.mxu1 %v7878_v23 }
 0x654   : > { %5906 = vmatpush1.bf16.msra.mxu0 %v7873_v40  ;;  %6070 = vmatpush1.bf16.msra.mxu1 %v7876_v24  ;;  %v7912_v40 = vld [vmem:[%s9084_s5 + $0x5d0] ss:$20 sps:$4 sm:$0xff]  }
 0x655   : > { %5916 = vmatprep.subr.bf16.mxu0 %v7881_v44  ;;  %6080 = vmatprep.subr.bf16.mxu1 %v7884_v45  ;;  %v7917_v44 = vld [vmem:[%s9084_s5 + $0x5f4] ss:$20 sps:$4 sm:$0xff]   ;;  %v7920_v45 = vld [vmem:[%s9084_s5 + $0x5fc] ss:$20 sps:$4 sm:$0xff]  }
 0x657   : > { %5908 = vmatmul.mubr.bf16.vlgmr.msra.gmra.mrb[16].mxu0 %v9366_v56  ;;  %6072 = vmatmul.mubr.bf16.vlgmr.msra.gmra.mrb[16].mxu1 %v9366_v56 }
 0x658   : > { %5917 = vmatpush1.bf16.msra.mxu0 %v7879_v25  ;;  %6081 = vmatpush1.bf16.msra.mxu1 %v7882_v59 }
 0x659   : > { %5918 = vmatprep.subr.bf16.mxu0 %v7887_v54  ;;  %6082 = vmatprep.subr.bf16.mxu1 %v7890_v26 }
 0x65c   : > { %v3386_v61 = vpop.f32.mrb[12].mxu0  ;;  %5919 = vmatpush1.bf16.msra.mxu0 %v7885_v55  ;;  %6083 = vmatpush1.bf16.msra.mxu1 %v7888_v58  ;;  %v7915_v55 = vld [vmem:[%s9084_s5 + $0x5f0] ss:$20 sps:$4 sm:$0xff]   ;;  %v7918_v58 = vld [vmem:[%s9084_s5 + $0x5f8] ss:$20 sps:$4 sm:$0xff]  }
 0x65d   : > { %v3501_v36 = vrot.slane %v3386_v61, 4  ;;  %v9378_v37 = vpop.f32.mrb[12].mxu1  ;;  %v3388_v39 = vpop.f32.mrb[13].mxu0  ;;  %5920 = vmatprep.subr.bf16.mxu0 %v7893_v60  ;;  %6084 = vmatprep.subr.bf16.mxu1 %v7896_v38  ;;  %v7923_v38 = vld [vmem:[%s9084_s5 + $0x61c] ss:$20 sps:$4 sm:$0xff]  }
 0x65e   : > { %v3507_v0 = vrot.slane %v3388_v39, 4  ;;  %v3470_v1 = vpop.f32.mrb[13].mxu1  ;;  %v3390_v2 = vpop.f32.mrb[14].mxu0 }
 0x65f   : > { %v3502_v4 = vadd.f32 %v3501_v36, %v3386_v61  ;;  %v3519_v46 = vrot.slane %v3470_v1, 4  ;;  %v3472_v47 = vpop.f32.mrb[14].mxu1  ;;  %v3391_v48 = vpop.f32.mrb[15].mxu0  ;;  %v3513_v2 = vrot.slane %v9378_v37, 4 }
 0x660   : > { %v3508_v50 = vadd.f32 %v3507_v0, %v3388_v39  ;;  %v3473_v51 = vpop.f32.mrb[15].mxu1  ;;  %5921 = vmatpush1.bf16.msra.mxu0 %v7891_v62  ;;  %6085 = vmatpush1.bf16.msra.mxu1 %v7894_v63  ;;  %v7921_v0 = vld [vmem:[%s9084_s5 + $0x618] ss:$20 sps:$4 sm:$0xff]  }
 0x661   : > { %v3503_v5 = vrot.slane %v3502_v4, 2  ;;  %v3520_v7 = vadd.f32 %v3519_v46, %v3470_v1  ;;  %5922 = vmatprep.subr.bf16.mxu0 %v7899_v41  ;;  %6086 = vmatprep.subr.bf16.mxu1 %v7902_v3  ;;  %v7932_v46 = vld [vmem:[%s9084_s5 + $0x64c] ss:$20 sps:$4 sm:$0xff]  }
 0x662   : > { %v3509_v35 = vrot.slane %v3508_v50, 2 }
 0x663   : > { %v3504_v15 = vadd.f32 %v3503_v5, %v3502_v4  ;;  %v3521_v16 = vrot.slane %v3520_v7, 2  ;;  %v7929_v4 = vld [vmem:[%s9084_s5 + $0x644] ss:$20 sps:$4 sm:$0xff]  }
 0x664   : > { %v3510_v17 = vadd.f32 %v3509_v35, %v3508_v50  ;;  %5923 = vmatpush1.bf16.msra.mxu0 %v7897_v9  ;;  %6087 = vmatpush1.bf16.msra.mxu1 %v7900_v10  ;;  %v7930_v9 = vld [vmem:[%s9084_s5 + $0x648] ss:$20 sps:$4 sm:$0xff]   ;;  %v3514_v10 = vadd.f32 %v3513_v2, %v9378_v37 }
 0x665   : > { %v3505_v18 = vrot.slane %v3504_v15, 1  ;;  %v3522_v21 = vadd.f32 %v3521_v16, %v3520_v7  ;;  %5924 = vmatprep.subr.bf16.mxu0 %v7905_v12  ;;  %6088 = vmatprep.subr.bf16.mxu1 %v7908_v14  ;;  %v7927_v7 = vld [vmem:[%s9084_s5 + $0x640] ss:$20 sps:$4 sm:$0xff]  }
 0x666   : > { %v3511_v28 = vrot.slane %v3510_v17, 1  ;;  %v7935_v12 = vld [vmem:[%s9084_s5 + $0x66c] ss:$20 sps:$4 sm:$0xff]   ;;  %v7938_v14 = vld [vmem:[%s9084_s5 + $0x674] ss:$20 sps:$4 sm:$0xff]  }
 0x667   : > { %v3506_v31 = vadd.f32 %v3505_v18, %v3504_v15  ;;  %v3523_v32 = vrot.slane %v3522_v21, 1  ;;  %v7962_v2 = vld [vmem:[%s9084_s5 + $0x714] ss:$20 sps:$4 sm:$0xff]  }
 0x668   : > { %v3512_v33 = vadd.f32 %v3511_v28, %v3510_v17  ;;  %5925 = vmatpush1.bf16.msra.mxu0 %v7903_v27  ;;  %6089 = vmatpush1.bf16.msra.mxu1 %v7906_v42  ;;  %v7933_v27 = vld [vmem:[%s9084_s5 + $0x668] ss:$20 sps:$4 sm:$0xff]   ;;  %v7936_v42 = vld [vmem:[%s9084_s5 + $0x670] ss:$20 sps:$4 sm:$0xff]   ;;  %v3515_v28 = vrot.slane %v3514_v10, 2 }
 0x669   : > { %v3529_v57 = vmul.f32 0.125, %v3506_v31  ;;  %v3524_v23 = vadd.f32 %v3523_v32, %v3522_v21  ;;  %5926 = vmatprep.subr.bf16.mxu0 %v7911_v29  ;;  %6090 = vmatprep.subr.bf16.mxu1 %v7914_v30  ;;  %v7941_v30 = vld [vmem:[%s9084_s5 + $0x694] ss:$20 sps:$4 sm:$0xff]   ;;  %v7944_v31 = vld [vmem:[%s9084_s5 + $0x69c] ss:$20 sps:$4 sm:$0xff]  }
 0x66a   : > { %v3530_v24 = vmul.f32 0.125, %v3512_v33 }
 0x66b   : > { %v9394_v52 = vsub.f32 %v3386_v61, %v3529_v57  ;;  %v3532_v25 = vmul.f32 0.125, %v3524_v23  ;;  %v7926_v61 = vld [vmem:[%s9084_s5 + $0x624] ss:$20 sps:$4 sm:$0xff]  }
 0x66c   : > { %v9396_v59 = vsub.f32 %v3388_v39, %v3530_v24  ;;  %5927 = vmatpush1.bf16.msra.mxu0 %v7909_v34  ;;  %6091 = vmatpush1.bf16.msra.mxu1 %v7912_v40  ;;  %v7939_v23 = vld [vmem:[%s9084_s5 + $0x690] ss:$20 sps:$4 sm:$0xff]   ;;  %v7942_v24 = vld [vmem:[%s9084_s5 + $0x698] ss:$20 sps:$4 sm:$0xff]  }
 0x66d   : > { %v3545_v54 = vmul.f32 %v9394_v52, %v9394_v52  ;;  %v9400_v26 = vsub.f32 %v3470_v1, %v3532_v25  ;;  %5928 = vmatprep.subr.bf16.mxu0 %v7917_v44  ;;  %6092 = vmatprep.subr.bf16.mxu1 %v7920_v45  ;;  %v7924_v1 = vld [vmem:[%s9084_s5 + $0x620] ss:$20 sps:$4 sm:$0xff]   ;;  %v3516_v44 = vadd.f32 %v3515_v28, %v3514_v10  ;;  %v7947_v25 = vld [vmem:[%s9084_s5 + $0x6bc] ss:$20 sps:$4 sm:$0xff]  }
 0x66e   : > { %v3546_v60 = vmul.f32 %v9396_v59, %v9396_v59  ;;  %v7968_v10 = vld [vmem:[%s9084_s5 + $0x73c] ss:$20 sps:$4 sm:$0xff]  }
 0x66f   : > { %v3573_v62 = vrot.slane %v3545_v54, 4  ;;  %v3548_v63 = vmul.f32 %v9400_v26, %v9400_v26 }
 0x670   : > { %v3579_v36 = vrot.slane %v3546_v60, 4  ;;  %5929 = vmatpush1.bf16.msra.mxu0 %v7915_v55  ;;  %6093 = vmatpush1.bf16.msra.mxu1 %v7918_v58  ;;  %v7945_v58 = vld [vmem:[%s9084_s5 + $0x6b8] ss:$20 sps:$4 sm:$0xff]  }
 0x671   : > { %v3574_v39 = vadd.f32 %v3573_v62, %v3545_v54  ;;  %v3591_v41 = vrot.slane %v3548_v63, 4  ;;  %5930 = vmatprep.subr.bf16.mxu0 %v7923_v38  ;;  %6094 = vmatprep.subr.bf16.mxu1 %v7926_v61  ;;  %v7950_v54 = vld [vmem:[%s9084_s5 + $0x6c4] ss:$20 sps:$4 sm:$0xff]   ;;  %v3517_v38 = vrot.slane %v3516_v44, 1  ;;  %v7956_v62 = vld [vmem:[%s9084_s5 + $0x6ec] ss:$20 sps:$4 sm:$0xff]  }
 0x672   : > { %v3580_v3 = vadd.f32 %v3579_v36, %v3546_v60  ;;  %v7948_v60 = vld [vmem:[%s9084_s5 + $0x6c0] ss:$20 sps:$4 sm:$0xff]   ;;  %v7953_v61 = vld [vmem:[%s9084_s5 + $0x6e4] ss:$20 sps:$4 sm:$0xff]  }
 0x673   : > { %v3575_v47 = vrot.slane %v3574_v39, 2  ;;  %v3592_v48 = vadd.f32 %v3591_v41, %v3548_v63  ;;  %v9433_v63 = vsub.s32 4, %v9109_v19  ;;  %v7951_v36 = vld [vmem:[%s9084_s5 + $0x6e0] ss:$20 sps:$4 sm:$0xff]   ;;  %v3518_v41 = vadd.f32 %v3517_v38, %v3516_v44 }
 0x674   : > { %v3581_v50 = vrot.slane %v3580_v3, 2  ;;  %5931 = vmatpush1.bf16.msra.mxu0 %v7921_v0  ;;  %6095 = vmatpush1.bf16.msra.mxu1 %v7924_v1  ;;  %v3652_v0 = vsub.s32 5, %v9109_v19  ;;  %v7959_v1 = vld [vmem:[%s9084_s5 + $0x70c] ss:$20 sps:$4 sm:$0xff]  }
 0x675   : > { %v3576_v51 = vadd.f32 %v3575_v47, %v3574_v39  ;;  %v3593_v5 = vrot.slane %v3592_v48, 2  ;;  %5932 = vmatprep.subr.bf16.mxu0 %v7929_v4  ;;  %6096 = vmatprep.subr.bf16.mxu1 %v7932_v46  ;;  %v7954_v39 = vld [vmem:[%s9084_s5 + $0x6e8] ss:$20 sps:$4 sm:$0xff]   ;;  %v3649_v4 = vrot.slane %v9262_v49, %v9433_v63  ;;  %v7983_v38 = vld [vmem:[%s9084_s5 + $0x7ac] ss:$20 sps:$4 sm:$0xff]  }
 0x676   : > { %v3582_v35 = vadd.f32 %v3581_v50, %v3580_v3  ;;  %v3660_v3 = vsub.s32 7, %v9109_v19  ;;  %v7957_v47 = vld [vmem:[%s9084_s5 + $0x708] ss:$20 sps:$4 sm:$0xff]  }
 0x677   : > { %v3577_v15 = vrot.slane %v3576_v51, 1  ;;  %v3594_v16 = vadd.f32 %v3593_v5, %v3592_v48  ;;  %v7960_v48 = vld [vmem:[%s9084_s5 + $0x710] ss:$20 sps:$4 sm:$0xff]   ;;  %v3531_v5 = vmul.f32 0.125, %v3518_v41 }
 0x678   : > { %v3583_v17 = vrot.slane %v3582_v35, 1  ;;  %5933 = vmatpush1.bf16.msra.mxu0 %v7927_v7  ;;  %6097 = vmatpush1.bf16.msra.mxu1 %v7930_v9  ;;  %v3653_v7 = vrot.slane %v9262_v49, %v3652_v0  ;;  %v7965_v9 = vld [vmem:[%s9084_s5 + $0x734] ss:$20 sps:$4 sm:$0xff]  }
 0x679   : > { %v3578_v18 = vadd.f32 %v3577_v15, %v3576_v51  ;;  %v3595_v21 = vrot.slane %v3594_v16, 1  ;;  %5934 = vmatprep.subr.bf16.mxu0 %v7935_v12  ;;  %6098 = vmatprep.subr.bf16.mxu1 %v7938_v14  ;;  %v3698_v51 = vrot.slane %v9264_v53, %v9433_v63  ;;  %v3661_v12 = vrot.slane %v9262_v49, %v3660_v3 }
 0x67a   : > { %v3584_v29 = vadd.f32 %v3583_v17, %v3582_v35 }
 0x67b   : > { %v3601_v32 = vmul.f32 0.125, %v3578_v18  ;;  %v3596_v33 = vadd.f32 %v3595_v21, %v3594_v16  ;;  %v3702_v16 = vrot.slane %v9264_v53, %v3652_v0  ;;  %v7963_v18 = vld [vmem:[%s9084_s5 + $0x730] ss:$20 sps:$4 sm:$0xff]   ;;  %v7966_v21 = vld [vmem:[%s9084_s5 + $0x738] ss:$20 sps:$4 sm:$0xff]  }
 0x67c   : > { %v3602_v57 = vmul.f32 0.125, %v3584_v29  ;;  %5935 = vmatpush1.bf16.msra.mxu0 %v7933_v27  ;;  %6099 = vmatpush1.bf16.msra.mxu1 %v7936_v42  ;;  %v3710_v27 = vrot.slane %v9264_v53, %v3660_v3  ;;  %v9459_v42 = vsub.f32 %v9378_v37, %v3531_v5  ;;  %v7974_v29 = vld [vmem:[%s9084_s5 + $0x764] ss:$20 sps:$4 sm:$0xff]   ;;  %v7989_v0 = vld [vmem:[%s9084_s5 + $0x7d4] ss:$20 sps:$4 sm:$0xff]  }
 0x67d   : > { %v3609_v34 = vadd.f32 0.8, %v3601_v32  ;;  %v3604_v40 = vmul.f32 0.125, %v3596_v33  ;;  %5936 = vmatprep.subr.bf16.mxu0 %v7941_v30  ;;  %6100 = vmatprep.subr.bf16.mxu1 %v7944_v31  ;;  %v7969_v32 = vld [vmem:[%s9084_s5 + $0x758] ss:$20 sps:$4 sm:$0xff]  }
 0x67e   : > { %v3610_v45 = vadd.f32 0.8, %v3602_v57  ;;  %v7972_v33 = vld [vmem:[%s9084_s5 + $0x760] ss:$20 sps:$4 sm:$0xff]   ;;  %v7977_v53 = vld [vmem:[%s9084_s5 + $0x784] ss:$20 sps:$4 sm:$0xff]   ;;  %v3547_v37 = vmul.f32 %v9459_v42, %v9459_v42 }
 0x67f   : > { %8155 = vrsqrt.f32 %v3609_v34  ;;  %v3612_v55 = vadd.f32 0.8, %v3604_v40  ;;  %v7980_v34 = vld [vmem:[%s9084_s5 + $0x78c] ss:$20 sps:$4 sm:$0xff]   ;;  %v8001_v5 = vld [vmem:[%s9084_s5 + $0x824] ss:$20 sps:$4 sm:$0xff]  }
 0x680   : > { %8157 = vrsqrt.f32 %v3610_v45  ;;  %5937 = vmatpush1.bf16.msra.mxu0 %v7939_v23  ;;  %6101 = vmatpush1.bf16.msra.mxu1 %v7942_v24  ;;  %v7990_v3 = vld [vmem:[%s9084_s5 + $0x7d8] ss:$20 sps:$4 sm:$0xff]  }
 0x681   : > { %8159 = vrsqrt.f32 %v3612_v55  ;;  %5938 = vmatprep.subr.bf16.mxu0 %v7947_v25  ;;  %6102 = vmatprep.subr.bf16.mxu1 %v7950_v54  ;;  %v7975_v25 = vld [vmem:[%s9084_s5 + $0x780] ss:$20 sps:$4 sm:$0xff]   ;;  %v7978_v54 = vld [vmem:[%s9084_s5 + $0x788] ss:$20 sps:$4 sm:$0xff]  }
 0x684   : > { %5939 = vmatpush1.bf16.msra.mxu0 %v7945_v58  ;;  %6103 = vmatpush1.bf16.msra.mxu1 %v7948_v60  ;;  %v3585_v58 = vrot.slane %v3547_v37, 4 }
 0x685   : > { %5940 = vmatprep.subr.bf16.mxu0 %v7953_v61  ;;  %6104 = vmatprep.subr.bf16.mxu1 %v7956_v62  ;;  %v7986_v61 = vld [vmem:[%s9084_s5 + $0x7b4] ss:$20 sps:$4 sm:$0xff]  }
 0x686   : > { %v3586_v41 = vadd.f32 %v3585_v58, %v3547_v37  ;;  %v8034_v37 = vld [vmem:[%s9084_s5 + $0x8f4] ss:$20 sps:$4 sm:$0xff]   ;;  %v3656_v58 = vsub.s32 6, %v9109_v19 }
 0x687   : > { %v8047_v19 = vld [vmem:[%s9084_s5 + $0x960] ss:$20 sps:$4 sm:$0xff]  }
 0x688   : > { %5941 = vmatpush1.bf16.msra.mxu0 %v7951_v36  ;;  %6105 = vmatpush1.bf16.msra.mxu1 %v7954_v39  ;;  %v7981_v36 = vld [vmem:[%s9084_s5 + $0x7a8] ss:$20 sps:$4 sm:$0xff]   ;;  %v7984_v39 = vld [vmem:[%s9084_s5 + $0x7b0] ss:$20 sps:$4 sm:$0xff]  }
 0x689   : > { %v8156_v46 = vpop.eup %8155  ;;  %5942 = vmatprep.subr.bf16.mxu0 %v7959_v1  ;;  %6106 = vmatprep.subr.bf16.mxu1 %v7962_v2  ;;  %v7992_v1 = vld [vmem:[%s9084_s5 + $0x7dc] ss:$20 sps:$4 sm:$0xff]  }
 0x68a   : > { %v3625_v50 = vmul.f32 %v8156_v46, %v9394_v52  ;;  %v8158_v35 = vpop.eup %8157  ;;  %v7987_v2 = vld [vmem:[%s9084_s5 + $0x7d0] ss:$20 sps:$4 sm:$0xff]  }
 0x68b   : > { %v8160_v14 = vpop.eup %8159  ;;  %v3626_v52 = vmul.f32 %v8158_v35, %v9396_v59  ;;  %v7971_v59 = vld [vmem:[%s9084_s5 + $0x75c] ss:$20 sps:$4 sm:$0xff]  }
 0x68c   : > { %v3674_v15 = vmul.f32 %v3649_v4, %v3625_v50  ;;  %v3628_v17 = vmul.f32 %v8160_v14, %v9400_v26  ;;  %5943 = vmatpush1.bf16.msra.mxu0 %v7957_v47  ;;  %6107 = vmatpush1.bf16.msra.mxu1 %v7960_v48  ;;  %v3587_v4 = vrot.slane %v3586_v41, 2  ;;  %v7995_v46 = vld [vmem:[%s9084_s5 + $0x7fc] ss:$20 sps:$4 sm:$0xff]   ;;  %v7998_v47 = vld [vmem:[%s9084_s5 + $0x804] ss:$20 sps:$4 sm:$0xff]  }
 0x68d   : > { %v3675_v28 = vmul.f32 %v3653_v7, %v3626_v52  ;;  %5944 = vmatprep.subr.bf16.mxu0 %v7965_v9  ;;  %6108 = vmatprep.subr.bf16.mxu1 %v7968_v10  ;;  %v7993_v48 = vld [vmem:[%s9084_s5 + $0x7f8] ss:$20 sps:$4 sm:$0xff]   ;;  %v7996_v50 = vld [vmem:[%s9084_s5 + $0x800] ss:$20 sps:$4 sm:$0xff]   ;;  %v8002_v10 = vld [vmem:[%s9084_s5 + $0x828] ss:$20 sps:$4 sm:$0xff]  }
 0x68e   : > { %v3723_v49 = vadd.f32 %v3698_v51, %v3674_v15  ;;  %v3677_v26 = vmul.f32 %v3661_v12, %v3628_v17  ;;  %v3588_v51 = vadd.f32 %v3587_v4, %v3586_v41  ;;  %v8004_v7 = vld [vmem:[%s9084_s5 + $0x82c] ss:$20 sps:$4 sm:$0xff]   ;;  %v8010_v14 = vld [vmem:[%s9084_s5 + $0x854] ss:$20 sps:$4 sm:$0xff]   ;;  %v8008_v52 = vld [vmem:[%s9084_s5 + $0x850] ss:$20 sps:$4 sm:$0xff]  }
 0x68f   : > { %v3724_v30 = vadd.f32 %v3702_v16, %v3675_v28  ;;  %v7999_v9 = vld [vmem:[%s9084_s5 + $0x820] ss:$20 sps:$4 sm:$0xff]   ;;  %v8005_v15 = vld [vmem:[%s9084_s5 + $0x848] ss:$20 sps:$4 sm:$0xff]  }
 0x690   : > { %vm3731_vm12 = vcmp.gt.f32.partialorder %v3723_v49, 0.0  ;;  %v3739_v31 = vmul.f32 0.2, %v3723_v49  ;;  %5945 = vmatpush1.bf16.msra.mxu0 %v7963_v18  ;;  %6109 = vmatpush1.bf16.msra.mxu1 %v7966_v21  ;;  %v3726_v57 = vadd.f32 %v3710_v27, %v3677_v26  ;;  %v3589_v35 = vrot.slane %v3588_v51, 1  ;;  %v8007_v12 = vld [vmem:[%s9084_s5 + $0x84c] ss:$20 sps:$4 sm:$0xff]  }
 0x691   : > { %5946 = vmatprep.subr.bf16.mxu0 %v7971_v59  ;;  %6110 = vmatprep.subr.bf16.mxu1 %v7974_v29  ;;  %vm3732_vm13 = vcmp.gt.f32.partialorder %v3724_v30, 0.0  ;;  %v3740_v23 = vmul.f32 0.2, %v3724_v30  ;;  %v8013_v17 = vld [vmem:[%s9084_s5 + $0x874] ss:$20 sps:$4 sm:$0xff]  }
 0x692   : > { %v3747_v40 = vsel %vm3731_vm12, %v3723_v49, %v3739_v31  ;;  %vm3734_vm14 = vcmp.gt.f32.partialorder %v3726_v57, 0.0  ;;  %v3742_v24 = vmul.f32 0.2, %v3726_v57  ;;  %v3590_v16 = vadd.f32 %v3589_v35, %v3588_v51  ;;  %v8016_v18 = vld [vmem:[%s9084_s5 + $0x87c] ss:$20 sps:$4 sm:$0xff]  }
 0x693   : > { %v3748_v44 = vsel %vm3732_vm13, %v3724_v30, %v3740_v23  ;;  %v9473_v60 = vpack.c.bf16 %v3747_v40, %v3747_v40  ;;  %v8011_v21 = vld [vmem:[%s9084_s5 + $0x870] ss:$20 sps:$4 sm:$0xff]   ;;  %v8014_v27 = vld [vmem:[%s9084_s5 + $0x878] ss:$20 sps:$4 sm:$0xff]   ;;  %v8020_v26 = vld [vmem:[%s9084_s5 + $0x8a0] ss:$20 sps:$4 sm:$0xff]  }
 0x694   : > { %5947 = vmatpush1.bf16.msra.mxu0 %v7969_v32  ;;  %6111 = vmatpush1.bf16.msra.mxu1 %v7972_v33  ;;  %v9469_v45 = vpack.c.bf16 %v3748_v44, %v3748_v44  ;;  %v3750_v55 = vsel %vm3734_vm14, %v3726_v57, %v3742_v24  ;;  %v3603_v49 = vmul.f32 0.125, %v3590_v16  ;;  %v8019_v28 = vld [vmem:[%s9084_s5 + $0x89c] ss:$20 sps:$4 sm:$0xff]   ;;  %v8022_v59 = vld [vmem:[%s9084_s5 + $0x8a4] ss:$20 sps:$4 sm:$0xff]  }
 0x695   : > { %5957 = vmatprep.subr.bf16.mxu0 %v7977_v53  ;;  %6121 = vmatprep.subr.bf16.mxu1 %v7980_v34  ;;  %v9481_v62 = vpack.c.bf16 %v3750_v55, %v3750_v55  ;;  %v8017_v29 = vld [vmem:[%s9084_s5 + $0x898] ss:$20 sps:$4 sm:$0xff]   ;;  %v8023_v33 = vld [vmem:[%s9084_s5 + $0x8c0] ss:$20 sps:$4 sm:$0xff]   ;;  %v8026_v53 = vld [vmem:[%s9084_s5 + $0x8c8] ss:$20 sps:$4 sm:$0xff]  }
 0x696   : > { %5948 = vmatprep.mubr.bf16.mxu0 %v9469_v45  ;;  %6112 = vmatprep.mubr.bf16.mxu1 %v9469_v45  ;;  %v3611_v30 = vadd.f32 0.8, %v3603_v49  ;;  %v8025_v31 = vld [vmem:[%s9084_s5 + $0x8c4] ss:$20 sps:$4 sm:$0xff]   ;;  %v8028_v32 = vld [vmem:[%s9084_s5 + $0x8cc] ss:$20 sps:$4 sm:$0xff]  }
 0x697   : > { %5949 = vmatmul.mubr.bf16.vlgmr.msra.gmra.mrb[16].mxu0 %v9473_v60  ;;  %6113 = vmatmul.mubr.bf16.vlgmr.msra.gmra.mrb[16].mxu1 %v9473_v60  ;;  %v8031_v57 = vld [vmem:[%s9084_s5 + $0x8ec] ss:$20 sps:$4 sm:$0xff]   ;;  %v8029_v23 = vld [vmem:[%s9084_s5 + $0x8e8] ss:$20 sps:$4 sm:$0xff]   ;;  %v8032_v34 = vld [vmem:[%s9084_s5 + $0x8f0] ss:$20 sps:$4 sm:$0xff]  }
 0x698   : > { %5958 = vmatpush1.bf16.msra.mxu0 %v7975_v25  ;;  %6122 = vmatpush1.bf16.msra.mxu1 %v7978_v54  ;;  %8161 = vrsqrt.f32 %v3611_v30  ;;  %v8037_v40 = vld [vmem:[%s9084_s5 + $0x914] ss:$20 sps:$4 sm:$0xff]   ;;  %v8040_v24 = vld [vmem:[%s9084_s5 + $0x91c] ss:$20 sps:$4 sm:$0xff]   ;;  %v8038_v25 = vld [vmem:[%s9084_s5 + $0x918] ss:$20 sps:$4 sm:$0xff]  }
 0x699   : > { %5989 = vmatprep.mubr.bf16.mxu0 %v9481_v62  ;;  %6153 = vmatprep.mubr.bf16.mxu1 %v9481_v62  ;;  %v8035_v44 = vld [vmem:[%s9084_s5 + $0x910] ss:$20 sps:$4 sm:$0xff]   ;;  %v8052_v41 = vld [vmem:[%s9084_s5 + $0x96c] ss:$20 sps:$4 sm:$0xff]  }
 0x69a   : > { %5959 = vmatprep.subr.bf16.mxu0 %v7983_v38  ;;  %6123 = vmatprep.subr.bf16.mxu1 %v7986_v61  ;;  %v8043_v54 = vld [vmem:[%s9084_s5 + $0x93c] ss:$20 sps:$4 sm:$0xff]   ;;  %v8046_v55 = vld [vmem:[%s9084_s5 + $0x944] ss:$20 sps:$4 sm:$0xff]   ;;  %v8055_v4 = vld [vmem:[%s9084_s5 + $0x98c] ss:$20 sps:$4 sm:$0xff]  }
 0x69b   : > { %v8041_v61 = vld [vmem:[%s9084_s5 + $0x938] ss:$20 sps:$4 sm:$0xff]   ;;  %v8056_v51 = vld [vmem:[%s9084_s5 + $0x990] ss:$20 sps:$4 sm:$0xff]   ;;  %v8068_v16 = vld [vmem:[%s9084_s5 + $0x9e0] ss:$20 sps:$4 sm:$0xff]  }
 0x69c   : > { %5960 = vmatpush1.bf16.msra.mxu0 %v7981_v36  ;;  %6124 = vmatpush1.bf16.msra.mxu1 %v7984_v39  ;;  %v8044_v36 = vld [vmem:[%s9084_s5 + $0x940] ss:$20 sps:$4 sm:$0xff]   ;;  %v8049_v39 = vld [vmem:[%s9084_s5 + $0x964] ss:$20 sps:$4 sm:$0xff]  }
 0x69d   : > { %5961 = vmatprep.subr.bf16.mxu0 %v7989_v0  ;;  %6125 = vmatprep.subr.bf16.mxu1 %v7992_v1  ;;  %v8173_v1 = vld [vmem:[#allocation16] sm:$0xff]  ;;  %v8062_v35 = vld [vmem:[%s9084_s5 + $0x9b8] ss:$20 sps:$4 sm:$0xff]  }
 0x69e   : > { %v8078_v30 = vld [vmem:[%s9084_s5 + $0x2b8] ss:$20 sps:$4 sm:$0xff]  }
 0x6a0   : > { %5962 = vmatpush1.bf16.msra.mxu0 %v7987_v2  ;;  %6126 = vmatpush1.bf16.msra.mxu1 %v7990_v3  ;;  %v3657_v2 = vrot.slane %v8173_v1, %v3656_v58  ;;  %v8050_v3 = vld [vmem:[%s9084_s5 + $0x968] ss:$20 sps:$4 sm:$0xff]  }
 0x6a1   : > { %5963 = vmatprep.subr.bf16.mxu0 %v7995_v46  ;;  %6127 = vmatprep.subr.bf16.mxu1 %v7998_v47  ;;  %v8058_v46 = vld [vmem:[%s9084_s5 + $0x994] ss:$20 sps:$4 sm:$0xff]  }
 0x6a2   : > { %v8162_v38 = vpop.eup %8161  ;;  %v8102_v1 = vld [vmem:[%s9084_s5 + $0x3a8] ss:$20 sps:$4 sm:$0xff]  }
 0x6a3   : > { %v3627_v0 = vmul.f32 %v8162_v38, %v9459_v42  ;;  %v8053_v42 = vld [vmem:[%s9084_s5 + $0x988] ss:$20 sps:$4 sm:$0xff]   ;;  %v8096_v38 = vld [vmem:[%s9084_s5 + $0x4c0] ss:$20 sps:$4 sm:$0xff]  }
 0x6a4   : > { %5964 = vmatpush1.bf16.msra.mxu0 %v7993_v48  ;;  %6128 = vmatpush1.bf16.msra.mxu1 %v7996_v50  ;;  %v8174_v48 = vld [vmem:[#allocation18] sm:$0xff] }
 0x6a5   : > { %5965 = vmatprep.subr.bf16.mxu0 %v8001_v5  ;;  %6129 = vmatprep.subr.bf16.mxu1 %v8004_v7  ;;  %v3676_v47 = vmul.f32 %v3657_v2, %v3627_v0  ;;  %v3706_v50 = vrot.slane %v8174_v48, %v3656_v58  ;;  %v8061_v5 = vld [vmem:[%s9084_s5 + $0x9b4] ss:$20 sps:$4 sm:$0xff]   ;;  %v8064_v7 = vld [vmem:[%s9084_s5 + $0x9bc] ss:$20 sps:$4 sm:$0xff]   ;;  %v8109_v48 = vld [vmem:[%s9084_s5 + $0x538] ss:$20 sps:$4 sm:$0xff]  }
 0x6a6   : > { %v8095_v58 = vld [vmem:[%s9084_s5 + $0x240] ss:$20 sps:$4 sm:$0xff]   ;;  %v8101_v0 = vld [vmem:[%s9084_s5 + $0x128] ss:$20 sps:$4 sm:$0xff]   ;;  %v8103_v2 = vld [vmem:[%s9084_s5 + $0x650] ss:$20 sps:$4 sm:$0xff]  }
 0x6a8   : > { %5966 = vmatpush1.bf16.msra.mxu0 %v7999_v9  ;;  %6130 = vmatpush1.bf16.msra.mxu1 %v8002_v10  ;;  %v3725_v9 = vadd.f32 %v3706_v50, %v3676_v47  ;;  %v8059_v10 = vld [vmem:[%s9084_s5 + $0x9b0] ss:$20 sps:$4 sm:$0xff]   ;;  %v8108_v47 = vld [vmem:[%s9084_s5 + $0x8f8] ss:$20 sps:$4 sm:$0xff]  }
 0x6a9   : > { %5967 = vmatprep.subr.bf16.mxu0 %v8007_v12  ;;  %6131 = vmatprep.subr.bf16.mxu1 %v8010_v14  ;;  %v8067_v12 = vld [vmem:[%s9084_s5 + $0x9dc] ss:$20 sps:$4 sm:$0xff]   ;;  %v8070_v14 = vld [vmem:[%s9084_s5 + $0x9e4] ss:$20 sps:$4 sm:$0xff]  }
 0x6aa   : > { %vm3733_vm15 = vcmp.gt.f32.partialorder %v3725_v9, 0.0  ;;  %v8110_v50 = vld [vmem:[%s9084_s5 + $0x7b8] ss:$20 sps:$4 sm:$0xff]  }
 0x6ac   : > { %5968 = vmatpush1.bf16.msra.mxu0 %v8005_v15  ;;  %6132 = vmatpush1.bf16.msra.mxu1 %v8008_v52  ;;  %v3741_v15 = vmul.f32 0.2, %v3725_v9  ;;  %v8065_v52 = vld [vmem:[%s9084_s5 + $0x9d8] ss:$20 sps:$4 sm:$0xff]  }
 0x6ad   : > { %5969 = vmatprep.subr.bf16.mxu0 %v8013_v17  ;;  %6133 = vmatprep.subr.bf16.mxu1 %v8016_v18  ;;  %v8071_v17 = vld [vmem:[%s9084_s5 + $0x150] ss:$20 sps:$4 sm:$0xff]  }
 0x6ae   : > { %v8072_v18 = vld [vmem:[%s9084_s5 + $0x3d0] ss:$20 sps:$4 sm:$0xff]  }
 0x6b0   : > { %5970 = vmatpush1.bf16.msra.mxu0 %v8011_v21  ;;  %6134 = vmatpush1.bf16.msra.mxu1 %v8014_v27  ;;  %v3749_v21 = vsel %vm3733_vm15, %v3725_v9, %v3741_v15  ;;  %v8073_v27 = vld [vmem:[%s9084_s5 + $0x10] ss:$20 sps:$4 sm:$0xff]   ;;  %v8124_v15 = vld [vmem:[%s9084_s5 + $0x998] ss:$20 sps:$4 sm:$0xff]  }
 0x6b1   : > { %5971 = vmatprep.subr.bf16.mxu0 %v8019_v28  ;;  %6135 = vmatprep.subr.bf16.mxu1 %v8022_v59  ;;  %v9548_v49 = vpack.c.bf16 %v3749_v21, %v3749_v21  ;;  %v8074_v28 = vld [vmem:[%s9084_s5 + $0x290] ss:$20 sps:$4 sm:$0xff]   ;;  %v8075_v59 = vld [vmem:[%s9084_s5 + $0x178] ss:$20 sps:$4 sm:$0xff]   ;;  %v8129_v21 = vld [vmem:[%s9084_s5 + $0x600] ss:$20 sps:$4 sm:$0xff]  }
 0x6b2   : > { %v8119_v9 = vld [vmem:[%s9084_s5 + $0x6f0] ss:$20 sps:$4 sm:$0xff]  }
 0x6b4   : > { %5972 = vmatpush1.bf16.msra.mxu0 %v8017_v29  ;;  %6136 = vmatpush1.bf16.msra.mxu1 %v8020_v26  ;;  %v8076_v29 = vld [vmem:[%s9084_s5 + $0x3f8] ss:$20 sps:$4 sm:$0xff]  }
 0x6b5   : > { %5973 = vmatprep.subr.bf16.mxu0 %v8025_v31  ;;  %6137 = vmatprep.subr.bf16.mxu1 %v8028_v32  ;;  %v8077_v26 = vld [vmem:[%s9084_s5 + $0x38] ss:$20 sps:$4 sm:$0xff]   ;;  %v8079_v31 = vld [vmem:[%s9084_s5 + $0x1a0] ss:$20 sps:$4 sm:$0xff]  }
 0x6b6   : > { %v8080_v32 = vld [vmem:[%s9084_s5 + $0x420] ss:$20 sps:$4 sm:$0xff]  }
 0x6b8   : > { %5974 = vmatpush1.bf16.msra.mxu0 %v8023_v33  ;;  %6138 = vmatpush1.bf16.msra.mxu1 %v8026_v53  ;;  %v8081_v33 = vld [vmem:[%s9084_s5 + $0x60] ss:$20 sps:$4 sm:$0xff]   ;;  %v8083_v53 = vld [vmem:[%s9084_s5 + $0x1c8] ss:$20 sps:$4 sm:$0xff]  }
 0x6b9   : > { %5975 = vmatprep.subr.bf16.mxu0 %v8031_v57  ;;  %6139 = vmatprep.subr.bf16.mxu1 %v8034_v37  ;;  %v8084_v57 = vld [vmem:[%s9084_s5 + $0x448] ss:$20 sps:$4 sm:$0xff]  }
 0x6ba   : > { %v8086_v37 = vld [vmem:[%s9084_s5 + $0x308] ss:$20 sps:$4 sm:$0xff]  }
 0x6bc   : > { %5976 = vmatpush1.bf16.msra.mxu0 %v8029_v23  ;;  %6140 = vmatpush1.bf16.msra.mxu1 %v8032_v34  ;;  %v8087_v23 = vld [vmem:[%s9084_s5 + $0x1f0] ss:$20 sps:$4 sm:$0xff]  }
 0x6bd   : > { %5977 = vmatprep.subr.bf16.mxu0 %v8037_v40  ;;  %6141 = vmatprep.subr.bf16.mxu1 %v8040_v24  ;;  %v8088_v34 = vld [vmem:[%s9084_s5 + $0x470] ss:$20 sps:$4 sm:$0xff]  }
 0x6be   : > { %v8089_v40 = vld [vmem:[%s9084_s5 + $0xb0] ss:$20 sps:$4 sm:$0xff]  }
 0x6bf   : > { %v8090_v24 = vld [vmem:[%s9084_s5 + $0x330] ss:$20 sps:$4 sm:$0xff]  }
 0x6c0   : > { %5978 = vmatpush1.bf16.msra.mxu0 %v8035_v44  ;;  %6142 = vmatpush1.bf16.msra.mxu1 %v8038_v25  ;;  %v8091_v44 = vld [vmem:[%s9084_s5 + $0x218] ss:$20 sps:$4 sm:$0xff]  }
 0x6c1   : > { %5979 = vmatprep.subr.bf16.mxu0 %v8043_v54  ;;  %6143 = vmatprep.subr.bf16.mxu1 %v8046_v55  ;;  %v8092_v25 = vld [vmem:[%s9084_s5 + $0x498] ss:$20 sps:$4 sm:$0xff]  }
 0x6c2   : > { %v8093_v54 = vld [vmem:[%s9084_s5 + $0xd8] ss:$20 sps:$4 sm:$0xff]  }
 0x6c3   : > { %v8094_v55 = vld [vmem:[%s9084_s5 + $0x358] ss:$20 sps:$4 sm:$0xff]  }
 0x6c4   : > { %5980 = vmatpush1.bf16.msra.mxu0 %v8041_v61  ;;  %6144 = vmatpush1.bf16.msra.mxu1 %v8044_v36  ;;  %v8097_v61 = vld [vmem:[%s9084_s5 + $0x100] ss:$20 sps:$4 sm:$0xff]  }
 0x6c5   : > { %5981 = vmatprep.subr.bf16.mxu0 %v8049_v39  ;;  %6145 = vmatprep.subr.bf16.mxu1 %v8052_v41  ;;  %v8098_v36 = vld [vmem:[%s9084_s5 + $0x380] ss:$20 sps:$4 sm:$0xff]   ;;  %v8099_v39 = vld [vmem:[%s9084_s5 + $0x268] ss:$20 sps:$4 sm:$0xff]  }
 0x6c6   : > { %v8100_v41 = vld [vmem:[%s9084_s5 + $0x4e8] ss:$20 sps:$4 sm:$0xff]  }
 0x6c8   : > { %5982 = vmatpush1.bf16.msra.mxu0 %v8047_v19  ;;  %6146 = vmatpush1.bf16.msra.mxu1 %v8050_v3  ;;  %v8104_v19 = vld [vmem:[%s9084_s5 + $0x8d0] ss:$20 sps:$4 sm:$0xff]  }
 0x6c9   : > { %5983 = vmatprep.subr.bf16.mxu0 %v8055_v4  ;;  %6147 = vmatprep.subr.bf16.mxu1 %v8058_v46  ;;  %v8105_v3 = vld [vmem:[%s9084_s5 + $0x510] ss:$20 sps:$4 sm:$0xff]   ;;  %v8107_v46 = vld [vmem:[%s9084_s5 + $0x678] ss:$20 sps:$4 sm:$0xff]  }
 0x6ca   : > { %v8106_v4 = vld [vmem:[%s9084_s5 + $0x790] ss:$20 sps:$4 sm:$0xff]  }
 0x6cc   : > { %5984 = vmatpush1.bf16.msra.mxu0 %v8053_v42  ;;  %6148 = vmatpush1.bf16.msra.mxu1 %v8056_v51  ;;  %v8111_v42 = vld [vmem:[%s9084_s5 + $0x6a0] ss:$20 sps:$4 sm:$0xff]  }
 0x6cd   : > { %5985 = vmatprep.subr.bf16.mxu0 %v8061_v5  ;;  %6149 = vmatprep.subr.bf16.mxu1 %v8064_v7  ;;  %v8114_v51 = vld [vmem:[%s9084_s5 + $0x7e0] ss:$20 sps:$4 sm:$0xff]   ;;  %v8116_v5 = vld [vmem:[%s9084_s5 + $0x948] ss:$20 sps:$4 sm:$0xff]  }
 0x6ce   : > { %v8118_v7 = vld [vmem:[%s9084_s5 + $0x808] ss:$20 sps:$4 sm:$0xff]  }
 0x6d0   : > { %5986 = vmatpush1.bf16.msra.mxu0 %v8059_v10  ;;  %6150 = vmatpush1.bf16.msra.mxu1 %v8062_v35  ;;  %v8120_v10 = vld [vmem:[%s9084_s5 + $0x970] ss:$20 sps:$4 sm:$0xff]  }
 0x6d1   : > { %5987 = vmatprep.subr.bf16.mxu0 %v8067_v12  ;;  %6151 = vmatprep.subr.bf16.mxu1 %v8070_v14  ;;  %v8121_v35 = vld [vmem:[%s9084_s5 + $0x5b0] ss:$20 sps:$4 sm:$0xff]   ;;  %v8123_v14 = vld [vmem:[%s9084_s5 + $0x718] ss:$20 sps:$4 sm:$0xff]  }
 0x6d2   : > { %v8122_v12 = vld [vmem:[%s9084_s5 + $0x830] ss:$20 sps:$4 sm:$0xff]  }
 0x6d4   : > { %5988 = vmatpush1.bf16.msra.mxu0 %v8065_v52  ;;  %6152 = vmatpush1.bf16.msra.mxu1 %v8068_v16  ;;  %v8125_v52 = vld [vmem:[%s9084_s5 + $0x5d8] ss:$20 sps:$4 sm:$0xff]  }
 0x6d5   : > { %7234 = vmatprep.subr.bf16.mxu0 %v8071_v17  ;;  %7256 = vmatprep.subr.bf16.mxu1 %v8072_v18  ;;  %v8126_v16 = vld [vmem:[%s9084_s5 + $0x858] ss:$20 sps:$4 sm:$0xff]   ;;  %v8127_v17 = vld [vmem:[%s9084_s5 + $0x740] ss:$20 sps:$4 sm:$0xff]  }
 0x6d6   : > { %v8128_v18 = vld [vmem:[%s9084_s5 + $0x9c0] ss:$20 sps:$4 sm:$0xff]  }
 0x6d7   : > { %5990 = vmatmul.mubr.bf16.vlgmr.msra.gmra.mrb[16].mxu0 %v9548_v49  ;;  %6154 = vmatmul.mubr.bf16.vlgmr.msra.gmra.mrb[16].mxu1 %v9548_v49 }
 0x6d8   : > { %7235 = vmatpush3.bf16.msra.mxu0 %v8073_v27  ;;  %6194 = vmatprep.mubr.bf16.mxu0 %v9283_v43  ;;  %v8082_v43 = vld [vmem:[%s9084_s5 + $0x2e0] ss:$20 sps:$4 sm:$0xff]  }
 0x6d9   : > { %7257 = vmatpush3.bf16.msra.mxu1 %v8074_v28  ;;  %6234 = vmatprep.mubr.bf16.mxu1 %v9295_v13  ;;  %v8085_v13 = vld [vmem:[%s9084_s5 + $0x88] ss:$20 sps:$4 sm:$0xff]   ;;  %v8130_v27 = vld [vmem:[%s9084_s5 + $0x880] ss:$20 sps:$4 sm:$0xff]  }
 0x6da   : > { %7236 = vmatprep.subr.bf16.mxu0 %v8075_v59  ;;  %7258 = vmatprep.subr.bf16.mxu1 %v8076_v29  ;;  %v8131_v28 = vld [vmem:[%s9084_s5 + $0x768] ss:$20 sps:$4 sm:$0xff]  }
 0x6db   : > { %v8132_v59 = vld [vmem:[%s9084_s5 + $0x9e8] ss:$20 sps:$4 sm:$0xff]  }
 0x6dc   : > { %7237 = vmatpush3.bf16.msra.mxu0 %v8077_v26  ;;  %v8133_v29 = vld [vmem:[%s9084_s5 + $0x628] ss:$20 sps:$4 sm:$0xff]  }
 0x6dd   : > { %7259 = vmatpush3.bf16.msra.mxu1 %v8078_v30  ;;  %7238 = vmatprep.subr.bf16.mxu0 %v8079_v31  ;;  %v8134_v26 = vld [vmem:[%s9084_s5 + $0x8a8] ss:$20 sps:$4 sm:$0xff]  }
 0x6de   : > { %7260 = vmatprep.subr.bf16.mxu1 %v8080_v32  ;;  %v4143_v30 = vld [vmem:[%s614_s22] sm:$0x1f] }
 0x6df   : > { %v4148_v31 = vrot.slane %v4143_v30, %v9112_v20  ;;  %v4156_v32 = vrot.slane %v4143_v30, %v9144_v6 }
 0x6e0   : > { %7239 = vmatpush3.bf16.msra.mxu0 %v8081_v33  ;;  %v4152_v33 = vrot.slane %v4143_v30, %v9115_v22 }
 0x6e1   : > { %7261 = vmatpush3.bf16.msra.mxu1 %v8082_v43  ;;  %7240 = vmatprep.subr.bf16.mxu0 %v8083_v53  ;;  %v4160_v43 = vrot.slane %v4143_v30, %v9147_v8 }
 0x6e2   : > { %7262 = vmatprep.subr.bf16.mxu1 %v8084_v57 }
 0x6e4   : > { %7241 = vmatpush3.bf16.msra.mxu0 %v8085_v13 }
 0x6e5   : > { %7263 = vmatpush3.bf16.msra.mxu1 %v8086_v37  ;;  %7242 = vmatprep.subr.bf16.mxu0 %v8087_v23 }
 0x6e6   : > { %7264 = vmatprep.subr.bf16.mxu1 %v8088_v34 }
 0x6e8   : > { %7243 = vmatpush3.bf16.msra.mxu0 %v8089_v40 }
 0x6e9   : > { %7265 = vmatpush3.bf16.msra.mxu1 %v8090_v24  ;;  %7244 = vmatprep.subr.bf16.mxu0 %v8091_v44 }
 0x6ea   : > { %7266 = vmatprep.subr.bf16.mxu1 %v8092_v25 }
 0x6ec   : > { %7245 = vmatpush3.bf16.msra.mxu0 %v8093_v54 }
 0x6ed   : > { %7267 = vmatpush3.bf16.msra.mxu1 %v8094_v55  ;;  %7246 = vmatprep.subr.bf16.mxu0 %v8095_v58  ;;  %v4164_v55 = vrot.slane %v4143_v30, %v9433_v63 }
 0x6ee   : > { %7268 = vmatprep.subr.bf16.mxu1 %v8096_v38 }
 0x6f0   : > { %7247 = vmatpush3.bf16.msra.mxu0 %v8097_v61 }
 0x6f1   : > { %7269 = vmatpush3.bf16.msra.mxu1 %v8098_v36  ;;  %7248 = vmatprep.subr.bf16.mxu0 %v8099_v39 }
 0x6f2   : > { %7270 = vmatprep.subr.bf16.mxu1 %v8100_v41 }
 0x6f4   : > { %7249 = vmatpush3.bf16.msra.mxu0 %v8101_v0 }
 0x6f5   : > { %7271 = vmatpush3.bf16.msra.mxu1 %v8102_v1  ;;  %7278 = vmatprep.subr.bf16.mxu0 %v8103_v2 }
 0x6f6   : > { %7300 = vmatprep.subr.bf16.mxu1 %v8104_v19 }
 0x6f7   : > { %6195 = vmatmul.mubr.bf16.vlgmr.msra.gmra.mrb[20].mxu0 %v9287_v11  ;;  %v8112_v11 = vld [vmem:[%s9084_s5 + $0x920] ss:$20 sps:$4 sm:$0xff]  }
 0x6f8   : > { %6235 = vmatmul.mubr.bf16.vlgmr.msra.gmra.mrb[20].mxu1 %v9366_v56  ;;  %7279 = vmatpush3.bf16.msra.mxu0 %v8105_v3  ;;  %v8113_v56 = vld [vmem:[%s9084_s5 + $0x560] ss:$20 sps:$4 sm:$0xff]  }
 0x6f9   : > { %6274 = vmatprep.mubr.bf16.mxu0 %v9469_v45  ;;  %7301 = vmatpush3.bf16.msra.mxu1 %v8106_v4  ;;  %v8115_v45 = vld [vmem:[%s9084_s5 + $0x6c8] ss:$20 sps:$4 sm:$0xff]  }
 0x6fa   : > { %6314 = vmatprep.mubr.bf16.mxu1 %v9481_v62  ;;  %7280 = vmatprep.subr.bf16.mxu0 %v8107_v46  ;;  %v8117_v62 = vld [vmem:[%s9084_s5 + $0x588] ss:$20 sps:$4 sm:$0xff]  }
 0x6fb   : > { %7302 = vmatprep.subr.bf16.mxu1 %v8108_v47 }
 0x6fc   : > { %7281 = vmatpush3.bf16.msra.mxu0 %v8109_v48 }
 0x6fd   : > { %7303 = vmatpush3.bf16.msra.mxu1 %v8110_v50  ;;  %7282 = vmatprep.subr.bf16.mxu0 %v8111_v42 }
 0x6fe   : > { %7304 = vmatprep.subr.bf16.mxu1 %v8112_v11 }
 0x700   : > { %7283 = vmatpush3.bf16.msra.mxu0 %v8113_v56 }
 0x701   : > { %7305 = vmatpush3.bf16.msra.mxu1 %v8114_v51  ;;  %7284 = vmatprep.subr.bf16.mxu0 %v8115_v45 }
 0x702   : > { %7306 = vmatprep.subr.bf16.mxu1 %v8116_v5 }
 0x704   : > { %7285 = vmatpush3.bf16.msra.mxu0 %v8117_v62 }
 0x705   : > { %7307 = vmatpush3.bf16.msra.mxu1 %v8118_v7  ;;  %7286 = vmatprep.subr.bf16.mxu0 %v8119_v9 }
 0x706   : > { %7308 = vmatprep.subr.bf16.mxu1 %v8120_v10 }
 0x708   : > { %7287 = vmatpush3.bf16.msra.mxu0 %v8121_v35 }
 0x709   : > { %7309 = vmatpush3.bf16.msra.mxu1 %v8122_v12  ;;  %7288 = vmatprep.subr.bf16.mxu0 %v8123_v14 }
 0x70a   : > { %7310 = vmatprep.subr.bf16.mxu1 %v8124_v15 }
 0x70c   : > { %7289 = vmatpush3.bf16.msra.mxu0 %v8125_v52 }
 0x70d   : > { %7311 = vmatpush3.bf16.msra.mxu1 %v8126_v16  ;;  %7290 = vmatprep.subr.bf16.mxu0 %v8127_v17 }
 0x70e   : > { %7312 = vmatprep.subr.bf16.mxu1 %v8128_v18 }
 0x710   : > { %7291 = vmatpush3.bf16.msra.mxu0 %v8129_v21 }
 0x711   : > { %7313 = vmatpush3.bf16.msra.mxu1 %v8130_v27  ;;  %7292 = vmatprep.subr.bf16.mxu0 %v8131_v28 }
 0x712   : > { %7314 = vmatprep.subr.bf16.mxu1 %v8132_v59 }
 0x714   : > { %7293 = vmatpush3.bf16.msra.mxu0 %v8133_v29 }
 0x715   : > { %7315 = vmatpush3.bf16.msra.mxu1 %v8134_v26 }
 0x717   : > { %6275 = vmatmul.mubr.bf16.vlgmr.msra.gmra.mrb[24].mxu0 %v9473_v60 }
 0x718   : > { %6315 = vmatmul.mubr.bf16.vlgmr.msra.gmra.mrb[24].mxu1 %v9548_v49 }
 0x7aa   : > { %v5991_v60 = vpop.f32.mrb[16].mxu0  ;;  %v6155_v49 = vpop.f32.mrb[16].mxu1 }
 0x7ab   : > { %v7342_v53 = vadd.f32 %v5991_v60, %v4148_v31  ;;  %v7344_v57 = vadd.f32 %v6155_v49, %v4156_v32  ;;  %v5993_v13 = vpop.f32.mrb[17].mxu0  ;;  %v6157_v37 = vpop.f32.mrb[17].mxu1 }
 0x7ac   : > { %v7343_v23 = vadd.f32 %v5993_v13, %v4152_v33  ;;  %v7345_v34 = vadd.f32 %v6157_v37, %v4160_v43  ;;  %v5995_v20 = vpop.f32.mrb[18].mxu0  ;;  %v6159_v40 = vpop.f32.mrb[18].mxu1 }
 0x7ad   : > { %8163 = vtanh.f32 %v7342_v53  ;;  %v5996_v6 = vpop.f32.mrb[19].mxu0  ;;  %v6160_v22 = vpop.f32.mrb[19].mxu1 }
 0x7ae   : > { %8165 = vtanh.f32 %v7344_v57 }
 0x7af   : > { %8167 = vtanh.f32 %v7343_v23 }
 0x7b0   : > { %8169 = vtanh.f32 %v7345_v34 }
 0x7b7   : > { %v8164_v8 = vpop.eup %8163 }
 0x7b8   : > { %v8166_v24 = vpop.eup %8165  ;;  %6327 = vst [vmem:[%s9637_s1] sm:$0xff] %v8164_v8 }
 0x7b9   : > { %v8168_v44 = vpop.eup %8167  ;;  %6329 = vst [vmem:[%s9637_s1 + $0x10] sm:$0xff] %v8166_v24 }
 0x7ba   : > { %v8170_v25 = vpop.eup %8169  ;;  %6328 = vst [vmem:[%s9637_s1 + $0x8] sm:$0xff] %v8168_v44 }
 0x7bb   : > { %6330 = vst [vmem:[%s9637_s1 + $0x18] sm:$0xff] %v8170_v25 }
 0x7ca   : > { %v7250_v54 = vpop.f32.mrb[20].mxu0 }
 0x7cb   : > { %v7272_v58 = vpop.f32.mrb[20].mxu1  ;;  %v7251_v38 = vpop.f32.mrb[21].mxu0 }
 0x7cc   : > { %v7252_v61 = vadd.f32 %v7251_v38, %v7250_v54  ;;  %v7273_v36 = vpop.f32.mrb[21].mxu1  ;;  %v7253_v39 = vpop.f32.mrb[22].mxu0 }
 0x7cd   : > { %v7274_v41 = vadd.f32 %v7273_v36, %v7272_v58  ;;  %v7275_v0 = vpop.f32.mrb[22].mxu1  ;;  %v7254_v1 = vpop.f32.mrb[23].mxu0 }
 0x7ce   : > { %v6197_v2 = vadd.f32 %v7252_v61, %v4164_v55  ;;  %v7276_v19 = vpop.f32.mrb[23].mxu1 }
 0x7d0   : > { %v6237_v3 = vadd.f32 %v7274_v41, %v6197_v2 }
 0x7ea   : > { %v7294_v4 = vpop.f32.mrb[24].mxu0 }
 0x7eb   : > { %v7316_v46 = vpop.f32.mrb[24].mxu1  ;;  %v7295_v47 = vpop.f32.mrb[25].mxu0 }
 0x7ec   : > { %v7296_v48 = vadd.f32 %v7295_v47, %v7294_v4  ;;  %v7317_v50 = vpop.f32.mrb[25].mxu1  ;;  %v7297_v42 = vpop.f32.mrb[26].mxu0 }
 0x7ed   : > { %v7318_v11 = vadd.f32 %v7317_v50, %v7316_v46  ;;  %v7319_v63 = vpop.f32.mrb[26].mxu1  ;;  %v7298_v56 = vpop.f32.mrb[27].mxu0 }
 0x7ee   : > { %v6277_v51 = vadd.f32 %v7296_v48, %v6237_v3  ;;  %v7320_v45 = vpop.f32.mrb[27].mxu1 }
 0x7f0   : > { %v6317_v5 = vadd.f32 %v7318_v11, %v6277_v51 }
 0x7f2   : > { %8171 = vtanh.f32 %v6317_v5 }
 0x7fc   : > { %v8172_v62 = vpop.eup %8171 }
 0x7fd   : > { %6331 = vst [vmem:[%s9637_s1 + $0x20] sm:$0xff] %v8172_v62 }
 0x7fe PF: > { %p30_p10 = scmp.ge.s32.totalorder %s8854_s14, 7   ;;  %s9740_s29 = smov %s8593_s30 }
 0x7ff   : > { %s9741_s30 = smov %s8597_s15  ;;  %s9742_s15 = smov %s8865_s2 }
 0x800   : > { %s9743_s16 = smov %s8854_s14  ;;  %32 = sbr.rel (!%p30_p10) target bundleno = 23 (0x17), region = 172 }
 0x807   :  { %6354 = vsyncpa [#allocation3], 1 }
 0x808   :  { %6356 = vsyncpa [#allocation3 + $0x1], 1 }
 0x809   :  { %6357 = vsyncpa [#allocation5], 1 }
 0x80a   :  { %6358 = vsyncpa [#allocation8], 1 }
 0x80b   :  { %6359 = vsyncpa [#allocation11], 1 }
 0x80c   :  { %6360 = vsyncpa [#allocation14], 1 }
 0x80d   :  { %6361 = vsyncpa [#allocation17], 1 }
 0x80e   :  { %6362 = vsyncpa [#allocation20], 1 }
 0x80f   :  { %6364 = vsyncpa [#allocation20 + $0x1], 1 }

</bundles_post_ra>
